<compile_context>
chip_gen: v6e
topology: v6e:2x2x1
jax: 0.10.0
libtpu: 0.0.40
codegen_flags: <defaults>
</compile_context>

<pallas_src>
import math

import jax
import jax.numpy as jnp
from jax import lax
from jax.experimental import pallas as pl
from jax.experimental.pallas import tpu as pltpu


_SQRT_HALF = 0.7071067811865476
_LANE = 128


def _round_up(v, m):
    return (v + m - 1) // m * m


def _gelu_exact(x):
    # torch.nn.GELU() (erf formulation) via Abramowitz & Stegun 7.1.26
    # (|err| <= 1.5e-7).  Built from abs/exp/mul/add/select + pl.reciprocal so it
    # lowers cleanly in Mosaic; the divide is routed through pl.reciprocal.
    p = 0.3275911
    a1, a2, a3, a4, a5 = (0.254829592, -0.284496736, 1.421413741,
                          -1.453152027, 1.061405429)
    u = x * _SQRT_HALF
    z = jnp.abs(u)
    t = pl.reciprocal(1.0 + p * z, approx=False)   # exact: tolerance-critical
    poly = ((((a5 * t + a4) * t + a3) * t + a2) * t + a1) * t
    y = 1.0 - poly * jnp.exp(-z * z)
    erf = jnp.where(u < 0.0, -y, y)
    return x * (0.5 + 0.5 * erf)


def _make_mlp_kernel(rem_last):
    """rem_last: number of valid image rows in the (possibly ragged) last tile."""

    def kernel(x_main_ref, x_top_ref, x_bot_ref,
               w1_ref, b1_ref, wd_ref, bd_ref, w2_ref, b2_ref,
               o_ref, hbuf):
        # x_main_ref: (1, TH, W, C_in)  rows [t*TH, t*TH+TH) of image n
        # x_top_ref:  (1, 1,  W, C_in)  row t*TH-1   (clamped)
        # x_bot_ref:  (1, 1,  W, C_in)  row t*TH+TH  (clamped)
        # w1_ref: (C_in, C_hid) act dtype     b1_ref: (1, C_hid) f32
        # wd_ref: (3, 3, C_hid) f32           bd_ref: (1, C_hid) f32
        # w2_ref: (C_hid, C_out) act dtype    b2_ref: (1, C_out) f32
        # o_ref:  (1, TH, W, C_out)
        # hbuf:   (TH+2, W, C_hid) act-dtype scratch (hidden activation + row halo)
        f32 = jnp.float32
        TH = x_main_ref.shape[1]
        W = x_main_ref.shape[2]
        Cin = x_main_ref.shape[3]
        Ch = w1_ref.shape[1]
        Cout = w2_ref.shape[1]
        in_dt = x_main_ref.dtype

        t = pl.program_id(1)
        last = pl.num_programs(1) - 1

        # ---- fc1: 1x1 conv == one MXU matmul over main rows + 1-row halos ----
        # Operands stay in the activation dtype (bf16 models use the bf16 MXU);
        # accumulation is f32 via preferred_element_type.
        x_all = jnp.concatenate(
            [x_top_ref[0], x_main_ref[0], x_bot_ref[0]], axis=0)  # (TH+2, W, Cin)
        h = jnp.dot(x_all.reshape((TH + 2) * W, Cin), w1_ref[...],
                    preferred_element_type=f32) + b1_ref[...]     # (.., Ch) f32

        # Single aligned store of the hidden activation (+halo rows) into VMEM.
        hbuf[...] = h.reshape(TH + 2, W, Ch).astype(hbuf.dtype)

        # Rows outside the image are the depthwise conv's zero padding; fc1 of a
        # clamped/garbage row is b1 != 0, so overwrite them (boundary tiles only).
        @pl.when(t == 0)
        def _():
            hbuf[pl.ds(0, 1), :, :] = jnp.zeros((1, W, Ch), hbuf.dtype)

        @pl.when(t == last)
        def _():
            # bottom halo row + any ragged rows past H on the last tile
            n_zero = TH + 1 - rem_last
            hbuf[pl.ds(rem_last + 1, n_zero), :, :] = jnp.zeros(
                (n_zero, W, Ch), hbuf.dtype)

        # ---- 3x3 depthwise conv: 3 aligned band loads + 9 VPU FMAs -----------
        wd = wd_ref[...]                                  # (3, 3, Ch) f32
        zcol = jnp.zeros((TH, 1, Ch), f32)
        acc = jnp.zeros((TH, W, Ch), f32)
        for dh in range(3):
            band = hbuf[pl.ds(dh, TH), :, :].astype(f32)  # (TH, W, Ch)
            # left  tap needs column j-1 (zero at j=0), right tap j+1 (zero at j=W-1)
            left = jnp.concatenate([zcol, band[:, :W - 1, :]], axis=1)
            right = jnp.concatenate([band[:, 1:, :], zcol], axis=1)
            acc = (acc
                   + left * wd[dh, 0].reshape(1, 1, Ch)
                   + band * wd[dh, 1].reshape(1, 1, Ch)
                   + right * wd[dh, 2].reshape(1, 1, Ch))
        acc = acc + bd_ref[...].reshape(1, 1, Ch)

        # ---- exact GELU (erf form, as in torch.nn.GELU) -----------------------
        h_act = _gelu_exact(acc)

        # ---- fc2: 1x1 conv == MXU matmul, then store --------------------------
        out = jnp.dot(h_act.reshape(TH * W, Ch).astype(in_dt), w2_ref[...],
                      preferred_element_type=f32) + b2_ref[...]
        o_ref[0] = out.reshape(TH, W, Cout).astype(o_ref.dtype)

    return kernel


def mlp_pallas(x_nchw, w1, b1, wd, bd, w2, b2, *,
               block_rows=None, vmem_budget_bytes=20 * 1024 * 1024):
    """Fused Mlp forward: fc1(1x1) -> DWConv(3x3, groups=C) -> GELU -> fc2(1x1).

    x_nchw: (N, C_in, H, W)
    w1: (C_hid, C_in, 1, 1), b1: (C_hid,)
    wd: (C_hid, 1, 3, 3),   bd: (C_hid,)
    w2: (C_out, C_hid, 1, 1), b2: (C_out,)
    returns (N, C_out, H, W).  Dropout (p=0.0 / eval) is the identity.
    """
    N, C_in, H, W = x_nchw.shape
    C_hid = w1.shape[0]
    C_out = w2.shape[0]
    dt = x_nchw.dtype
    act_bytes = jnp.dtype(dt).itemsize

    # Lane-dense channel counts (channels sit on the 128-lane axis inside the
    # kernel; hidden-channel padding is free since the hidden never hits HBM).
    Cin_p = _round_up(C_in, _LANE)
    Ch_p = _round_up(C_hid, _LANE)
    Cout_p = _round_up(C_out, _LANE)

    # ---- row-tile height from an explicit VMEM budget -------------------------
    # Budget is chosen to stay well under 32 MiB scoped VMEM, which is safe on
    # v7x (64 MiB physical), v6e and v5e (after raising the 16 MiB default).
    if block_rows is None:
        fixed = (2 * (Cin_p * Ch_p + Ch_p * Cout_p) * act_bytes   # dbl-buffered fc weights
                 + 4 * 12 * Ch_p * 4)                             # dw weights + biases
        per_row = W * (2 * Cin_p * act_bytes        # dbl-buffered input tile
                       + 2 * Cout_p * act_bytes     # dbl-buffered output tile
                       + Ch_p * act_bytes           # hidden scratch (hbuf)
                       + 6 * Ch_p * 4)              # f32 temporaries headroom
        block_rows = max(1, (vmem_budget_bytes - fixed) // per_row)
    TH = int(min(H, block_rows))
    T = -(-H // TH)                       # cdiv: ragged last tile allowed
    rem_last = H - (T - 1) * TH           # valid rows in the last tile

    # ---- layout plumbing (NCHW -> NHWC, pad channels to lane multiples) -------
    x = jnp.transpose(x_nchw, (0, 2, 3, 1))                       # (N, H, W, C_in)
    if Cin_p != C_in:
        x = jnp.pad(x, ((0, 0), (0, 0), (0, 0), (0, Cin_p - C_in)))

    w1_t = jnp.pad(jnp.transpose(w1[:, :, 0, 0], (1, 0)).astype(dt),
                   ((0, Cin_p - C_in), (0, Ch_p - C_hid)))        # (Cin_p, Ch_p)
    w2_t = jnp.pad(jnp.transpose(w2[:, :, 0, 0], (1, 0)).astype(dt),
                   ((0, Ch_p - C_hid), (0, Cout_p - C_out)))      # (Ch_p, Cout_p)
    wd_t = jnp.pad(jnp.transpose(wd[:, 0, :, :], (1, 2, 0)).astype(jnp.float32),
                   ((0, 0), (0, 0), (0, Ch_p - C_hid)))           # (3, 3, Ch_p)
    b1_p = jnp.pad(b1.astype(jnp.float32), (0, Ch_p - C_hid)).reshape(1, Ch_p)
    bd_p = jnp.pad(bd.astype(jnp.float32), (0, Ch_p - C_hid)).reshape(1, Ch_p)
    b2_p = jnp.pad(b2.astype(jnp.float32), (0, Cout_p - C_out)).reshape(1, Cout_p)

    # Main row tile + two clamped 1-row halo views of the same NHWC input.
    x_main_spec = pl.BlockSpec((1, TH, W, Cin_p), lambda n, t: (n, t, 0, 0))
    x_top_spec = pl.BlockSpec(
        (1, 1, W, Cin_p), lambda n, t: (n, jnp.maximum(t * TH - 1, 0), 0, 0))
    x_bot_spec = pl.BlockSpec(
        (1, 1, W, Cin_p), lambda n, t: (n, jnp.minimum((t + 1) * TH, H - 1), 0, 0))

    out_nhwc = pl.pallas_call(
        _make_mlp_kernel(rem_last),
        out_shape=jax.ShapeDtypeStruct((N, H, W, Cout_p), dt),
        grid_spec=pltpu.PrefetchScalarGridSpec(
            num_scalar_prefetch=0,
            grid=(N, T),
            in_specs=[
                x_main_spec, x_top_spec, x_bot_spec,
                pl.BlockSpec((Cin_p, Ch_p), lambda n, t: (0, 0)),
                pl.BlockSpec((1, Ch_p), lambda n, t: (0, 0)),
                pl.BlockSpec((3, 3, Ch_p), lambda n, t: (0, 0, 0)),
                pl.BlockSpec((1, Ch_p), lambda n, t: (0, 0)),
                pl.BlockSpec((Ch_p, Cout_p), lambda n, t: (0, 0)),
                pl.BlockSpec((1, Cout_p), lambda n, t: (0, 0)),
            ],
            out_specs=pl.BlockSpec((1, TH, W, Cout_p), lambda n, t: (n, t, 0, 0)),
            scratch_shapes=[pltpu.VMEM((TH + 2, W, Ch_p), dt)],
        ),
        compiler_params=pltpu.CompilerParams(
            dimension_semantics=("parallel", "parallel"),
            vmem_limit_bytes=32 * 1024 * 1024),
    )(x, x, x, w1_t, b1_p, wd_t, bd_p, w2_t, b2_p)

    out_nhwc = out_nhwc[..., :C_out]
    return jnp.transpose(out_nhwc, (0, 3, 1, 2))                  # back to NCHW


def mlp_reference(x, w1, b1, wd, bd, w2, b2):
    """Pure-JAX/XLA reference for the PyTorch Mlp forward (eval mode)."""
    dn = ("NCHW", "OIHW", "NCHW")
    hp = lax.Precision.HIGHEST
    C_hid = w1.shape[0]
    h = lax.conv_general_dilated(x, w1, (1, 1), "VALID", dimension_numbers=dn,
                                 precision=hp) + b1.reshape(1, -1, 1, 1)
    h = lax.conv_general_dilated(h, wd, (1, 1), ((1, 1), (1, 1)),
                                 dimension_numbers=dn, feature_group_count=C_hid,
                                 precision=hp) + bd.reshape(1, -1, 1, 1)
    h = jax.nn.gelu(h, approximate=False)
    out = lax.conv_general_dilated(h, w2, (1, 1), "VALID", dimension_numbers=dn,
                                   precision=hp) + b2.reshape(1, -1, 1, 1)
    return out


if __name__ == "__main__":
    key = jax.random.PRNGKey(0)
    kx, k1, k2, k3, k4, k5, k6 = jax.random.split(key, 7)

    # Small shapes consistent with Mlp(in_features=32, hidden_features=64).
    N, C_in, H, W = 2, 32, 16, 16
    C_hid, C_out = 64, 32

    x = jax.random.normal(kx, (N, C_in, H, W), dtype=jnp.float32)

    # Conv2d-style init (weight ~ N(0, sqrt(2/fan_out))); small nonzero biases so
    # the bias paths are actually exercised.
    w1 = jax.random.normal(k1, (C_hid, C_in, 1, 1), jnp.float32) * math.sqrt(2.0 / C_hid)
    b1 = jax.random.normal(k2, (C_hid,), jnp.float32) * 0.02
    wd = jax.random.normal(k3, (C_hid, 1, 3, 3), jnp.float32) * math.sqrt(2.0 / 9.0)
    bd = jax.random.normal(k4, (C_hid,), jnp.float32) * 0.02
    w2 = jax.random.normal(k5, (C_out, C_hid, 1, 1), jnp.float32) * math.sqrt(2.0 / C_out)
    b2 = jax.random.normal(k6, (C_out,), jnp.float32) * 0.02

    out = mlp_pallas(x, w1, b1, wd, bd, w2, b2)
    out = jax.block_until_ready(out)

    ref = mlp_reference(x, w1, b1, wd, bd, w2, b2)
    assert out.shape == (N, C_out, H, W)
    max_err = float(jnp.max(jnp.abs(out - ref)))
    assert jnp.allclose(out, ref, atol=1e-3, rtol=1e-3), (
        f"mismatch vs reference (max abs err {max_err:.3e})")

    print("KERNEL_OK")
</pallas_src>

<mosaic_0001>
module attributes {stable_mosaic.version = 11 : i64} {
  func.func @kernel(%arg0: i32, %arg1: i32, %arg2: memref<1x16x16x128xf32, #tpu.memory_space<vmem>>, %arg3: memref<1x1x16x128xf32, #tpu.memory_space<vmem>>, %arg4: memref<1x1x16x128xf32, #tpu.memory_space<vmem>>, %arg5: memref<128x128xf32, #tpu.memory_space<vmem>>, %arg6: memref<1x128xf32, #tpu.memory_space<vmem>>, %arg7: memref<3x3x128xf32, #tpu.memory_space<vmem>>, %arg8: memref<1x128xf32, #tpu.memory_space<vmem>>, %arg9: memref<128x128xf32, #tpu.memory_space<vmem>>, %arg10: memref<1x128xf32, #tpu.memory_space<vmem>>, %arg11: memref<1x16x16x128xf32, #tpu.memory_space<vmem>>, %arg12: memref<18x16x128xf32, #tpu.memory_space<vmem>>) attributes {dimension_semantics = [#tpu.dimension_semantics<parallel>, #tpu.dimension_semantics<parallel>], iteration_bounds = array<i64: 2, 1>, scalar_prefetch = 0 : i64, scratch_operands = 1 : i64, tpu.core_type = #tpu.core_type<tc>, window_params = [{transform_indices = @transform_0, window_bounds = array<i64: 1, 16, 16, 128>}, {transform_indices = @transform_1, window_bounds = array<i64: 1, 1, 16, 128>}, {transform_indices = @transform_2, window_bounds = array<i64: 1, 1, 16, 128>}, {pipeline_mode = #tpu.pipeline_mode<synchronous>, transform_indices = @transform_3, window_bounds = array<i64: 128, 128>}, {pipeline_mode = #tpu.pipeline_mode<synchronous>, transform_indices = @transform_4, window_bounds = array<i64: 1, 128>}, {pipeline_mode = #tpu.pipeline_mode<synchronous>, transform_indices = @transform_5, window_bounds = array<i64: 3, 3, 128>}, {pipeline_mode = #tpu.pipeline_mode<synchronous>, transform_indices = @transform_6, window_bounds = array<i64: 1, 128>}, {pipeline_mode = #tpu.pipeline_mode<synchronous>, transform_indices = @transform_7, window_bounds = array<i64: 128, 128>}, {pipeline_mode = #tpu.pipeline_mode<synchronous>, transform_indices = @transform_8, window_bounds = array<i64: 1, 128>}, {transform_indices = @transform_9, window_bounds = array<i64: 1, 16, 16, 128>}]} {
    %c0 = arith.constant 0 : index
    %c0_0 = arith.constant 0 : index
    %c0_1 = arith.constant 0 : index
    %c0_2 = arith.constant 0 : index
    %0 = vector.load %arg3[%c0, %c0_0, %c0_1, %c0_2] : memref<1x1x16x128xf32, #tpu.memory_space<vmem>>, vector<1x1x16x128xf32>
    %1 = vector.shape_cast %0 : vector<1x1x16x128xf32> to vector<1x16x128xf32>
    %c0_3 = arith.constant 0 : index
    %c0_4 = arith.constant 0 : index
    %c0_5 = arith.constant 0 : index
    %c0_6 = arith.constant 0 : index
    %2 = vector.load %arg2[%c0_3, %c0_4, %c0_5, %c0_6] : memref<1x16x16x128xf32, #tpu.memory_space<vmem>>, vector<1x16x16x128xf32>
    %3 = vector.shape_cast %2 : vector<1x16x16x128xf32> to vector<16x16x128xf32>
    %c0_7 = arith.constant 0 : index
    %c0_8 = arith.constant 0 : index
    %c0_9 = arith.constant 0 : index
    %c0_10 = arith.constant 0 : index
    %4 = vector.load %arg4[%c0_7, %c0_8, %c0_9, %c0_10] : memref<1x1x16x128xf32, #tpu.memory_space<vmem>>, vector<1x1x16x128xf32>
    %5 = vector.shape_cast %4 : vector<1x1x16x128xf32> to vector<1x16x128xf32>
    %6 = tpu.concatenate %1, %3, %5 in 0 : vector<1x16x128xf32>, vector<16x16x128xf32>, vector<1x16x128xf32> -> vector<18x16x128xf32>
    %7 = vector.shape_cast %6 : vector<18x16x128xf32> to vector<288x128xf32>
    %c0_11 = arith.constant 0 : index
    %c0_12 = arith.constant 0 : index
    %8 = vector.load %arg5[%c0_11, %c0_12] : memref<128x128xf32, #tpu.memory_space<vmem>>, vector<128x128xf32>
    %cst = arith.constant dense<0.000000e+00> : vector<288x128xf32>
    %9 = tpu.matmul %7, %8, %cst {dimension_numbers = #tpu.dot_dimension_numbers<[1], [0], [0], [1], [0, 0, 1, 1], [], []>} : vector<288x128xf32>, vector<128x128xf32>, vector<288x128xf32> -> vector<288x128xf32>
    %c0_13 = arith.constant 0 : index
    %c0_14 = arith.constant 0 : index
    %10 = vector.load %arg6[%c0_13, %c0_14] : memref<1x128xf32, #tpu.memory_space<vmem>>, vector<1x128xf32>
    %11 = vector.broadcast %10 : vector<1x128xf32> to vector<288x128xf32>
    %12 = arith.addf %9, %11 : vector<288x128xf32>
    %13 = vector.shape_cast %12 : vector<288x128xf32> to vector<18x16x128xf32>
    %c0_15 = arith.constant 0 : index
    %c0_16 = arith.constant 0 : index
    %c0_17 = arith.constant 0 : index
    %14 = vector.load %arg12[%c0_15, %c0_16, %c0_17] : memref<18x16x128xf32, #tpu.memory_space<vmem>>, vector<18x16x128xf32>
    tpu.vector_store %arg12[%c0_15, %c0_16, %c0_17], %13 {strides = array<i32>} : memref<18x16x128xf32, #tpu.memory_space<vmem>>, vector<18x16x128xf32>,
    %c0_i32 = arith.constant 0 : i32
    %15 = arith.cmpi eq, %arg1, %c0_i32 : i32
    %16 = arith.extui %15 : i1 to i32
    %c0_i32_18 = arith.constant 0 : i32
    %17 = arith.cmpi ne, %16, %c0_i32_18 : i32
    scf.if %17 {
      %cst_58 = arith.constant 0.000000e+00 : f32
      %146 = vector.broadcast %cst_58 : f32 to vector<1x16x128xf32>
      %c0_59 = arith.constant 0 : index
      %c0_60 = arith.constant 0 : index
      %c0_61 = arith.constant 0 : index
      %147 = vector.load %arg12[%c0_59, %c0_60, %c0_61] : memref<18x16x128xf32, #tpu.memory_space<vmem>>, vector<1x16x128xf32>
      tpu.vector_store %arg12[%c0_59, %c0_60, %c0_61], %146 {strides = array<i32>} : memref<18x16x128xf32, #tpu.memory_space<vmem>>, vector<1x16x128xf32>,
    } else {
    }
    %c0_i32_19 = arith.constant 0 : i32
    %18 = arith.cmpi eq, %arg1, %c0_i32_19 : i32
    %19 = arith.extui %18 : i1 to i32
    %c0_i32_20 = arith.constant 0 : i32
    %20 = arith.cmpi ne, %19, %c0_i32_20 : i32
    scf.if %20 {
      %cst_58 = arith.constant 0.000000e+00 : f32
      %146 = vector.broadcast %cst_58 : f32 to vector<1x16x128xf32>
      %c17 = arith.constant 17 : index
      %c0_59 = arith.constant 0 : index
      %c0_60 = arith.constant 0 : index
      %147 = vector.load %arg12[%c17, %c0_59, %c0_60] : memref<18x16x128xf32, #tpu.memory_space<vmem>>, vector<1x16x128xf32>
      tpu.vector_store %arg12[%c17, %c0_59, %c0_60], %146 {strides = array<i32>} : memref<18x16x128xf32, #tpu.memory_space<vmem>>, vector<1x16x128xf32>,
    } else {
    }
    %c0_21 = arith.constant 0 : index
    %c0_22 = arith.constant 0 : index
    %c0_23 = arith.constant 0 : index
    %21 = vector.load %arg7[%c0_21, %c0_22, %c0_23] : memref<3x3x128xf32, #tpu.memory_space<vmem>>, vector<3x3x128xf32>
    %cst_24 = arith.constant 0.000000e+00 : f32
    %22 = vector.broadcast %cst_24 : f32 to vector<16x1x128xf32>
    %cst_25 = arith.constant 0.000000e+00 : f32
    %23 = vector.broadcast %cst_25 : f32 to vector<16x16x128xf32>
    %c0_26 = arith.constant 0 : index
    %c0_27 = arith.constant 0 : index
    %c0_28 = arith.constant 0 : index
    %24 = vector.load %arg12[%c0_26, %c0_27, %c0_28] : memref<18x16x128xf32, #tpu.memory_space<vmem>>, vector<16x16x128xf32>
    %25 = vector.extract_strided_slice %24 {offsets = [0, 0, 0], sizes = [16, 15, 128], strides = [1, 1, 1]} : vector<16x16x128xf32> to vector<16x15x128xf32>
    %26 = tpu.concatenate %22, %25 in 1 : vector<16x1x128xf32>, vector<16x15x128xf32> -> vector<16x16x128xf32>
    %27 = vector.extract_strided_slice %24 {offsets = [0, 1, 0], sizes = [16, 15, 128], strides = [1, 1, 1]} : vector<16x16x128xf32> to vector<16x15x128xf32>
    %28 = tpu.concatenate %27, %22 in 1 : vector<16x15x128xf32>, vector<16x1x128xf32> -> vector<16x16x128xf32>
    %29 = vector.extract_strided_slice %21 {offsets = [0, 0, 0], sizes = [1, 1, 128], strides = [1, 1, 1]} : vector<3x3x128xf32> to vector<1x1x128xf32>
    %30 = vector.shape_cast %29 : vector<1x1x128xf32> to vector<128xf32>
    %31 = vector.shape_cast %30 : vector<128xf32> to vector<1x1x128xf32>
    %32 = vector.broadcast %31 : vector<1x1x128xf32> to vector<16x16x128xf32>
    %33 = arith.mulf %26, %32 : vector<16x16x128xf32>
    %34 = arith.addf %23, %33 : vector<16x16x128xf32>
    %35 = vector.extract_strided_slice %21 {offsets = [0, 1, 0], sizes = [1, 1, 128], strides = [1, 1, 1]} : vector<3x3x128xf32> to vector<1x1x128xf32>
    %36 = vector.shape_cast %35 : vector<1x1x128xf32> to vector<128xf32>
    %37 = vector.shape_cast %36 : vector<128xf32> to vector<1x1x128xf32>
    %38 = vector.broadcast %37 : vector<1x1x128xf32> to vector<16x16x128xf32>
    %39 = arith.mulf %24, %38 : vector<16x16x128xf32>
    %40 = arith.addf %34, %39 : vector<16x16x128xf32>
    %41 = vector.extract_strided_slice %21 {offsets = [0, 2, 0], sizes = [1, 1, 128], strides = [1, 1, 1]} : vector<3x3x128xf32> to vector<1x1x128xf32>
    %42 = vector.shape_cast %41 : vector<1x1x128xf32> to vector<128xf32>
    %43 = vector.shape_cast %42 : vector<128xf32> to vector<1x1x128xf32>
    %44 = vector.broadcast %43 : vector<1x1x128xf32> to vector<16x16x128xf32>
    %45 = arith.mulf %28, %44 : vector<16x16x128xf32>
    %46 = arith.addf %40, %45 : vector<16x16x128xf32>
    %c1 = arith.constant 1 : index
    %c0_29 = arith.constant 0 : index
    %c0_30 = arith.constant 0 : index
    %47 = vector.load %arg12[%c1, %c0_29, %c0_30] : memref<18x16x128xf32, #tpu.memory_space<vmem>>, vector<16x16x128xf32>
    %48 = vector.extract_strided_slice %47 {offsets = [0, 0, 0], sizes = [16, 15, 128], strides = [1, 1, 1]} : vector<16x16x128xf32> to vector<16x15x128xf32>
    %49 = tpu.concatenate %22, %48 in 1 : vector<16x1x128xf32>, vector<16x15x128xf32> -> vector<16x16x128xf32>
    %50 = vector.extract_strided_slice %47 {offsets = [0, 1, 0], sizes = [16, 15, 128], strides = [1, 1, 1]} : vector<16x16x128xf32> to vector<16x15x128xf32>
    %51 = tpu.concatenate %50, %22 in 1 : vector<16x15x128xf32>, vector<16x1x128xf32> -> vector<16x16x128xf32>
    %52 = vector.extract_strided_slice %21 {offsets = [1, 0, 0], sizes = [1, 1, 128], strides = [1, 1, 1]} : vector<3x3x128xf32> to vector<1x1x128xf32>
    %53 = vector.shape_cast %52 : vector<1x1x128xf32> to vector<128xf32>
    %54 = vector.shape_cast %53 : vector<128xf32> to vector<1x1x128xf32>
    %55 = vector.broadcast %54 : vector<1x1x128xf32> to vector<16x16x128xf32>
    %56 = arith.mulf %49, %55 : vector<16x16x128xf32>
    %57 = arith.addf %46, %56 : vector<16x16x128xf32>
    %58 = vector.extract_strided_slice %21 {offsets = [1, 1, 0], sizes = [1, 1, 128], strides = [1, 1, 1]} : vector<3x3x128xf32> to vector<1x1x128xf32>
    %59 = vector.shape_cast %58 : vector<1x1x128xf32> to vector<128xf32>
    %60 = vector.shape_cast %59 : vector<128xf32> to vector<1x1x128xf32>
    %61 = vector.broadcast %60 : vector<1x1x128xf32> to vector<16x16x128xf32>
    %62 = arith.mulf %47, %61 : vector<16x16x128xf32>
    %63 = arith.addf %57, %62 : vector<16x16x128xf32>
    %64 = vector.extract_strided_slice %21 {offsets = [1, 2, 0], sizes = [1, 1, 128], strides = [1, 1, 1]} : vector<3x3x128xf32> to vector<1x1x128xf32>
    %65 = vector.shape_cast %64 : vector<1x1x128xf32> to vector<128xf32>
    %66 = vector.shape_cast %65 : vector<128xf32> to vector<1x1x128xf32>
    %67 = vector.broadcast %66 : vector<1x1x128xf32> to vector<16x16x128xf32>
    %68 = arith.mulf %51, %67 : vector<16x16x128xf32>
    %69 = arith.addf %63, %68 : vector<16x16x128xf32>
    %c2 = arith.constant 2 : index
    %c0_31 = arith.constant 0 : index
    %c0_32 = arith.constant 0 : index
    %70 = vector.load %arg12[%c2, %c0_31, %c0_32] : memref<18x16x128xf32, #tpu.memory_space<vmem>>, vector<16x16x128xf32>
    %71 = vector.extract_strided_slice %70 {offsets = [0, 0, 0], sizes = [16, 15, 128], strides = [1, 1, 1]} : vector<16x16x128xf32> to vector<16x15x128xf32>
    %72 = tpu.concatenate %22, %71 in 1 : vector<16x1x128xf32>, vector<16x15x128xf32> -> vector<16x16x128xf32>
    %73 = vector.extract_strided_slice %70 {offsets = [0, 1, 0], sizes = [16, 15, 128], strides = [1, 1, 1]} : vector<16x16x128xf32> to vector<16x15x128xf32>
    %74 = tpu.concatenate %73, %22 in 1 : vector<16x15x128xf32>, vector<16x1x128xf32> -> vector<16x16x128xf32>
    %75 = vector.extract_strided_slice %21 {offsets = [2, 0, 0], sizes = [1, 1, 128], strides = [1, 1, 1]} : vector<3x3x128xf32> to vector<1x1x128xf32>
    %76 = vector.shape_cast %75 : vector<1x1x128xf32> to vector<128xf32>
    %77 = vector.shape_cast %76 : vector<128xf32> to vector<1x1x128xf32>
    %78 = vector.broadcast %77 : vector<1x1x128xf32> to vector<16x16x128xf32>
    %79 = arith.mulf %72, %78 : vector<16x16x128xf32>
    %80 = arith.addf %69, %79 : vector<16x16x128xf32>
    %81 = vector.extract_strided_slice %21 {offsets = [2, 1, 0], sizes = [1, 1, 128], strides = [1, 1, 1]} : vector<3x3x128xf32> to vector<1x1x128xf32>
    %82 = vector.shape_cast %81 : vector<1x1x128xf32> to vector<128xf32>
    %83 = vector.shape_cast %82 : vector<128xf32> to vector<1x1x128xf32>
    %84 = vector.broadcast %83 : vector<1x1x128xf32> to vector<16x16x128xf32>
    %85 = arith.mulf %70, %84 : vector<16x16x128xf32>
    %86 = arith.addf %80, %85 : vector<16x16x128xf32>
    %87 = vector.extract_strided_slice %21 {offsets = [2, 2, 0], sizes = [1, 1, 128], strides = [1, 1, 1]} : vector<3x3x128xf32> to vector<1x1x128xf32>
    %88 = vector.shape_cast %87 : vector<1x1x128xf32> to vector<128xf32>
    %89 = vector.shape_cast %88 : vector<128xf32> to vector<1x1x128xf32>
    %90 = vector.broadcast %89 : vector<1x1x128xf32> to vector<16x16x128xf32>
    %91 = arith.mulf %74, %90 : vector<16x16x128xf32>
    %92 = arith.addf %86, %91 : vector<16x16x128xf32>
    %c0_33 = arith.constant 0 : index
    %c0_34 = arith.constant 0 : index
    %93 = vector.load %arg8[%c0_33, %c0_34] : memref<1x128xf32, #tpu.memory_space<vmem>>, vector<1x128xf32>
    %94 = vector.shape_cast %93 : vector<1x128xf32> to vector<1x1x128xf32>
    %95 = vector.broadcast %94 : vector<1x1x128xf32> to vector<16x16x128xf32>
    %96 = arith.addf %92, %95 : vector<16x16x128xf32>
    %cst_35 = arith.constant 0.707106769 : f32
    %97 = vector.broadcast %cst_35 : f32 to vector<16x16x128xf32>
    %98 = arith.mulf %96, %97 : vector<16x16x128xf32>
    %99 = math.absf %98 : vector<16x16x128xf32>
    %cst_36 = arith.constant 0.327591091 : f32
    %100 = vector.broadcast %cst_36 : f32 to vector<16x16x128xf32>
    %101 = arith.mulf %100, %99 : vector<16x16x128xf32>
    %cst_37 = arith.constant 1.000000e+00 : f32
    %102 = vector.broadcast %cst_37 : f32 to vector<16x16x128xf32>
    %103 = arith.addf %102, %101 : vector<16x16x128xf32>
    %104 = tpu.reciprocal %103 : vector<16x16x128xf32> -> vector<16x16x128xf32>
    %cst_38 = arith.constant 1.06140542 : f32
    %105 = vector.broadcast %cst_38 : f32 to vector<16x16x128xf32>
    %106 = arith.mulf %105, %104 : vector<16x16x128xf32>
    %cst_39 = arith.constant -1.45315206 : f32
    %107 = vector.broadcast %cst_39 : f32 to vector<16x16x128xf32>
    %108 = arith.addf %106, %107 : vector<16x16x128xf32>
    %109 = arith.mulf %108, %104 : vector<16x16x128xf32>
    %cst_40 = arith.constant 1.42141378 : f32
    %110 = vector.broadcast %cst_40 : f32 to vector<16x16x128xf32>
    %111 = arith.addf %109, %110 : vector<16x16x128xf32>
    %112 = arith.mulf %111, %104 : vector<16x16x128xf32>
    %cst_41 = arith.constant -0.284496725 : f32
    %113 = vector.broadcast %cst_41 : f32 to vector<16x16x128xf32>
    %114 = arith.addf %112, %113 : vector<16x16x128xf32>
    %115 = arith.mulf %114, %104 : vector<16x16x128xf32>
    %cst_42 = arith.constant 0.254829586 : f32
    %116 = vector.broadcast %cst_42 : f32 to vector<16x16x128xf32>
    %117 = arith.addf %115, %116 : vector<16x16x128xf32>
    %118 = arith.mulf %117, %104 : vector<16x16x128xf32>
    %cst_43 = arith.constant 0.000000e+00 : f32
    %119 = vector.broadcast %cst_43 : f32 to vector<16x16x128xf32>
    %120 = arith.subf %119, %99 : vector<16x16x128xf32>
    %121 = arith.mulf %120, %99 : vector<16x16x128xf32>
    %122 = math.exp %121 : vector<16x16x128xf32>
    %123 = arith.mulf %118, %122 : vector<16x16x128xf32>
    %cst_44 = arith.constant 1.000000e+00 : f32
    %124 = vector.broadcast %cst_44 : f32 to vector<16x16x128xf32>
    %125 = arith.subf %124, %123 : vector<16x16x128xf32>
    %cst_45 = arith.constant 0.000000e+00 : f32
    %126 = vector.broadcast %cst_45 : f32 to vector<16x16x128xf32>
    %127 = arith.cmpf olt, %98, %126 : vector<16x16x128xf32>
    %cst_46 = arith.constant 0.000000e+00 : f32
    %128 = vector.broadcast %cst_46 : f32 to vector<16x16x128xf32>
    %129 = arith.subf %128, %125 : vector<16x16x128xf32>
    %130 = arith.select %127, %129, %125 : vector<16x16x128xi1>, vector<16x16x128xf32>
    %cst_47 = arith.constant 5.000000e-01 : f32
    %131 = vector.broadcast %cst_47 : f32 to vector<16x16x128xf32>
    %132 = arith.mulf %131, %130 : vector<16x16x128xf32>
    %cst_48 = arith.constant 5.000000e-01 : f32
    %133 = vector.broadcast %cst_48 : f32 to vector<16x16x128xf32>
    %134 = arith.addf %133, %132 : vector<16x16x128xf32>
    %135 = arith.mulf %96, %134 : vector<16x16x128xf32>
    %136 = vector.shape_cast %135 : vector<16x16x128xf32> to vector<256x128xf32>
    %c0_49 = arith.constant 0 : index
    %c0_50 = arith.constant 0 : index
    %137 = vector.load %arg9[%c0_49, %c0_50] : memref<128x128xf32, #tpu.memory_space<vmem>>, vector<128x128xf32>
    %cst_51 = arith.constant dense<0.000000e+00> : vector<256x128xf32>
    %138 = tpu.matmul %136, %137, %cst_51 {dimension_numbers = #tpu.dot_dimension_numbers<[1], [0], [0], [1], [0, 0, 1, 1], [], []>} : vector<256x128xf32>, vector<128x128xf32>, vector<256x128xf32> -> vector<256x128xf32>
    %c0_52 = arith.constant 0 : index
    %c0_53 = arith.constant 0 : index
    %139 = vector.load %arg10[%c0_52, %c0_53] : memref<1x128xf32, #tpu.memory_space<vmem>>, vector<1x128xf32>
    %140 = vector.broadcast %139 : vector<1x128xf32> to vector<256x128xf32>
    %141 = arith.addf %138, %140 : vector<256x128xf32>
    %142 = vector.shape_cast %141 : vector<256x128xf32> to vector<16x16x128xf32>
    %c0_54 = arith.constant 0 : index
    %c0_55 = arith.constant 0 : index
    %c0_56 = arith.constant 0 : index
    %c0_57 = arith.constant 0 : index
    %143 = vector.load %arg11[%c0_54, %c0_55, %c0_56, %c0_57] : memref<1x16x16x128xf32, #tpu.memory_space<vmem>>, vector<1x16x16x128xf32>
    %144 = vector.shape_cast %143 : vector<1x16x16x128xf32> to vector<16x16x128xf32>
    %145 = vector.shape_cast %142 : vector<16x16x128xf32> to vector<1x16x16x128xf32>
    tpu.vector_store %arg11[%c0_54, %c0_55, %c0_56, %c0_57], %145 {strides = array<i32>} : memref<1x16x16x128xf32, #tpu.memory_space<vmem>>, vector<1x16x16x128xf32>,
    return
  }
  func.func @transform_0(%arg0: i32, %arg1: i32) -> (i32, i32, i32, i32) {
    %c0_i32 = arith.constant 0 : i32
    %c0_i32_0 = arith.constant 0 : i32
    %c0_i32_1 = arith.constant 0 : i32
    return %arg0, %arg1, %c0_i32, %c0_i32_0 : i32, i32, i32, i32
  }
  func.func @transform_1(%arg0: i32, %arg1: i32) -> (i32, i32, i32, i32) {
    %c16_i32 = arith.constant 16 : i32
    %0 = arith.muli %arg1, %c16_i32 : i32
    %c1_i32 = arith.constant 1 : i32
    %1 = arith.subi %0, %c1_i32 : i32
    %c0_i32 = arith.constant 0 : i32
    %2 = arith.maxsi %1, %c0_i32 : i32
    %c0_i32_0 = arith.constant 0 : i32
    %c0_i32_1 = arith.constant 0 : i32
    %c0_i32_2 = arith.constant 0 : i32
    return %arg0, %2, %c0_i32_0, %c0_i32_1 : i32, i32, i32, i32
  }
  func.func @transform_2(%arg0: i32, %arg1: i32) -> (i32, i32, i32, i32) {
    %c1_i32 = arith.constant 1 : i32
    %0 = arith.addi %arg1, %c1_i32 : i32
    %c16_i32 = arith.constant 16 : i32
    %1 = arith.muli %0, %c16_i32 : i32
    %c15_i32 = arith.constant 15 : i32
    %2 = arith.minsi %1, %c15_i32 : i32
    %c0_i32 = arith.constant 0 : i32
    %c0_i32_0 = arith.constant 0 : i32
    %c0_i32_1 = arith.constant 0 : i32
    return %arg0, %2, %c0_i32, %c0_i32_0 : i32, i32, i32, i32
  }
  func.func @transform_3(%arg0: i32, %arg1: i32) -> (i32, i32) {
    %c0_i32 = arith.constant 0 : i32
    %c0_i32_0 = arith.constant 0 : i32
    %c0_i32_1 = arith.constant 0 : i32
    return %c0_i32, %c0_i32_0 : i32, i32
  }
  func.func @transform_4(%arg0: i32, %arg1: i32) -> (i32, i32) {
    %c0_i32 = arith.constant 0 : i32
    %c0_i32_0 = arith.constant 0 : i32
    %c0_i32_1 = arith.constant 0 : i32
    return %c0_i32, %c0_i32_0 : i32, i32
  }
  func.func @transform_5(%arg0: i32, %arg1: i32) -> (i32, i32, i32) {
    %c0_i32 = arith.constant 0 : i32
    %c0_i32_0 = arith.constant 0 : i32
    %c0_i32_1 = arith.constant 0 : i32
    %c0_i32_2 = arith.constant 0 : i32
    return %c0_i32, %c0_i32_0, %c0_i32_1 : i32, i32, i32
  }
  func.func @transform_6(%arg0: i32, %arg1: i32) -> (i32, i32) {
    %c0_i32 = arith.constant 0 : i32
    %c0_i32_0 = arith.constant 0 : i32
    %c0_i32_1 = arith.constant 0 : i32
    return %c0_i32, %c0_i32_0 : i32, i32
  }
  func.func @transform_7(%arg0: i32, %arg1: i32) -> (i32, i32) {
    %c0_i32 = arith.constant 0 : i32
    %c0_i32_0 = arith.constant 0 : i32
    %c0_i32_1 = arith.constant 0 : i32
    return %c0_i32, %c0_i32_0 : i32, i32
  }
  func.func @transform_8(%arg0: i32, %arg1: i32) -> (i32, i32) {
    %c0_i32 = arith.constant 0 : i32
    %c0_i32_0 = arith.constant 0 : i32
    %c0_i32_1 = arith.constant 0 : i32
    return %c0_i32, %c0_i32_0 : i32, i32
  }
  func.func @transform_9(%arg0: i32, %arg1: i32) -> (i32, i32, i32, i32) {
    %c0_i32 = arith.constant 0 : i32
    %c0_i32_0 = arith.constant 0 : i32
    %c0_i32_1 = arith.constant 0 : i32
    return %arg0, %arg1, %c0_i32, %c0_i32_0 : i32, i32, i32, i32
  }
}

</mosaic_0001>

<bundles_post_ra>
// kernel: tpu_custom_call.1
= control target key start
LH: loop header
LB: loop body
LE: loop exit
PB: predicated region body
PF: predicated region fallthrough
CT: control target
= control target key end

     0   :  { %s6747_s0 = inlined_call_operand.hbm [shape: f32[2,16,16,128], index: 0, kind: input, shape index: {}]   ;;  %s6748_s1 = inlined_call_operand.hbm [shape: f32[2,16,16,128], index: 1, kind: input, shape index: {}]   ;;  %s6749_s2 = inlined_call_operand.hbm [shape: f32[2,16,16,128], index: 2, kind: input, shape index: {}]   ;;  %s6750_s3 = inlined_call_operand.hbm [shape: f32[128,128], index: 3, kind: input, shape index: {}]   ;;  %s6751_s4 = inlined_call_operand.vmem [shape: f32[1,128], index: 4, kind: input, shape index: {}]   ;;  %s6752_s5 = inlined_call_operand.hbm [shape: f32[3,3,128], index: 5, kind: input, shape index: {}]   ;;  %s6753_s6 = inlined_call_operand.vmem [shape: f32[1,128], index: 6, kind: input, shape index: {}]   ;;  %s6754_s7 = inlined_call_operand.hbm [shape: f32[128,128], index: 7, kind: input, shape index: {}]   ;;  %s6755_s8 = inlined_call_operand.vmem [shape: f32[1,128], index: 8, kind: input, shape index: {}]   ;;  %s6756_s9 = inlined_call_operand.hbm [shape: f32[2,16,16,128], index: 9, kind: output, shape index: {}]  }
   0x1   :  { %6833 = sst [smem:[#allocation120_spill]] %s6748_s1 }
   0x2   :  { %6834 = sst [smem:[#allocation121_spill]] %s6750_s3 }
   0x3   :  { %6835 = sst [smem:[#allocation122_spill]] %s6752_s5 }
   0x4   :  { %6836 = sst [smem:[#allocation123_spill]] %s6756_s9 }
   0x5   :  { %14 = vsyncpa [#allocation4], 0 }
   0x6   :  { %16 = vsyncpa [#allocation4 + $0x1], 0 }
   0x7   :  { %17 = vsyncpa [#allocation7], 0 }
   0x8   :  { %19 = vsyncpa [#allocation7 + $0x1], 0 }
   0x9   :  { %20 = vsyncpa [#allocation10], 0 }
   0xa   :  { %21 = vsyncpa [#allocation13], 0 }
   0xb   :  { %22 = vsyncpa [#allocation5], 0 }
   0xc   :  { %24 = vsyncpa [#allocation5 + $0x1], 0  ;;  %s4466_s30 = smov 0   ;;  %s4468_s10 = smov 0  }
   0xd   :  { %s4470_s11 = smov 0   ;;  %s4472_s12 = smov 0  }
   0xe   :  { %s4474_s13 = smov 0   ;;  %s4476_s14 = smov 0  }
   0xf LB: > { %6837 = sst [smem:[#allocation20_spill]] %s4380_s30  ;;  %s4497_s15 = sadd.s32 4294967295, %s4400_s14   ;;  %s4400_s14 = sphi %s4476_s14, %s30_s14   ;;  %s4396_s13 = sphi %s4474_s13, %s7136_s13   ;;  %s4392_s12 = sphi %s4472_s12, %s7135_s12   ;;  %s4388_s11 = sphi %s4470_s11, %s7134_s11   ;;  %s4384_s10 = sphi %s4468_s10, %s7138_s10   ;;  %s4380_s30 = sphi %s4466_s30, %s7137_s30  }
  0x10   : > { %6838 = sst [smem:[#allocation21_spill]] %s4388_s11  ;;  %s3603_s16 = sadd.s32 4294967294, %s4400_s14  }
  0x11   : > { %6839 = sst [smem:[#allocation22_spill]] %s4392_s12  ;;  %p58_p0 = scmp.ne.s32.totalorder %s4388_s11, %s4384_s10 }
  0x12   : > { %6840 = sst [smem:[#allocation23_spill]] %s4396_s13  ;;  %p59_p1 = scmp.eq.s32.totalorder %s4400_s14, 0 }
  0x13   : > { %p64_p2 = scmp.ne.s32.totalorder %s4384_s10, %s4380_s30  ;;  %p6757_p3 = scmp.eq.s32.totalorder %s4497_s15, 0 }
  0x14   : > { %p4506_p4 = por %p59_p1, %p58_p0  ;;  %p288_p5 = scmp.eq.s32.totalorder %s4497_s15, 1 }
  0x15   : > { %p4513_p6 = por %p6757_p3, %p64_p2  ;;  %p294_p7 = scmp.eq.s32.totalorder %s3603_s16, 1 }
  0x16   : > { %p4517_p8 = por %p288_p5, %p58_p0  ;;  %p3604_p9 = scmp.ge.s32.totalorder %s4400_s14, 1 }
  0x17   : > { %p4522_p10 = por %p294_p7, %p64_p2  ;;  %p301_p11 = scmp.lt.s32.totalorder %s4400_s14, 3 }
  0x18   : > { %s6843_s19 = scalar_select %p4517_p8, 1, 0 }
  0x19   : > { %s6845_s20 = scalar_select %p4522_p10, 1, 0 }
  0x1a   : > { %6844 = sst [smem:[#allocation24_spill]] %s6843_s19  ;;  %p4527_p12 = pnand %p3604_p9, %p301_p11 }
  0x1b   : > { %6846 = sst [smem:[#allocation25_spill]] %s6845_s20  ;;  %s4402_s22 = smov [#allocation9]  }
  0x1c   : > { %s313_s23 = sshll.u32 %s4402_s22, 4  ;;  %p3926_p13 = pneg %p4527_p12  ;;  %s314_s23 = int_to_ptr.vmem [resolvable:$true] %s313_s23 }
  0x1d   : > { %s42_s25 = sadd.s32 1, %s4396_s13  ;;  %s51_s26 = sadd.s32 1, %s4388_s11 }
  0x1e   : > { %p4536_p1 = pnand %p3926_p13, %p6757_p3  ;;  %p4542_p2 = scmp.ge.s32.totalorder %s42_s25, 2 }
  0x1f   : > { %s4157_s28 = scalar_lea.vmem %s314_s23, 2048  ;;  %p4165_p13 = scmp.lt.s32.totalorder %s314_s23, %s314_s23 }
  0x20   : > { %p4148_p5 = pneg %p4536_p1  ;;  %p4158_p7 = scmp.ne.s32.totalorder %s314_s23, %s4157_s28 }
  0x21   : > { %p4166_p0 = scmp.lt.s32.totalorder %s4157_s28, %s4157_s28 }
  0x22   : > { %p4160_p9 = pnand %p4158_p7, %p4148_p5 }
  0x23   : > { %p4167_p3 = por %p4166_p0, %p4165_p13 }
  0x24   : > { %p4161_p11 = pneg %p4160_p9 }
  0x26   : > { %p4168_p10 = pnand %p4167_p3, %p4161_p11 }
  0x28   : > { %4171 = shalt.err (!%p4168_p10)
}
  0x29   : > { %s6763_s29 = smov 128   ;;  %s6765_s16 = smov 8  }
  0x2a   : > { %s6850_s3 = sld [smem:[#allocation121_spill]]  ;;  %s7140_s25 = smov (%p4542_p2, %s42_s25), 0 }
  0x2b   : > { %6851 = sst [smem:[#allocation26_spill]] %s7140_s25  ;;  %p3953_p3 = scmp.lt.s32.totalorder %s4400_s14, 2 }
  0x2c   : > { %s4565_s20 = sand.u32 1, %s4388_s11   ;;  %s46_s30 = ssub.s32 %s4396_s13, %s7140_s25 }
  0x2d   : > { %s4570_s9 = sshll.u32 %s4396_s13, 12  ;;  %p49_p10 = scmp.eq.s32.totalorder %s46_s30, 0 }
  0x2e   : > { %p4574_p0 = pnand %p3953_p3, %p4506_p4  ;;  %s3612_s27 = sshll.u32 %s4565_s20, 4 }
  0x2f   : > { %s4581_s22 = scalar_select %p49_p10, %s4388_s11, %s51_s26  }
  0x30   : > { %3929 = dma.hbm_to_vmem [thread:$0]  (!%p4536_p1), %s6850_s3, 2048, %s314_s23, [#allocation10], %s6763_s29, %s6763_s29, %s6765_s16  }
  0x31   : > { %s386_s23 = sand.u32 1, %s4400_s14   ;;  %6853 = sst [smem:[#allocation27_spill]] %s4581_s22 }
  0x32   : > { %s6854_s1 = sld [smem:[#allocation120_spill]]  ;;  %s390_s3 = scalar_lea.vmem [#allocation6], %s3612_s27 }
  0x33   : > { %s403_s25 = sshll.u32 %s390_s3, 4  ;;  %s417_s13 = scalar_lea.vmem [#allocation8], %s3612_s27  ;;  %s404_s25 = int_to_ptr.vmem [resolvable:$true] %s403_s25 }
  0x34   : > { %s430_s30 = sshll.u32 %s417_s13, 4  ;;  %s4587_s17 = scalar_lea.sflag [#allocation7], %s386_s23  ;;  %s4600_s30 = int_to_ptr.vmem [resolvable:$true] %s430_s30 }
  0x35   : > { %p4174_p4 = pneg %p4574_p0  ;;  %s4185_s12 = scalar_lea.vmem %s404_s25, 256 }
  0x36   : > { %p4186_p2 = scmp.ne.s32.totalorder %s404_s25, %s4185_s12  ;;  %s4405_s26 = smov [#allocation6]  }
  0x37   : > { %s4190_s22 = sshll.u32 %s4405_s26, 4  ;;  %s4191_s22 = int_to_ptr.vmem [resolvable:$false] %s4190_s22 }
  0x38   : > { %s402_s16 = scalar_lea.hbm %s6854_s1, %s4570_s9  ;;  %p4188_p7 = pnand %p4186_p2, %p4174_p4 }
  0x39   : > { %s4192_s29 = scalar_lea.vmem %s4191_s22, 512  ;;  %p4193_p11 = scmp.lt.s32.totalorder %s404_s25, %s4191_s22 }
  0x3a   : > { %p4189_p9 = pneg %p4188_p7  ;;  %p4194_p13 = scmp.lt.s32.totalorder %s4192_s29, %s4185_s12 }
  0x3c   : > { %p4195_p3 = por %p4194_p13, %p4193_p11 }
  0x3e   : > { %p4196_p10 = pnand %p4195_p3, %p4189_p9 }
  0x40   : > { %4199 = shalt.err (!%p4196_p10)
}
  0x41   : > { %s6855_s3 = smov 8   ;;  %s6856_s13 = smov 128  }
  0x42   : > { %3942 = dma.hbm_to_vmem [thread:$0]  (!%p4574_p0), %s402_s16, 256, %s404_s25, %s4587_s17, %s6856_s13, %s6856_s13, %s6855_s3  }
  0x43   : > { %s4406_s23 = smov [#allocation11]  }
  0x44   : > { %s329_s27 = sshll.u32 %s4406_s23, 4  ;;  %s330_s27 = int_to_ptr.vmem [resolvable:$true] %s329_s27 }
  0x45   : > { %s4211_s28 = scalar_lea.vmem %s330_s27, 192  ;;  %p4219_p11 = scmp.lt.s32.totalorder %s330_s27, %s330_s27 }
  0x46   : > { %p4212_p2 = scmp.ne.s32.totalorder %s330_s27, %s4211_s28  ;;  %p4220_p13 = scmp.lt.s32.totalorder %s4211_s28, %s4211_s28 }
  0x48   : > { %p4214_p7 = pnand %p4212_p2, %p4148_p5  ;;  %p4221_p3 = por %p4220_p13, %p4219_p11 }
  0x4a   : > { %p4215_p9 = pneg %p4214_p7 }
  0x4c   : > { %p4222_p10 = pnand %p4221_p3, %p4215_p9 }
  0x4e   : > { %4225 = shalt.err (!%p4222_p10)
}
  0x4f   : > { %s4407_s12 = smov 64   ;;  %s4408_s25 = smov 4  }
  0x50   : > { %s6857_s5 = sld [smem:[#allocation122_spill]]  ;;  %s4409_s26 = smov [#allocation12]  }
  0x51   : > { %s345_s29 = sshll.u32 %s4409_s26, 4  ;;  %s3609_s23 = sshll.u32 %s4565_s20, 8  ;;  %s346_s29 = int_to_ptr.vmem [resolvable:$true] %s345_s29 }
  0x52   : > { %s4237_s1 = scalar_lea.vmem %s346_s29, 2048  ;;  %p4245_p11 = scmp.lt.s32.totalorder %s346_s29, %s346_s29 }
  0x53   : > { %p4238_p2 = scmp.ne.s32.totalorder %s346_s29, %s4237_s1  ;;  %p4246_p13 = scmp.lt.s32.totalorder %s4237_s1, %s4237_s1 }
  0x55   : > { %p4240_p7 = pnand %p4238_p2, %p4148_p5  ;;  %p4247_p3 = por %p4246_p13, %p4245_p11 }
  0x56   : > { %3932 = dma.hbm_to_vmem [thread:$0]  (!%p4536_p1), %s6857_s5, 192, %s330_s27, [#allocation10], %s4407_s12, %s4407_s12, %s4408_s25  }
  0x57   : > { %p4241_p9 = pneg %p4240_p7 }
  0x59   : > { %p4248_p10 = pnand %p4247_p3, %p4241_p9 }
  0x5b   : > { %4251 = shalt.err (!%p4248_p10)
}
  0x5c   : > { %3935 = dma.hbm_to_vmem [thread:$0]  (!%p4536_p1), %s6754_s7, 2048, %s346_s29, [#allocation13], %s6856_s13, %s6856_s13, %s6855_s3  }
  0x5d   : > { %s375_s1 = scalar_lea.hbm %s6747_s0, %s4570_s9  ;;  %s366_s16 = scalar_lea.vmem [#allocation3], %s3609_s23 }
  0x5e   : > { %s376_s22 = sshll.u32 %s366_s16, 4  ;;  %s3637_s26 = sadd.s32 3840, %s4570_s9  ;;  %s377_s22 = int_to_ptr.vmem [resolvable:$true] %s376_s22 }
  0x5f   : > { %s363_s24 = scalar_lea.sflag [#allocation4], %s4565_s20  ;;  %s4265_s5 = scalar_lea.vmem %s377_s22, 4096 }
  0x60   : > { %p4266_p5 = scmp.ne.s32.totalorder %s377_s22, %s4265_s5  ;;  %s4410_s27 = smov [#allocation3]  }
  0x61   : > { %s4270_s28 = sshll.u32 %s4410_s27, 4  ;;  %s4271_s28 = int_to_ptr.vmem [resolvable:$false] %s4270_s28 }
  0x62   : > { %p4268_p2 = pnand %p4266_p5, %p4174_p4  ;;  %s4272_s11 = scalar_lea.vmem %s4271_s28, 8192 }
  0x63   : > { %p4273_p1 = scmp.lt.s32.totalorder %s377_s22, %s4271_s28  ;;  %p4274_p9 = scmp.lt.s32.totalorder %s4272_s11, %s4265_s5 }
  0x64   : > { %p4269_p7 = pneg %p4268_p2 }
  0x65   : > { %p4275_p11 = por %p4274_p9, %p4273_p1 }
  0x67   : > { %p4276_p13 = pnand %p4275_p11, %p4269_p7 }
  0x69   : > { %4279 = shalt.err (!%p4276_p13)
}
  0x6a   : > { %3939 = dma.hbm_to_vmem [thread:$0]  (!%p4574_p0), %s375_s1, 4096, %s377_s22, %s363_s24, %s6856_s13, %s6856_s13, %s6855_s3  }
  0x6b   : > { %s429_s29 = scalar_lea.hbm %s6749_s2, %s3637_s26  ;;  %s4293_s23 = scalar_lea.vmem %s4600_s30, 256 }
  0x6c   : > { %p4294_p3 = scmp.ne.s32.totalorder %s4600_s30, %s4293_s23  ;;  %s4411_s5 = smov [#allocation8]  }
  0x6d   : > { %s4298_s11 = sshll.u32 %s4411_s5, 4  ;;  %s4299_s11 = int_to_ptr.vmem [resolvable:$false] %s4298_s11 }
  0x6e   : > { %p4296_p10 = pnand %p4294_p3, %p4174_p4  ;;  %s4300_s12 = scalar_lea.vmem %s4299_s11, 512 }
  0x6f   : > { %p4301_p2 = scmp.lt.s32.totalorder %s4600_s30, %s4299_s11  ;;  %p4302_p7 = scmp.lt.s32.totalorder %s4300_s12, %s4293_s23 }
  0x70   : > { %p4297_p5 = pneg %p4296_p10 }
  0x71   : > { %p4303_p1 = por %p4302_p7, %p4301_p2 }
  0x73   : > { %p4304_p9 = pnand %p4303_p1, %p4297_p5 }
  0x75   : > { %4307 = shalt.err (!%p4304_p9)
}
  0x76   : > { %3945 = dma.hbm_to_vmem [thread:$0]  (!%p4574_p0), %s429_s29, 256, %s4600_s30, %s4587_s17, %s6856_s13, %s6856_s13, %s6855_s3  }
  0x77   : > { %442 = sbr.rel (%p4527_p12) target bundleno = 1022 (0x3fe), region = 56 }
  0x7c   : > { %s4655_s25 = sand.u32 1, %s4384_s10  }
  0x7d   : > { %s3619_s1 = sshll.u32 %s4655_s25, 8  ;;  %s445_s16 = scalar_lea.sflag [#allocation4], %s4655_s25 }
  0x7e   : > { %s4661_s19 = scalar_lea.vmem [#allocation3], %s3619_s1 }
  0x7f   : > { %4359 = dma.done.wait (%p4513_p6), %s445_s16, 4096  }
  0x80   : > { %4361 = vsyncadd (%p4513_p6), %s445_s16, 4294963200  ;;  %s453_s21 = sand.u32 1, %s4497_s15   ;;  %s3620_s30 = sshll.u32 %s4655_s25, 4 }
  0x81   : > { %s454_s17 = scalar_lea.sflag [#allocation7], %s453_s21  ;;  %s4669_s3 = scalar_lea.vmem [#allocation6], %s3620_s30 }
  0x82   : > { %4363 = dma.done.wait (%p4513_p6), %s454_s17, 512  }
  0x83   : > { %4365 = vsyncadd (%p4513_p6), %s454_s17, 4294966784  ;;  %s4675_s13 = scalar_lea.vmem [#allocation8], %s3620_s30  ;;  %p6858_p12 = scmp.eq.s32.totalorder %s4497_s15, 0 }
  0x85   : > { %4367 = dma.done.wait (%p6858_p12), [#allocation10], 2240   ;;  %p6859_p0 = pmov %p6858_p12 }
  0x87   : > { %4369 = vsyncadd (%p6859_p0), [#allocation10], 4294965056  ;;  %p6860_p4 = pmov %p6859_p0 }
  0x88   : > { %p6861_p11 = pmov %p6859_p0 }
  0x89   : > { %4371 = dma.done.wait (%p6860_p4), [#allocation13], 2048  }
  0x8a   : > { %4373 = vsyncadd (%p6861_p11), [#allocation13], 4294965248  ;;  %v584_v0 = vld [vmem:[#allocation9 + $0x78] sm:$0xff]  ;;  %v583_v1 = vld [vmem:[#allocation9 + $0x70] sm:$0xff]  ;;  %vm949_vm0 = vcmask 1040384   ;;  %vm1046_vm1 = vcmask 1046528  }
  0x8b   : > { %3740 = vmatprep.subr.mxu0 %v584_v0  ;;  %v582_v2 = vld [vmem:[#allocation9 + $0x68] sm:$0xff]  ;;  %v581_v3 = vld [vmem:[#allocation9 + $0x60] sm:$0xff]  ;;  %v580_v5 = vld [vmem:[#allocation9 + $0x58] sm:$0xff]  ;;  %s6596_s23 = scalar_lea.vmem [#allocation14], %s3619_s1  ;;  %s7126_s5 = sld [smem:[#allocation22_spill]] }
  0x8c   : > { %3741 = vmatpush3.msra.mxu0 %v584_v0  ;;  %v533_v4 = vld [vmem:[%s4669_s3] sm:$0xff]  ;;  %v578_v7 = vld [vmem:[#allocation9 + $0x48] sm:$0xff]  ;;  %v576_v9 = vld [vmem:[#allocation9 + $0x38] sm:$0xff]  ;;  %s3437_s1 = sshll.u32 %s6596_s23, 4  ;;  %s7128_s21 = sld [smem:[#allocation123_spill]]  ;;  %s6696_s1 = int_to_ptr.vmem [resolvable:$true] %s3437_s1 }
  0x8d   : > { %3742 = vmatprep.subr.mxu0 %v583_v1  ;;  %3772 = vmatprep.mubr.f32.mxu0 %v533_v4  ;;  %v579_v6 = vld [vmem:[#allocation9 + $0x50] sm:$0xff]  ;;  %v577_v8 = vld [vmem:[#allocation9 + $0x40] sm:$0xff]  ;;  %v574_v11 = vld [vmem:[#allocation9 + $0x28] sm:$0xff]  ;;  %s3421_s17 = scalar_lea.sflag [#allocation5], %s4655_s25 }
  0x8e   : > { %3743 = vmatpush3.msra.mxu0 %v583_v1  ;;  %v575_v10 = vld [vmem:[#allocation9 + $0x30] sm:$0xff]  ;;  %v573_v12 = vld [vmem:[#allocation9 + $0x20] sm:$0xff]  ;;  %v572_v13 = vld [vmem:[#allocation9 + $0x18] sm:$0xff] }
  0x8f   : > { %3744 = vmatprep.subr.mxu0 %v582_v2  ;;  %v571_v14 = vld [vmem:[#allocation9 + $0x10] sm:$0xff]  ;;  %v570_v15 = vld [vmem:[#allocation9 + $0x8] sm:$0xff]  ;;  %v569_v16 = vld [vmem:[#allocation9] sm:$0xff] }
  0x90   : > { %3745 = vmatpush3.msra.mxu0 %v582_v2  ;;  %v534_v17 = vld [vmem:[%s4669_s3 + $0x8] sm:$0xff]  ;;  %v535_v18 = vld [vmem:[%s4661_s19] sm:$0xff]  ;;  %v537_v20 = vld [vmem:[%s4661_s19 + $0x10] sm:$0xff]  ;;  %v1143_v2 = vlaneseq  ;;  %s4308_s3 = scalar_lea.vmem %s6696_s1, 4096 }
  0x91   : > { %3746 = vmatprep.subr.mxu0 %v581_v3  ;;  %v536_v19 = vld [vmem:[%s4661_s19 + $0x8] sm:$0xff]  ;;  %v538_v21 = vld [vmem:[%s4661_s19 + $0x18] sm:$0xff]  ;;  %v539_v22 = vld [vmem:[%s4661_s19 + $0x20] sm:$0xff]  ;;  %s3638_s12 = sshll.u32 %s7126_s5, 12  ;;  %p4309_p6 = scmp.ne.s32.totalorder %s6696_s1, %s4308_s3 }
  0x92   : > { %3747 = vmatpush3.msra.mxu0 %v581_v3  ;;  %v540_v23 = vld [vmem:[%s4661_s19 + $0x28] sm:$0xff]  ;;  %v541_v24 = vld [vmem:[%s4661_s19 + $0x30] sm:$0xff]  ;;  %v542_v25 = vld [vmem:[%s4661_s19 + $0x38] sm:$0xff]  ;;  %v1144_v3 = vshrl.u32 %v1143_v2, 7  ;;  %s6694_s30 = scalar_lea.hbm %s7128_s21, %s3638_s12 }
  0x93   : > { %3748 = vmatprep.subr.mxu0 %v580_v5  ;;  %v543_v26 = vld [vmem:[%s4661_s19 + $0x40] sm:$0xff]  ;;  %v544_v27 = vld [vmem:[%s4661_s19 + $0x48] sm:$0xff]  ;;  %v545_v28 = vld [vmem:[%s4661_s19 + $0x50] sm:$0xff]  ;;  %p4310_p13 = pnand %p4309_p6, %p4517_p8 }
  0x94   : > { %3749 = vmatpush3.msra.mxu0 %v580_v5  ;;  %v546_v29 = vld [vmem:[%s4661_s19 + $0x58] sm:$0xff]  ;;  %v547_v30 = vld [vmem:[%s4661_s19 + $0x60] sm:$0xff]  ;;  %v548_v31 = vld [vmem:[%s4661_s19 + $0x68] sm:$0xff]  ;;  %v1213_v4 = vsub.s32 1, %v1144_v3  ;;  %v1145_v5 = vsub.s32 0, %v1144_v3 }
  0x95   : > { %3750 = vmatprep.subr.mxu0 %v579_v6  ;;  %v549_v32 = vld [vmem:[%s4661_s19 + $0x70] sm:$0xff]  ;;  %v550_v33 = vld [vmem:[%s4661_s19 + $0x78] sm:$0xff]  ;;  %v551_v34 = vld [vmem:[%s4661_s19 + $0x80] sm:$0xff]  ;;  %p4311_p3 = pneg %p4310_p13 }
  0x96   : > { %3751 = vmatpush3.msra.mxu0 %v579_v6  ;;  %v552_v35 = vld [vmem:[%s4661_s19 + $0x88] sm:$0xff]  ;;  %v553_v36 = vld [vmem:[%s4661_s19 + $0x90] sm:$0xff]  ;;  %v554_v37 = vld [vmem:[%s4661_s19 + $0x98] sm:$0xff] }
  0x97   : > { %3752 = vmatprep.subr.mxu0 %v578_v7  ;;  %v555_v38 = vld [vmem:[%s4661_s19 + $0xa0] sm:$0xff]  ;;  %v556_v39 = vld [vmem:[%s4661_s19 + $0xa8] sm:$0xff]  ;;  %v557_v40 = vld [vmem:[%s4661_s19 + $0xb0] sm:$0xff] }
  0x98   : > { %3753 = vmatpush3.msra.mxu0 %v578_v7  ;;  %v558_v41 = vld [vmem:[%s4661_s19 + $0xb8] sm:$0xff]  ;;  %v559_v42 = vld [vmem:[%s4661_s19 + $0xc0] sm:$0xff]  ;;  %v560_v43 = vld [vmem:[%s4661_s19 + $0xc8] sm:$0xff]  ;;  %v4412_v7 = vmov 0.0  }
  0x99   : > { %3754 = vmatprep.subr.mxu0 %v577_v8  ;;  %v561_v44 = vld [vmem:[%s4661_s19 + $0xd0] sm:$0xff]  ;;  %v562_v45 = vld [vmem:[%s4661_s19 + $0xd8] sm:$0xff]  ;;  %v563_v46 = vld [vmem:[%s4661_s19 + $0xe0] sm:$0xff] }
  0x9a   : > { %3755 = vmatpush3.msra.mxu0 %v577_v8  ;;  %v564_v47 = vld [vmem:[%s4661_s19 + $0xe8] sm:$0xff]  ;;  %v565_v48 = vld [vmem:[%s4661_s19 + $0xf0] sm:$0xff]  ;;  %v566_v49 = vld [vmem:[%s4661_s19 + $0xf8] sm:$0xff]  ;;  %v4719_v8 = vrot.slane %v4412_v7, 7 }
  0x9b   : > { %3756 = vmatprep.subr.mxu0 %v576_v9  ;;  %v3155_v50 = vld [vmem:[#allocation12 + $0x78] sm:$0xff]  ;;  %v3154_v51 = vld [vmem:[#allocation12 + $0x70] sm:$0xff]  ;;  %v3153_v52 = vld [vmem:[#allocation12 + $0x68] sm:$0xff] }
  0x9c   : > { %3757 = vmatpush3.msra.mxu0 %v576_v9  ;;  %3826 = vmatprep.subr.mxu1 %v3155_v50  ;;  %v3152_v53 = vld [vmem:[#allocation12 + $0x60] sm:$0xff]  ;;  %v3151_v54 = vld [vmem:[#allocation12 + $0x58] sm:$0xff]  ;;  %v3150_v55 = vld [vmem:[#allocation12 + $0x50] sm:$0xff]  ;;  %6862 = vst [vmem:[#allocation28_spill] sm:$0xff] %v4719_v8 }
  0x9d   : > { %3758 = vmatprep.subr.mxu0 %v575_v10  ;;  %3827 = vmatpush3.msra.mxu1 %v3155_v50  ;;  %v3149_v56 = vld [vmem:[#allocation12 + $0x48] sm:$0xff]  ;;  %v3148_v57 = vld [vmem:[#allocation12 + $0x40] sm:$0xff]  ;;  %v3147_v58 = vld [vmem:[#allocation12 + $0x38] sm:$0xff] }
  0x9e   : > { %3759 = vmatpush3.msra.mxu0 %v575_v10  ;;  %3828 = vmatprep.subr.mxu1 %v3154_v51  ;;  %v3146_v59 = vld [vmem:[#allocation12 + $0x30] sm:$0xff]  ;;  %v3145_v60 = vld [vmem:[#allocation12 + $0x28] sm:$0xff]  ;;  %v3144_v61 = vld [vmem:[#allocation12 + $0x20] sm:$0xff] }
  0x9f   : > { %3760 = vmatprep.subr.mxu0 %v574_v11  ;;  %3829 = vmatpush3.msra.mxu1 %v3154_v51  ;;  %v3143_v62 = vld [vmem:[#allocation12 + $0x18] sm:$0xff]  ;;  %v3142_v63 = vld [vmem:[#allocation12 + $0x10] sm:$0xff]  ;;  %v3141_v0 = vld [vmem:[#allocation12 + $0x8] sm:$0xff] }
  0xa0   : > { %3761 = vmatpush3.msra.mxu0 %v574_v11  ;;  %3830 = vmatprep.subr.mxu1 %v3153_v52  ;;  %v3140_v1 = vld [vmem:[#allocation12] sm:$0xff]  ;;  %v882_v6 = vld [vmem:[#allocation11] sm:$0x7] }
  0xa1   : > { %3762 = vmatprep.subr.mxu0 %v573_v12  ;;  %3831 = vmatpush3.msra.mxu1 %v3153_v52  ;;  %v4721_v11 = vrot.slane %v882_v6, %v1213_v4 }
  0xa2   : > { %3763 = vmatpush3.msra.mxu0 %v573_v12  ;;  %3832 = vmatprep.subr.mxu1 %v3152_v53  ;;  %v4723_v12 = vrot.slane %v882_v6, %v1145_v5 }
  0xa3   : > { %3764 = vmatprep.subr.mxu0 %v572_v13  ;;  %3833 = vmatpush3.msra.mxu1 %v3152_v53 }
  0xa4   : > { %3765 = vmatpush3.msra.mxu0 %v572_v13  ;;  %3834 = vmatprep.subr.mxu1 %v3151_v54  ;;  %v1281_v13 = vsub.s32 2, %v1144_v3 }
  0xa5   : > { %3766 = vmatprep.subr.mxu0 %v571_v14  ;;  %3835 = vmatpush3.msra.mxu1 %v3151_v54 }
  0xa6   : > { %3767 = vmatpush3.msra.mxu0 %v571_v14  ;;  %3836 = vmatprep.subr.mxu1 %v3150_v55  ;;  %v4727_v14 = vsel %vm949_vm0, 0.0, %v4719_v8 }
  0xa7   : > { %3768 = vmatprep.subr.mxu0 %v570_v15  ;;  %3837 = vmatpush3.msra.mxu1 %v3150_v55  ;;  %6863 = vst [vmem:[#allocation29_spill] sm:$0xff] %v4727_v14 }
  0xa8   : > { %3769 = vmatpush3.msra.mxu0 %v570_v15  ;;  %3838 = vmatprep.subr.mxu1 %v3149_v56 }
  0xa9   : > { %3770 = vmatprep.subr.mxu0 %v569_v16  ;;  %3839 = vmatpush3.msra.mxu1 %v3149_v56 }
  0xaa   : > { %3771 = vmatpush3.msra.mxu0 %v569_v16  ;;  %3840 = vmatprep.subr.mxu1 %v3148_v57  ;;  %v4732_v16 = vld [vmem:[%s6751_s4] ss:$0 sm:$0xff] }
  0xab   : > { %3773 = vmatmul.mubr.f32.vlgmr.msra.gmra.mxu0 %v534_v17  ;;  %3841 = vmatpush3.msra.mxu1 %v3148_v57  ;;  %v4734_v17 = vrot.slane %v4412_v7, 1 }
  0xac   : > { %3775 = vmatprep.mubr.f32.mxu0 %v535_v18  ;;  %3842 = vmatprep.subr.mxu1 %v3147_v58 }
  0xad   : > { %3843 = vmatpush3.msra.mxu1 %v3147_v58  ;;  %6864 = vst [vmem:[#allocation30_spill] sm:$0xff] %v4734_v17 }
  0xae   : > { %3844 = vmatprep.subr.mxu1 %v3146_v59 }
  0xaf   : > { %3776 = vmatmul.mubr.f32.gmra.mxu0 %v536_v19  ;;  %3845 = vmatpush3.msra.mxu1 %v3146_v59  ;;  %v1147_v19 = vmul.f32 %v4723_v12, %v4727_v14 }
  0xb0   : > { %3778 = vmatprep.mubr.f32.mxu0 %v537_v20  ;;  %3846 = vmatprep.subr.mxu1 %v3145_v60  ;;  %v1215_v20 = vmul.f32 0.0, %v4721_v11 }
  0xb1   : > { %3847 = vmatpush3.msra.mxu1 %v3145_v60 }
  0xb2   : > { %3848 = vmatprep.subr.mxu1 %v3144_v61 }
  0xb3   : > { %3779 = vmatmul.mubr.f32.gmra.mxu0 %v538_v21  ;;  %3849 = vmatpush3.msra.mxu1 %v3144_v61 }
  0xb4   : > { %3781 = vmatprep.mubr.f32.mxu0 %v539_v22  ;;  %3850 = vmatprep.subr.mxu1 %v3143_v62  ;;  %v4740_v22 = vrot.slane %v882_v6, %v1281_v13 }
  0xb5   : > { %3851 = vmatpush3.msra.mxu1 %v3143_v62 }
  0xb6   : > { %3852 = vmatprep.subr.mxu1 %v3142_v63 }
  0xb7   : > { %3782 = vmatmul.mubr.f32.gmra.mxu0 %v540_v23  ;;  %3853 = vmatpush3.msra.mxu1 %v3142_v63  ;;  %v1148_v23 = vmul.f32 %v4723_v12, %v4719_v8 }
  0xb8   : > { %3784 = vmatprep.mubr.f32.mxu0 %v541_v24  ;;  %3854 = vmatprep.subr.mxu1 %v3141_v0 }
  0xb9   : > { %3855 = vmatpush3.msra.mxu1 %v3141_v0 }
  0xba   : > { %3856 = vmatprep.subr.mxu1 %v3140_v1 }
  0xbb   : > { %3785 = vmatmul.mubr.f32.gmra.mxu0 %v542_v25  ;;  %3857 = vmatpush3.msra.mxu1 %v3140_v1  ;;  %v4747_v25 = vsel %vm1046_vm1, %v4734_v17, 0.0 }
  0xbc   : > { %3787 = vmatprep.mubr.f32.mxu0 %v543_v26  ;;  %6865 = vst [vmem:[#allocation31_spill] sm:$0xff] %v4747_v25 }
  0xbf   : > { %3788 = vmatmul.mubr.f32.gmra.mxu0 %v544_v27 }
  0xc0   : > { %3790 = vmatprep.mubr.f32.mxu0 %v545_v28  ;;  %v1247_v28 = vadd.f32 %v1215_v20, %v1147_v19 }
  0xc3   : > { %3791 = vmatmul.mubr.f32.gmra.mxu0 %v546_v29 }
  0xc4   : > { %3793 = vmatprep.mubr.f32.mxu0 %v547_v30  ;;  %v883_v30 = vld [vmem:[#allocation11 + $0x4] sm:$0x7] }
  0xc7   : > { %3794 = vmatmul.mubr.f32.gmra.mxu0 %v548_v31 }
  0xc8   : > { %3796 = vmatprep.mubr.f32.mxu0 %v549_v32  ;;  %v1248_v32 = vadd.f32 %v1215_v20, %v1148_v23 }
  0xcb   : > { %3797 = vmatmul.mubr.f32.gmra.mxu0 %v550_v33  ;;  %v1283_v33 = vmul.f32 %v4740_v22, %v4734_v17 }
  0xcc   : > { %3799 = vmatprep.mubr.f32.mxu0 %v551_v34  ;;  %v1284_v34 = vmul.f32 %v4740_v22, %v4747_v25 }
  0xcf   : > { %3800 = vmatmul.mubr.f32.gmra.mxu0 %v552_v35 }
  0xd0   : > { %3802 = vmatprep.mubr.f32.mxu0 %v553_v36 }
  0xd3   : > { %3803 = vmatmul.mubr.f32.gmra.mxu0 %v554_v37  ;;  %v4754_v37 = vrot.slane %v883_v30, %v1145_v5 }
  0xd4   : > { %3805 = vmatprep.mubr.f32.mxu0 %v555_v38 }
  0xd7   : > { %3806 = vmatmul.mubr.f32.gmra.mxu0 %v556_v39  ;;  %v884_v39 = vld [vmem:[#allocation11 + $0x8] sm:$0x7] }
  0xd8   : > { %3808 = vmatprep.mubr.f32.mxu0 %v557_v40  ;;  %v4774_v56 = vrot.slane %v884_v39, %v1145_v5  ;;  %v4776_v57 = vrot.slane %v884_v39, %v1281_v13 }
  0xdb   : > { %3809 = vmatmul.mubr.f32.gmra.mxu0 %v558_v41  ;;  %v4757_v41 = vrot.slane %v883_v30, %v1213_v4 }
  0xdc   : > { %3811 = vmatprep.mubr.f32.mxu0 %v559_v42  ;;  %v4759_v42 = vrot.slane %v883_v30, %v1281_v13 }
  0xdf   : > { %3812 = vmatmul.mubr.f32.gmra.mxu0 %v560_v43 }
  0xe0   : > { %3814 = vmatprep.mubr.f32.mxu0 %v561_v44 }
  0xe3   : > { %3815 = vmatmul.mubr.f32.gmra.mxu0 %v562_v45 }
  0xe4   : > { %3817 = vmatprep.mubr.f32.mxu0 %v563_v46  ;;  %v1315_v46 = vadd.f32 %v1283_v33, %v1247_v28 }
  0xe7   : > { %3818 = vmatmul.mubr.f32.gmra.mxu0 %v564_v47  ;;  %v1316_v47 = vadd.f32 %v1284_v34, %v1248_v32 }
  0xe8   : > { %3820 = vmatprep.mubr.f32.mxu0 %v565_v48  ;;  %v4762_v48 = vrot.slane %v884_v39, %v1213_v4 }
  0xeb   : > { %3821 = vmatmul.mubr.f32.gmra.mxu0 %v566_v49 }
 0x16b   : > { %v3774_v9 = vpop.f32.mrf.mxu0 }
 0x16d   : > { %v658_v10 = vpop.f32.mrf.mxu0 }
 0x16f   : > { %v3777_v15 = vpop.f32.mrf.mxu0 }
 0x170   : > { %v674_v21 = vadd.f32 %v3777_v15, %v4732_v16 }
 0x171   : > { %v668_v18 = vpop.f32.mrf.mxu0 }
 0x172   : > { %v669_v24 = vadd.f32 %v4732_v16, %v668_v18  ;;  %v954_v31 = vrot.slane %v674_v21, 7  ;;  %v1051_v35 = vrot.slane %v674_v21, 1  ;;  %v1218_v58 = vmul.f32 %v4721_v11, %v674_v21 }
 0x173   : > { %v3780_v26 = vpop.f32.mrf.mxu0  ;;  %v4780_v59 = vmul.f32 %v4757_v41, %v674_v21 }
 0x174   : > { %v953_v27 = vrot.slane %v669_v24, 7  ;;  %v1050_v43 = vrot.slane %v669_v24, 1  ;;  %v1128_v49 = vsel %vm1046_vm1, %v1051_v35, 0.0  ;;  %v1217_v54 = vmul.f32 %v4721_v11, %v669_v24 }
 0x175   : > { %v678_v29 = vpop.f32.mrf.mxu0  ;;  %v4772_v55 = vadd.f32 %v3780_v26, %v4732_v16  ;;  %v1286_v63 = vmul.f32 %v4740_v22, %v1128_v49  ;;  %v4788_v0 = vmul.f32 %v4759_v42, %v1128_v49  ;;  %v1676_v5 = vmul.f32 %v4757_v41, %v669_v24 }
 0x176   : > { %v1031_v36 = vsel %vm949_vm0, 0.0, %v953_v27  ;;  %v955_v40 = vsel %vm949_vm0, %v953_v27, %v954_v31  ;;  %v4783_v60 = vsel %vm1046_vm1, %v1050_v43, %v1051_v35  ;;  %v4791_v2 = vadd.f32 %v4732_v16, %v678_v29 }
 0x177   : > { %v3783_v38 = vpop.f32.mrf.mxu0  ;;  %v1149_v45 = vmul.f32 %v4723_v12, %v1031_v36  ;;  %v1150_v50 = vmul.f32 %v4723_v12, %v955_v40  ;;  %v1608_v51 = vmul.f32 %v4754_v37, %v1031_v36  ;;  %v1609_v61 = vmul.f32 %v4754_v37, %v955_v40 }
 0x178   : > { %v1285_v9 = vmul.f32 %v4740_v22, %v4783_v60  ;;  %v4799_v13 = vadd.f32 %v3783_v38, %v4732_v16  ;;  %v4808_v19 = vmul.f32 %v4721_v11, %v4772_v55  ;;  %v4812_v20 = vmul.f32 %v4757_v41, %v4772_v55 }
 0x179   : > { %v688_v44 = vpop.f32.mrf.mxu0  ;;  %v1249_v1 = vadd.f32 %v1217_v54, %v1149_v45  ;;  %v1250_v3 = vadd.f32 %v1218_v58, %v1150_v50  ;;  %v1640_v4 = vadd.f32 %v1608_v51, %v1315_v46  ;;  %v4804_v18 = vadd.f32 %v1609_v61, %v1316_v47 }
 0x17a   : > { %v4768_v52 = vadd.f32 %v4732_v16, %v688_v44  ;;  %v6772_v23 = vrot.slane %v4772_v55, 1  ;;  %v6773_v26 = vrot.slane %v4791_v2, 7  ;;  %v4820_v27 = vmul.f32 %v4721_v11, %v4791_v2 }
 0x17b   : > { %v3786_v53 = vpop.f32.mrf.mxu0  ;;  %v4815_v24 = vadd.f32 %v1285_v9, %v1249_v1  ;;  %v4824_v28 = vmul.f32 %v4757_v41, %v4791_v2  ;;  %v4826_v29 = vadd.f32 %v1286_v63, %v1250_v3  ;;  %v4828_v30 = vadd.f32 %v1676_v5, %v1640_v4 }
 0x17c   : > { %v6771_v6 = vrot.slane %v4768_v52, 7  ;;  %v4836_v32 = vadd.f32 %v3786_v53, %v4732_v16  ;;  %v4846_v39 = vmul.f32 %v4721_v11, %v4799_v13  ;;  %v4850_v40 = vmul.f32 %v4757_v41, %v4799_v13 }
 0x17d   : > { %v698_v62 = vpop.f32.mrf.mxu0  ;;  %v1221_v44 = vmul.f32 %v4721_v11, %v4768_v52  ;;  %v4859_v47 = vmul.f32 %v4757_v41, %v4768_v52  ;;  %v4867_v50 = vsel %vm949_vm0, 0.0, %v6773_v26  ;;  %v1053_v61 = vrot.slane %v4791_v2, 1 }
 0x17e   : > { %v4802_v15 = vadd.f32 %v4732_v16, %v698_v62  ;;  %v4833_v31 = vsel %vm949_vm0, 0.0, %v6771_v6  ;;  %v4877_v62 = vmul.f32 %v4721_v11, %v4836_v32  ;;  %v4881_v63 = vmul.f32 %v4757_v41, %v4836_v32 }
 0x17f   : > { %v3789_v7 = vpop.f32.mrf.mxu0  ;;  %v1153_v46 = vmul.f32 %v4723_v12, %v4833_v31  ;;  %v1610_v43 = vmul.f32 %v4754_v37, %v4867_v50 }
 0x180   : > { %v6770_v36 = vrot.slane %v4802_v15, 7  ;;  %v1223_v5 = vmul.f32 %v4721_v11, %v4802_v15  ;;  %v4893_v9 = vadd.f32 %v3789_v7, %v4732_v16 }
 0x181   : > { %v708_v21 = vpop.f32.mrf.mxu0 }
 0x182   : > { %v4842_v38 = vadd.f32 %v4732_v16, %v708_v21  ;;  %v4886_v1 = vsel %vm949_vm0, 0.0, %v6770_v36  ;;  %v4903_v36 = vmul.f32 %v4757_v41, %v4802_v15 }
 0x183   : > { %v3792_v33 = vpop.f32.mrf.mxu0  ;;  %v1155_v7 = vmul.f32 %v4723_v12, %v4886_v1  ;;  %v4926_v34 = vmul.f32 %v4754_v37, %v4886_v1 }
 0x184   : > { %v4862_v49 = vadd.f32 %v3792_v33, %v4732_v16  ;;  %v6774_v3 = vrot.slane %v4842_v38, 7  ;;  %v1225_v17 = vmul.f32 %v4721_v11, %v4842_v38 }
 0x185   : > { %v718_v45 = vpop.f32.mrf.mxu0  ;;  %v4958_v25 = vadd.f32 %v1223_v5, %v1155_v7 }
 0x186   : > { %6866 = vst [vmem:[#allocation32_spill] sm:$0xff] %v4862_v49  ;;  %v4872_v54 = vadd.f32 %v4732_v16, %v718_v45  ;;  %v4897_v21 = vmul.f32 %v4757_v41, %v4862_v49  ;;  %v4899_v45 = vadd.f32 %v1221_v44, %v1153_v46  ;;  %v4920_v44 = vsel %vm1046_vm1, %v1053_v61, %v6772_v23 }
 0x187   : > { %v3795_v58 = vpop.f32.mrf.mxu0  ;;  %v1151_v46 = vmul.f32 %v4723_v12, %v4867_v50  ;;  %v4940_v23 = vmul.f32 %v4721_v11, %v4893_v9  ;;  %v4992_v5 = vmul.f32 %v4721_v11, %v4862_v49 }
 0x188   : > { %6867 = vst [vmem:[#allocation33_spill] sm:$0xff] %v4872_v54  ;;  %6868 = vst [vmem:[#allocation34_spill] sm:$0xff] %v4897_v21  ;;  %v4907_v51 = vmul.f32 %v4757_v41, %v4872_v54  ;;  %v4910_v4 = vadd.f32 %v3795_v58, %v4732_v16  ;;  %v4931_v58 = vsel %vm949_vm0, 0.0, %v6774_v3  ;;  %v4948_v3 = vmul.f32 %v4757_v41, %v4893_v9 }
 0x189   : > { %v728_v33 = vpop.f32.mrf.mxu0  ;;  %6872 = vst [vmem:[#allocation38_spill] sm:$0xff] %v4940_v23  ;;  %v1157_v8 = vmul.f32 %v4723_v12, %v4931_v58  ;;  %v1251_v7 = vadd.f32 %v4820_v27, %v1151_v46  ;;  %v4980_v21 = vmul.f32 %v4754_v37, %v4931_v58  ;;  %6883 = vst [vmem:[#allocation48_spill] sm:$0xff] %v4992_v5 }
 0x18a   : > { %6869 = vst [vmem:[#allocation35_spill] sm:$0xff] %v4907_v51  ;;  %6870 = vst [vmem:[#allocation36_spill] sm:$0xff] %v4910_v4  ;;  %v4915_v53 = vadd.f32 %v4732_v16, %v728_v33  ;;  %v4944_v26 = vmul.f32 %v4757_v41, %v4910_v4  ;;  %v4969_v33 = vmul.f32 %v4757_v41, %v4842_v38 }
 0x18b   : > { %v3798_v6 = vpop.f32.mrf.mxu0  ;;  %6874 = vst [vmem:[#allocation40_spill] sm:$0xff] %v4948_v3  ;;  %6881 = vst [vmem:[#allocation46_spill] sm:$0xff] %v4980_v21  ;;  %v1287_v3 = vmul.f32 %v4740_v22, %v4920_v44  ;;  %v1227_v5 = vmul.f32 %v4721_v11, %v4872_v54 }
 0x18c   : > { %6871 = vst [vmem:[#allocation37_spill] sm:$0xff] %v4915_v53  ;;  %6873 = vst [vmem:[#allocation39_spill] sm:$0xff] %v4944_v26  ;;  %v4953_v61 = vmul.f32 %v4757_v41, %v4915_v53  ;;  %v4956_v35 = vadd.f32 %v3798_v6, %v4732_v16  ;;  %v6888_v49 = vrot.slane %v4915_v53, 7 }
 0x18d   : > { %v738_v10 = vpop.f32.mrf.mxu0  ;;  %6878 = vst [vmem:[#allocation44_spill] sm:$0xff] %v4969_v33 }
 0x18e   : > { %6875 = vst [vmem:[#allocation41_spill] sm:$0xff] %v4953_v61  ;;  %6876 = vst [vmem:[#allocation42_spill] sm:$0xff] %v4956_v35  ;;  %v4965_v14 = vadd.f32 %v4732_v16, %v738_v10  ;;  %v6879_v61 = vrot.slane %v4872_v54, 7  ;;  %v4985_v51 = vmul.f32 %v4757_v41, %v4956_v35  ;;  %v5001_v10 = vadd.f32 %v1225_v17, %v1157_v8 }
 0x18f   : > { %v3801_v26 = vpop.f32.mrf.mxu0  ;;  %v1612_v8 = vmul.f32 %v4754_v37, %v4833_v31 }
 0x190   : > { %6877 = vst [vmem:[#allocation43_spill] sm:$0xff] %v4965_v14  ;;  %v4974_v6 = vsel %vm949_vm0, 0.0, %v6879_v61  ;;  %6882 = vst [vmem:[#allocation47_spill] sm:$0xff] %v4985_v51  ;;  %v4996_v27 = vmul.f32 %v4757_v41, %v4965_v14  ;;  %v4999_v46 = vadd.f32 %v3801_v26, %v4732_v16  ;;  %v1319_v26 = vadd.f32 %v1287_v3, %v1251_v7 }
 0x191   : > { %6880 = vst [vmem:[#allocation45_spill] sm:$0xff] %v4974_v6  ;;  %v748_v23 = vpop.f32.mrf.mxu0  ;;  %6886 = vst [vmem:[#allocation51_spill] sm:$0xff] %v5001_v10  ;;  %v1159_v33 = vmul.f32 %v4723_v12, %v4974_v6  ;;  %v5020_v17 = vmul.f32 %v4754_v37, %v4974_v6  ;;  %v5031_v3 = vmul.f32 %v4721_v11, %v4910_v4  ;;  %v6897_v51 = vrot.slane %v4965_v14, 7 }
 0x192   : > { %6884 = vst [vmem:[#allocation49_spill] sm:$0xff] %v4996_v27  ;;  %6885 = vst [vmem:[#allocation50_spill] sm:$0xff] %v4999_v46  ;;  %v5007_v61 = vadd.f32 %v4732_v16, %v748_v23  ;;  %v5014_v27 = vsel %vm949_vm0, 0.0, %v6888_v49  ;;  %v5026_v10 = vmul.f32 %v4757_v41, %v4999_v46 }
 0x193   : > { %v3804_v21 = vpop.f32.mrf.mxu0  ;;  %6889 = vst [vmem:[#allocation53_spill] sm:$0xff] %v5020_v17  ;;  %6891 = vst [vmem:[#allocation55_spill] sm:$0xff] %v5031_v3  ;;  %v5040_v23 = vadd.f32 %v1227_v5, %v1159_v33  ;;  %v1229_v3 = vmul.f32 %v4721_v11, %v4915_v53  ;;  %v5055_v33 = vadd.f32 %v1612_v8, %v1319_v26 }
 0x194   : > { %6887 = vst [vmem:[#allocation52_spill] sm:$0xff] %v5007_v61  ;;  %6890 = vst [vmem:[#allocation54_spill] sm:$0xff] %v5026_v10  ;;  %v5035_v7 = vmul.f32 %v4757_v41, %v5007_v61  ;;  %v5038_v17 = vadd.f32 %v3804_v21, %v4732_v16  ;;  %v1161_v10 = vmul.f32 %v4723_v12, %v5014_v27 }
 0x195   : > { %v758_v54 = vpop.f32.mrf.mxu0  ;;  %6894 = vst [vmem:[#allocation58_spill] sm:$0xff] %v5040_v23  ;;  %v1642_v21 = vadd.f32 %v1610_v43, %v4815_v24  ;;  %v5061_v23 = vsel %vm949_vm0, 0.0, %v6897_v51  ;;  %v1744_v51 = vmul.f32 %v4759_v42, %v4783_v60  ;;  %v5082_v8 = vmul.f32 %v4721_v11, %v4956_v35 }
 0x196   : > { %6892 = vst [vmem:[#allocation56_spill] sm:$0xff] %v5035_v7  ;;  %6893 = vst [vmem:[#allocation57_spill] sm:$0xff] %v5038_v17  ;;  %v5046_v49 = vadd.f32 %v4732_v16, %v758_v54  ;;  %v5052_v7 = vmul.f32 %v4754_v37, %v5014_v27  ;;  %v5066_v53 = vmul.f32 %v4757_v41, %v5038_v17 }
 0x197   : > { %v3807_v6 = vpop.f32.mrf.mxu0  ;;  %v5078_v26 = vadd.f32 %v1229_v3, %v1161_v10  ;;  %6902 = vst [vmem:[#allocation65_spill] sm:$0xff] %v5082_v8  ;;  %v1710_v60 = vadd.f32 %v4824_v28, %v1642_v21  ;;  %v1776_v10 = vadd.f32 %v1744_v51, %v4828_v30  ;;  %v5096_v3 = vmul.f32 %v4754_v37, %v5061_v23 }
 0x198   : > { %6895 = vst [vmem:[#allocation59_spill] sm:$0xff] %v5046_v49  ;;  %6896 = vst [vmem:[#allocation60_spill] sm:$0xff] %v5052_v7  ;;  %v5071_v24 = vmul.f32 %v4757_v41, %v5046_v49  ;;  %v5074_v43 = vadd.f32 %v3807_v6, %v4732_v16  ;;  %v1231_v6 = vmul.f32 %v4721_v11, %v4965_v14 }
 0x199   : > { %6898 = vst [vmem:[#allocation61_spill] sm:$0xff] %v5066_v53  ;;  %v768_v4 = vpop.f32.mrf.mxu0  ;;  %6901 = vst [vmem:[#allocation64_spill] sm:$0xff] %v5078_v26  ;;  %v1163_v53 = vmul.f32 %v4723_v12, %v5061_v23  ;;  %v2069_v51 = vmul.f32 %v4774_v56, %v4867_v50  ;;  %v5121_v5 = vmul.f32 %v4721_v11, %v4999_v46 }
 0x19a   : > { %6899 = vst [vmem:[#allocation62_spill] sm:$0xff] %v5071_v24  ;;  %6900 = vst [vmem:[#allocation63_spill] sm:$0xff] %v5074_v43  ;;  %v5086_v7 = vadd.f32 %v4732_v16, %v768_v4  ;;  %v6905_v4 = vrot.slane %v5007_v61, 7  ;;  %v5106_v8 = vmul.f32 %v4757_v41, %v5074_v43  ;;  %v1233_v50 = vmul.f32 %v4721_v11, %v5007_v61 }
 0x19b   : > { %v3810_v54 = vpop.f32.mrf.mxu0  ;;  %6904 = vst [vmem:[#allocation67_spill] sm:$0xff] %v5096_v3  ;;  %6910 = vst [vmem:[#allocation72_spill] sm:$0xff] %v5121_v5  ;;  %v5127_v14 = vadd.f32 %v1231_v6, %v1163_v53  ;;  %v1746_v53 = vmul.f32 %v4759_v42, %v4920_v44  ;;  %v6915_v6 = vrot.slane %v5046_v49, 7  ;;  %v2137_v5 = vmul.f32 %v4762_v48, %v4791_v2 }
 0x19c   : > { %6903 = vst [vmem:[#allocation66_spill] sm:$0xff] %v5086_v7  ;;  %v5102_v24 = vsel %vm949_vm0, 0.0, %v6905_v4  ;;  %6907 = vst [vmem:[#allocation69_spill] sm:$0xff] %v5106_v8  ;;  %v5111_v30 = vmul.f32 %v4757_v41, %v5086_v7  ;;  %v5114_v21 = vadd.f32 %v3810_v54, %v4732_v16  ;;  %v5162_v61 = vmul.f32 %v4721_v11, %v5038_v17 }
 0x19d   : > { %6906 = vst [vmem:[#allocation68_spill] sm:$0xff] %v5102_v24  ;;  %v778_v26 = vpop.f32.mrf.mxu0  ;;  %6912 = vst [vmem:[#allocation74_spill] sm:$0xff] %v5127_v14  ;;  %v1165_v54 = vmul.f32 %v4723_v12, %v5102_v24  ;;  %v5135_v4 = vmul.f32 %v4754_v37, %v5102_v24  ;;  %v5147_v14 = vsel %vm949_vm0, 0.0, %v6915_v6 }
 0x19e   : > { %6908 = vst [vmem:[#allocation70_spill] sm:$0xff] %v5111_v30  ;;  %6909 = vst [vmem:[#allocation71_spill] sm:$0xff] %v5114_v21  ;;  %v5125_v28 = vadd.f32 %v4732_v16, %v778_v26  ;;  %v2101_v30 = vadd.f32 %v2069_v51, %v1776_v10  ;;  %v5140_v26 = vmul.f32 %v4757_v41, %v5114_v21 }
 0x19f   : > { %v3813_v3 = vpop.f32.mrf.mxu0  ;;  %6913 = vst [vmem:[#allocation75_spill] sm:$0xff] %v5135_v4  ;;  %6916 = vst [vmem:[#allocation77_spill] sm:$0xff] %v5147_v14  ;;  %v5167_v24 = vadd.f32 %v1233_v50, %v1165_v54  ;;  %v6922_v4 = vrot.slane %v5086_v7, 7  ;;  %v5183_v50 = vadd.f32 %v1746_v53, %v1710_v60 }
 0x1a0   : > { %6911 = vst [vmem:[#allocation73_spill] sm:$0xff] %v5125_v28  ;;  %6914 = vst [vmem:[#allocation76_spill] sm:$0xff] %v5140_v26  ;;  %v5151_v10 = vmul.f32 %v4757_v41, %v5125_v28  ;;  %v5154_v51 = vadd.f32 %v3813_v3, %v4732_v16  ;;  %v2169_v35 = vadd.f32 %v2137_v5, %v2101_v30 }
 0x1a1   : > { %v788_v8 = vpop.f32.mrf.mxu0  ;;  %6919 = vst [vmem:[#allocation80_spill] sm:$0xff] %v5162_v61  ;;  %6921 = vst [vmem:[#allocation82_spill] sm:$0xff] %v5167_v24  ;;  %v1167_v26 = vmul.f32 %v4723_v12, %v5147_v14  ;;  %v5177_v17 = vsel %vm949_vm0, 0.0, %v6922_v4  ;;  %v5187_v3 = vmul.f32 %v4754_v37, %v5147_v14  ;;  %v2205_v4 = vmul.f32 %v4776_v57, %v4920_v44 }
 0x1a2   : > { %6917 = vst [vmem:[#allocation78_spill] sm:$0xff] %v5151_v10  ;;  %6918 = vst [vmem:[#allocation79_spill] sm:$0xff] %v5154_v51  ;;  %v5165_v6 = vadd.f32 %v4732_v16, %v788_v8  ;;  %v1235_v10 = vmul.f32 %v4721_v11, %v5046_v49  ;;  %v5181_v8 = vmul.f32 %v4757_v41, %v5154_v51 }
 0x1a3   : > { %v3816_v46 = vpop.f32.mrf.mxu0  ;;  %6923 = vst [vmem:[#allocation83_spill] sm:$0xff] %v5177_v17  ;;  %6925 = vst [vmem:[#allocation85_spill] sm:$0xff] %v5187_v3  ;;  %v5206_v24 = vmul.f32 %v4721_v11, %v5074_v43  ;;  %v2237_v44 = vadd.f32 %v2205_v4, %v2169_v35  ;;  %v1237_v61 = vmul.f32 %v4721_v11, %v5086_v7 }
 0x1a4   : > { %6920 = vst [vmem:[#allocation81_spill] sm:$0xff] %v5165_v6  ;;  %6924 = vst [vmem:[#allocation84_spill] sm:$0xff] %v5181_v8  ;;  %v5191_v5 = vmul.f32 %v4757_v41, %v5165_v6  ;;  %v5194_v30 = vadd.f32 %v3816_v46, %v4732_v16  ;;  %v5211_v49 = vadd.f32 %v1235_v10, %v1167_v26  ;;  %v5226_v46 = vld [vmem:[%s6753_s6] ss:$0 sm:$0xff] }
 0x1a5   : > { %v798_v54 = vpop.f32.mrf.mxu0  ;;  %6929 = vst [vmem:[#allocation89_spill] sm:$0xff] %v5206_v24 }
 0x1a6   : > { %6926 = vst [vmem:[#allocation86_spill] sm:$0xff] %v5191_v5  ;;  %6927 = vst [vmem:[#allocation87_spill] sm:$0xff] %v5194_v30  ;;  %v5202_v53 = vadd.f32 %v4732_v16, %v798_v54  ;;  %v1169_v5 = vmul.f32 %v4723_v12, %v5177_v17  ;;  %v5217_v54 = vmul.f32 %v4754_v37, %v5177_v17 }
 0x1a7   : > { %v3819_v3 = vpop.f32.mrf.mxu0  ;;  %6930 = vst [vmem:[#allocation90_spill] sm:$0xff] %v5211_v49  ;;  %v5221_v8 = vmul.f32 %v4757_v41, %v5194_v30 }
 0x1a8   : > { %6928 = vst [vmem:[#allocation88_spill] sm:$0xff] %v5202_v53  ;;  %6931 = vst [vmem:[#allocation91_spill] sm:$0xff] %v5217_v54  ;;  %v5232_v10 = vmul.f32 %v4757_v41, %v5202_v53  ;;  %v5235_v4 = vadd.f32 %v3819_v3, %v4732_v16  ;;  %v6936_v54 = vrot.slane %v5125_v28, 7  ;;  %v5250_v7 = vadd.f32 %v1237_v61, %v1169_v5 }
 0x1a9   : > { %6932 = vst [vmem:[#allocation92_spill] sm:$0xff] %v5221_v8  ;;  %v808_v60 = vpop.f32.mrf.mxu0  ;;  %v5239_v8 = vmul.f32 %v4721_v11, %v5114_v21  ;;  %v1239_v3 = vmul.f32 %v4721_v11, %v5125_v28 }
 0x1aa   : > { %6933 = vst [vmem:[#allocation93_spill] sm:$0xff] %v5232_v10  ;;  %6934 = vst [vmem:[#allocation94_spill] sm:$0xff] %v5235_v4  ;;  %v5244_v24 = vsel %vm949_vm0, 0.0, %v6936_v54  ;;  %v5248_v26 = vadd.f32 %v4732_v16, %v808_v60  ;;  %v5261_v54 = vmul.f32 %v4757_v41, %v5235_v4 }
 0x1ab   : > { %6935 = vst [vmem:[#allocation95_spill] sm:$0xff] %v5239_v8  ;;  %6937 = vst [vmem:[#allocation96_spill] sm:$0xff] %v5244_v24  ;;  %v3822_v49 = vpop.f32.mrf.mxu0  ;;  %v5256_v8 = vadd.f32 %v5226_v46, %v2237_v44  ;;  %v1171_v5 = vmul.f32 %v4723_v12, %v5244_v24  ;;  %v5269_v10 = vmul.f32 %v4754_v37, %v5244_v24 }
 0x1ac   : > { %6938 = vst [vmem:[#allocation97_spill] sm:$0xff] %v5248_v26  ;;  %6939 = vst [vmem:[#allocation98_spill] sm:$0xff] %v5250_v7  ;;  %v6810_v60 = vrot.slane %v5248_v26, 7  ;;  %v1092_v35 = vrot.slane %v5248_v26, 1  ;;  %v5273_v44 = vmul.f32 %v4757_v41, %v5248_v26  ;;  %v5276_v21 = vadd.f32 %v3822_v49, %v4732_v16 }
 0x1ad   : > { %6940 = vst [vmem:[#allocation99_spill] sm:$0xff] %v5261_v54  ;;  %v818_v61 = vpop.f32.mrf.mxu0  ;;  %6941 = vst [vmem:[#allocation100_spill] sm:$0xff] %v5269_v10  ;;  %v6945_v7 = vrot.slane %v5235_v4, 1  ;;  %v6947_v49 = vrot.slane %v5165_v6, 7 }
 0x1ae   : > { %6942 = vst [vmem:[#allocation101_spill] sm:$0xff] %v5273_v44  ;;  %6943 = vst [vmem:[#allocation102_spill] sm:$0xff] %v5276_v21  ;;  %v5282_v28 = vsel %vm949_vm0, 0.0, %v6810_v60  ;;  %v5290_v10 = vadd.f32 %v4732_v16, %v818_v61  ;;  %v1245_v60 = vmul.f32 %v4721_v11, %v5248_v26  ;;  %v5308_v16 = vmul.f32 %v4757_v41, %v5276_v21 }
 0x1af   : > { %6944 = vst [vmem:[#allocation103_spill] sm:$0xff] %v5282_v28  ;;  %v5287_v43 = vsel %vm1046_vm1, %v1092_v35, %v6945_v7  ;;  %v5296_v24 = vsel %vm949_vm0, 0.0, %v6947_v49  ;;  %v1177_v54 = vmul.f32 %v4723_v12, %v5282_v28  ;;  %v5304_v7 = vmul.f32 %v4721_v11, %v5154_v51 }
 0x1b0   : > { %6946 = vst [vmem:[#allocation104_spill] sm:$0xff] %v5287_v43  ;;  %6948 = vst [vmem:[#allocation105_spill] sm:$0xff] %v5296_v24  ;;  %v6817_v35 = vrot.slane %v5290_v10, 7  ;;  %v5312_v61 = vmul.f32 0.70710677, %v5256_v8  ;;  %v1313_v17 = vmul.f32 %v4740_v22, %v5287_v43  ;;  %v1706_v26 = vmul.f32 %v4757_v41, %v5290_v10 }
 0x1b1   : > { %6949 = vst [vmem:[#allocation106_spill] sm:$0xff] %v5304_v7  ;;  %6950 = vst [vmem:[#allocation107_spill] sm:$0xff] %v5308_v16  ;;  %v1277_v44 = vadd.f32 %v1245_v60, %v1177_v54  ;;  %v5319_v51 = vadd.f32 %v1239_v3, %v1171_v5  ;;  %v1173_v16 = vmul.f32 %v4723_v12, %v5296_v24  ;;  %v6952_v41 = vrot.slane %v4772_v55, 7 }
 0x1b2   : > { %v5327_v14 = vsel %vm949_vm0, 0.0, %v6817_v35  ;;  %v1241_v54 = vmul.f32 %v4721_v11, %v5165_v6  ;;  %v6953_v3 = vrot.slane %v4791_v2, 7  ;;  %v5340_v7 = vmul.f32 %v4754_v37, %v5296_v24 }
 0x1b3   : > { %6951 = vst [vmem:[#allocation108_spill] sm:$0xff] %v5319_v51  ;;  %v1345_v60 = vadd.f32 %v1313_v17, %v1277_v44  ;;  %v1638_v49 = vmul.f32 %v4754_v37, %v5327_v14  ;;  %v2340_v6 = vand.u32 2147483647, %v5312_v61  ;;  %v5347_v17 = vmul.f32 %v4721_v11, %v5194_v30 }
 0x1b4   : > { %v958_v5 = vsel %vm949_vm0, %v6953_v3, %v6952_v41  ;;  %6954 = vst [vmem:[#allocation109_spill] sm:$0xff] %v5340_v7  ;;  %v6956_v44 = vrot.slane %v5202_v53, 7  ;;  %v1709_v3 = vadd.f32 %v4780_v59, %v4804_v18  ;;  %v5356_v7 = vadd.f32 %v1241_v54, %v1173_v16 }
 0x1b5   : > { %6955 = vst [vmem:[#allocation110_spill] sm:$0xff] %v5347_v17  ;;  %v1670_v41 = vadd.f32 %v1638_v49, %v1345_v60  ;;  %v1243_v43 = vmul.f32 %v4721_v11, %v5202_v53  ;;  %v2372_v24 = vmul.f32 0.3275911, %v2340_v6  ;;  %v6959_v17 = vrot.slane %v4772_v55, 1 }
 0x1b6   : > { %v5352_v2 = vsel %vm949_vm0, 0.0, %v6956_v44  ;;  %v1777_v44 = vadd.f32 %v4788_v0, %v1709_v3  ;;  %v2070_v49 = vmul.f32 %v4774_v56, %v958_v5  ;;  %v2071_v0 = vmul.f32 %v4774_v56, %v4833_v31 }
 0x1b7   : > { %6957 = vst [vmem:[#allocation111_spill] sm:$0xff] %v5352_v2  ;;  %v5361_v51 = vadd.f32 %v1706_v26, %v1670_v41  ;;  %v1129_v30 = vsel %vm1046_vm1, %v6959_v17, 0.0  ;;  %v1175_v59 = vmul.f32 %v4723_v12, %v5352_v2  ;;  %v5372_v18 = vmul.f32 %v4754_v37, %v5352_v2 }
 0x1b8   : > { %v2404_v54 = vadd.f32 1.0, %v2372_v24  ;;  %v1611_v26 = vmul.f32 %v4754_v37, %v958_v5  ;;  %v2102_v60 = vadd.f32 %v2070_v49, %v1777_v44  ;;  %v2138_v17 = vmul.f32 %v4762_v48, %v4772_v55 }
 0x1b9   : > { %6958 = vst [vmem:[#allocation112_spill] sm:$0xff] %v5361_v51  ;;  %6960 = vst [vmem:[#allocation113_spill] sm:$0xff] %v5372_v18  ;;  %v5382_v41 = vmul.f32 %v4721_v11, %v5235_v4  ;;  %v6962_v35 = vrot.slane %v4799_v13, 1  ;;  %v6963_v24 = vrot.slane %v4768_v52, 1  ;;  %v2206_v55 = vmul.f32 %v4776_v57, %v1129_v30 }
 0x1ba   : > { %4016 = vrcp.f32 %v2404_v54  ;;  %v2170_v44 = vadd.f32 %v2138_v17, %v2102_v60  ;;  %v2103_v49 = vadd.f32 %v2071_v0, %v5183_v50  ;;  %v2139_v31 = vmul.f32 %v4762_v48, %v4768_v52 }
 0x1bb   : > { %6961 = vst [vmem:[#allocation114_spill] sm:$0xff] %v5382_v41  ;;  %v5390_v16 = vsel %vm1046_vm1, %v6963_v24, %v6962_v35  ;;  %v5396_v11 = vadd.f32 %v1243_v43, %v1175_v59  ;;  %v5400_v54 = vmul.f32 %v4754_v37, %v5282_v28  ;;  %v1458_v3 = vrot.slane %v5276_v21, 7 }
 0x1bc   : > { %v1152_v51 = vmul.f32 %v4723_v12, %v958_v5  ;;  %v2238_v35 = vadd.f32 %v2206_v55, %v2170_v44  ;;  %v2171_v24 = vadd.f32 %v2139_v31, %v2103_v49  ;;  %v2207_v60 = vmul.f32 %v4776_v57, %v5390_v16 }
 0x1bd   : > { %6964 = vst [vmem:[#allocation115_spill] sm:$0xff] %v5396_v11  ;;  %6965 = vst [vmem:[#allocation116_spill] sm:$0xff] %v5400_v54  ;;  %v1643_v50 = vadd.f32 %v1611_v26, %v4826_v29  ;;  %v6966_v17 = vrot.slane %v5276_v21, 1  ;;  %v5414_v59 = vmul.f32 %v4762_v48, %v5276_v21  ;;  %v2756_v0 = vsub.f32 0.0, %v2340_v6 }
 0x1be   : > { %v6969_v54 = vrot.slane %v4799_v13, 7  ;;  %v6970_v5 = vrot.slane %v4768_v52, 7  ;;  %v1747_v55 = vmul.f32 %v4759_v42, %v1129_v30  ;;  %v5423_v29 = vadd.f32 %v5226_v46, %v2238_v35 }
 0x1bf   : > { %v5410_v43 = vsel %vm1046_vm1, %v6966_v17, 0.0  ;;  %6968 = vst [vmem:[#allocation118_spill] sm:$0xff] %v5414_v59  ;;  %v2239_v26 = vadd.f32 %v2207_v60, %v2171_v24  ;;  %v1711_v49 = vadd.f32 %v4812_v20, %v1643_v50  ;;  %v1252_v31 = vadd.f32 %v4808_v19, %v1152_v51 }
 0x1c0   : > { %6967 = vst [vmem:[#allocation117_spill] sm:$0xff] %v5410_v43  ;;  %v961_v44 = vsel %vm949_vm0, %v6970_v5, %v6969_v54  ;;  %v1288_v17 = vmul.f32 %v4740_v22, %v1129_v30  ;;  %v1748_v59 = vmul.f32 %v4759_v42, %v5390_v16  ;;  %v1712_v52 = vadd.f32 %v4859_v47, %v5055_v33 }
 0x1c1   : > { %v5433_v54 = vmul.f32 0.70710677, %v5423_v29  ;;  %v5436_v5 = vadd.f32 %v5226_v46, %v2239_v26  ;;  %v1779_v35 = vadd.f32 %v1747_v55, %v1711_v49  ;;  %v2072_v24 = vmul.f32 %v4774_v56, %v961_v44 }
 0x1c2   : > { %v2788_v20 = vmul.f32 %v2756_v0, %v2340_v6  ;;  %v6971_v19 = vrot.slane %v4799_v13, 1  ;;  %v1780_v30 = vadd.f32 %v1748_v59, %v1712_v52  ;;  %v2073_v60 = vmul.f32 %v4774_v56, %v4886_v1 }
 0x1c3   : > { %v2341_v47 = vand.u32 2147483647, %v5433_v54  ;;  %v5446_v33 = vmul.f32 0.70710677, %v5436_v5  ;;  %v2104_v50 = vadd.f32 %v2072_v24, %v1779_v35  ;;  %v6972_v26 = vrot.slane %v4836_v32, 1 }
 0x1c4   : > { %v1130_v51 = vsel %vm1046_vm1, %v6971_v19, 0.0  ;;  %v6973_v55 = vrot.slane %v4802_v15, 1  ;;  %v2140_v59 = vmul.f32 %v4762_v48, %v4799_v13  ;;  %v2105_v49 = vadd.f32 %v2073_v60, %v1780_v30 }
 0x1c5   : > { %v2141_v1 = vmul.f32 %v4762_v48, %v4802_v15  ;;  %v1320_v52 = vadd.f32 %v1288_v17, %v1252_v31  ;;  %v2373_v19 = vmul.f32 0.3275911, %v2341_v47  ;;  %v2342_v21 = vand.u32 2147483647, %v5446_v33 }
 0x1c6   : > { %v1061_v6 = vsel %vm1046_vm1, %v6973_v55, %v6972_v26  ;;  %v1154_v35 = vmul.f32 %v4723_v12, %v961_v44  ;;  %v2172_v24 = vadd.f32 %v2140_v59, %v2104_v50  ;;  %v2208_v41 = vmul.f32 %v4776_v57, %v1130_v51 }
 0x1c7   : > { %v2173_v4 = vadd.f32 %v2141_v1, %v2105_v49  ;;  %v2209_v26 = vmul.f32 %v4776_v57, %v1061_v6  ;;  %v5462_v55 = vpop.eup %4016  ;;  %v2820_v0 = vmul.f32 1.442695, %v2788_v20  ;;  %v2405_v13 = vadd.f32 1.0, %v2373_v19 }
 0x1c8   : > { %v2374_v30 = vmul.f32 0.3275911, %v2342_v21  ;;  %v1613_v60 = vmul.f32 %v4754_v37, %v961_v44  ;;  %v5467_v31 = vmul.f32 %v4759_v42, %v5410_v43  ;;  %v2468_v17 = vmul.f32 1.0614054, %v5462_v55 }
 0x1c9   : > { %v2240_v28 = vadd.f32 %v2208_v41, %v2172_v24  ;;  %v2241_v50 = vadd.f32 %v2209_v26, %v2173_v4  ;;  %v6975_v59 = vrot.slane %v5290_v10, 7  ;;  %4018 = vrcp.f32 %v2405_v13 }
 0x1ca   : > { %6974 = vst [vmem:[#allocation119_spill] sm:$0xff] %v5467_v31  ;;  %v2406_v1 = vadd.f32 1.0, %v2374_v30  ;;  %v1254_v20 = vadd.f32 %v4846_v39, %v1154_v35  ;;  %v2500_v19 = vadd.f32 -1.4531521, %v2468_v17  ;;  %v1289_v44 = vmul.f32 %v4740_v22, %v5390_v16 }
 0x1cb   : > { %v5473_v49 = vsel %vm949_vm0, %v6975_v59, %v1458_v3  ;;  %v5479_v43 = vadd.f32 %v5226_v46, %v2240_v28  ;;  %v5482_v31 = vadd.f32 %v5226_v46, %v2241_v50  ;;  %4020 = vpow2.f32 %v2820_v0 }
 0x1cc   : > { %v1290_v4 = vmul.f32 %v4740_v22, %v1130_v51  ;;  %v6976_v41 = vrot.slane %v4836_v32, 7  ;;  %v6977_v3 = vrot.slane %v4802_v15, 7  ;;  %v1645_v39 = vadd.f32 %v1613_v60, %v1320_v52 }
 0x1cd   : > { %v2532_v35 = vmul.f32 %v5462_v55, %v2500_v19  ;;  %4022 = vrcp.f32 %v2406_v1  ;;  %v5492_v16 = vmul.f32 0.70710677, %v5479_v43  ;;  %v5495_v28 = vmul.f32 0.70710677, %v5482_v31 }
 0x1ce   : > { %v964_v24 = vsel %vm949_vm0, %v6977_v3, %v6976_v41  ;;  %v1321_v0 = vadd.f32 %v1289_v44, %v4899_v45  ;;  %v5498_v26 = vadd.f32 %v1290_v4, %v1254_v20  ;;  %v1749_v13 = vmul.f32 %v4759_v42, %v1130_v51 }
 0x1cf   : > { %v1713_v15 = vadd.f32 %v4850_v40, %v1645_v39  ;;  %v2564_v30 = vadd.f32 1.4214138, %v2532_v35  ;;  %v2757_v17 = vsub.f32 0.0, %v2341_v47  ;;  %v2343_v52 = vand.u32 2147483647, %v5492_v16 }
 0x1d0   : > { %v5504_v60 = vmul.f32 %v4740_v22, %v1061_v6  ;;  %v1750_v50 = vmul.f32 %v4759_v42, %v1061_v6  ;;  %v2344_v59 = vand.u32 2147483647, %v5495_v28  ;;  %v2074_v45 = vmul.f32 %v4774_v56, %v964_v24 }
 0x1d1   : > { %v1781_v1 = vadd.f32 %v1749_v13, %v1713_v15  ;;  %v2596_v20 = vmul.f32 %v5462_v55, %v2564_v30  ;;  %v2758_v19 = vsub.f32 0.0, %v2342_v21  ;;  %v2375_v51 = vmul.f32 0.3275911, %v2343_v52 }
 0x1d2   : > { %v6978_v40 = vrot.slane %v4836_v32, 1  ;;  %v2759_v4 = vsub.f32 0.0, %v2343_v52  ;;  %v2376_v41 = vmul.f32 0.3275911, %v2344_v59  ;;  %v2142_v6 = vmul.f32 %v4762_v48, %v4836_v32 }
 0x1d3   : > { %v2106_v3 = vadd.f32 %v2074_v45, %v1781_v1  ;;  %v2628_v39 = vadd.f32 -0.28449672, %v2596_v20  ;;  %v2789_v35 = vmul.f32 %v2757_v17, %v2341_v47  ;;  %v2407_v13 = vadd.f32 1.0, %v2375_v51 }
 0x1d4   : > { %v5513_v44 = vsel %vm1046_vm1, %v6978_v40, 0.0  ;;  %v1646_v15 = vadd.f32 %v4926_v34, %v1321_v0  ;;  %v2408_v18 = vadd.f32 1.0, %v2376_v41  ;;  %v2760_v30 = vsub.f32 0.0, %v2344_v59 }
 0x1d5   : > { %v2174_v11 = vadd.f32 %v2142_v6, %v2106_v3  ;;  %v2210_v53 = vmul.f32 %v4776_v57, %v5513_v44  ;;  %v2660_v40 = vmul.f32 %v5462_v55, %v2628_v39  ;;  %v2790_v2 = vmul.f32 %v2758_v19, %v2342_v21 }
 0x1d6   : > { %4024 = vrcp.f32 %v2407_v13  ;;  %v1714_v1 = vadd.f32 %v4903_v36, %v1646_v15  ;;  %v2791_v45 = vmul.f32 %v2759_v4, %v2343_v52  ;;  %v1156_v32 = vmul.f32 %v4723_v12, %v964_v24  ;;  %v5523_v17 = vpop.eup %4018 }
 0x1d7   : > { %4026 = vrcp.f32 %v2408_v18  ;;  %v2242_v47 = vadd.f32 %v2210_v53, %v2174_v11  ;;  %v2692_v34 = vadd.f32 0.2548296, %v2660_v40  ;;  %v2822_v0 = vmul.f32 1.442695, %v2789_v35 }
 0x1d8   : > { %v1782_v20 = vadd.f32 %v1750_v50, %v1714_v1  ;;  %v2075_v51 = vmul.f32 %v4774_v56, %v4931_v58  ;;  %vm2948_vm2 = vcmp.lt.f32.partialorder %v5312_v61, 0.0  ;;  %v2469_v21 = vmul.f32 1.0614054, %v5523_v17  ;;  %v4021_v52 = vpop.eup %4020 }
 0x1d9   : > { %v2792_v19 = vmul.f32 %v2760_v30, %v2344_v59  ;;  %v5530_v36 = vadd.f32 %v5226_v46, %v2242_v47  ;;  %v6979_v18 = vrot.slane %v4893_v9, 1  ;;  %v6980_v53 = vrot.slane %v4842_v38, 1 }
 0x1da   : > { %v2724_v50 = vmul.f32 %v5462_v55, %v2692_v34  ;;  %v2824_v4 = vmul.f32 1.442695, %v2790_v2  ;;  %v2107_v58 = vadd.f32 %v2075_v51, %v1782_v20  ;;  %v2143_v41 = vmul.f32 %v4762_v48, %v4842_v38  ;;  %v5542_v3 = vpop.eup %4022 }
 0x1db   : > { %v5537_v11 = vsel %vm1046_vm1, %v6980_v53, %v6979_v18  ;;  %v2501_v59 = vadd.f32 -1.4531521, %v2469_v21  ;;  %v2826_v6 = vmul.f32 1.442695, %v2791_v45  ;;  %v1615_v39 = vmul.f32 %v4754_v37, %v964_v24 }
 0x1dc   : > { %v5546_v35 = vmul.f32 0.70710677, %v5530_v36  ;;  %v2884_v13 = vmul.f32 %v4021_v52, %v2724_v50  ;;  %v2470_v15 = vmul.f32 1.0614054, %v5542_v3  ;;  %v2175_v30 = vadd.f32 %v2143_v41, %v2107_v58 }
 0x1dd   : > { %v2211_v2 = vmul.f32 %v4776_v57, %v5537_v11  ;;  %v2533_v55 = vmul.f32 %v5523_v17, %v2501_v59  ;;  %4028 = vpow2.f32 %v2822_v0  ;;  %v2828_v40 = vmul.f32 1.442695, %v2792_v19 }
 0x1de   : > { %v2345_v1 = vand.u32 2147483647, %v5546_v35  ;;  %v2916_v47 = vsub.f32 1.0, %v2884_v13  ;;  %v2502_v45 = vadd.f32 -1.4531521, %v2470_v15  ;;  %4030 = vpow2.f32 %v2824_v4 }
 0x1df   : > { %v2243_v24 = vadd.f32 %v2211_v2, %v2175_v30  ;;  %v2565_v34 = vadd.f32 1.4214138, %v2533_v55  ;;  %4032 = vpow2.f32 %v2826_v6  ;;  %v5555_v20 = vadd.f32 %v5504_v60, %v4958_v25 }
 0x1e0   : > { %v2377_v51 = vmul.f32 0.3275911, %v2345_v1  ;;  %v2980_v21 = vsub.f32 0.0, %v2916_v47  ;;  %v2534_v18 = vmul.f32 %v5542_v3, %v2502_v45  ;;  %v1647_v0 = vadd.f32 %v1615_v39, %v5498_v26 }
 0x1e1   : > { %v5559_v53 = vadd.f32 %v5226_v46, %v2243_v24  ;;  %v2597_v19 = vmul.f32 %v5523_v17, %v2565_v34  ;;  %4034 = vpow2.f32 %v2828_v40  ;;  %v1256_v52 = vadd.f32 %v4877_v62, %v1156_v32 }
 0x1e2   : > { %v2409_v50 = vadd.f32 1.0, %v2377_v51  ;;  %v3012_v4 = vsel %vm2948_vm2, %v2980_v21, %v2916_v47  ;;  %v2566_v25 = vadd.f32 1.4214138, %v2534_v18  ;;  %v1715_v58 = vadd.f32 %v4881_v63, %v1647_v0 }
 0x1e3   : > { %v5567_v60 = vmul.f32 0.70710677, %v5559_v53  ;;  %v5570_v41 = vpop.eup %4024  ;;  %v3044_v59 = vmul.f32 0.5, %v3012_v4  ;;  %v2629_v6 = vadd.f32 -0.28449672, %v2597_v19  ;;  %v1751_v26 = vmul.f32 %v4759_v42, %v5513_v44 }
 0x1e4   : > { %4036 = vrcp.f32 %v2409_v50  ;;  %v5574_v39 = vpop.eup %4026  ;;  %v2598_v62 = vmul.f32 %v5542_v3, %v2566_v25  ;;  %v2471_v61 = vmul.f32 1.0614054, %v5570_v41  ;;  %v6981_v13 = vrot.slane %v4893_v9, 7 }
 0x1e5   : > { %v2346_v32 = vand.u32 2147483647, %v5567_v60  ;;  %v6982_v63 = vrot.slane %v4842_v38, 7  ;;  %v3076_v30 = vadd.f32 0.5, %v3044_v59  ;;  %v2661_v2 = vmul.f32 %v5523_v17, %v2629_v6 }
 0x1e6   : > { %v2472_v55 = vmul.f32 1.0614054, %v5574_v39  ;;  %v2761_v40 = vsub.f32 0.0, %v2345_v1  ;;  %v2630_v47 = vadd.f32 -0.28449672, %v2598_v62  ;;  %v1783_v34 = vadd.f32 %v1751_v26, %v1715_v58 }
 0x1e7   : > { %v5584_v15 = vsel %vm949_vm0, %v6982_v63, %v6981_v13  ;;  %v2503_v45 = vadd.f32 -1.4531521, %v2471_v61  ;;  %v2378_v24 = vmul.f32 0.3275911, %v2346_v32  ;;  %v3108_v51 = vmul.f32 %v3076_v30, %v5256_v8 }
 0x1e8   : > { %v2693_v21 = vadd.f32 0.2548296, %v2661_v2  ;;  %v2504_v18 = vadd.f32 -1.4531521, %v2472_v55  ;;  %v6983_v0 = vrot.slane %v4893_v9, 1  ;;  %vm2949_vm3 = vcmp.lt.f32.partialorder %v5433_v54, 0.0 }
 0x1e9   : > { %v2662_v19 = vmul.f32 %v5542_v3, %v2630_v47  ;;  %v2535_v50 = vmul.f32 %v5570_v41, %v2503_v45  ;;  %v2410_v4 = vadd.f32 1.0, %v2378_v24  ;;  %v2076_v25 = vmul.f32 %v4774_v56, %v5584_v15  ;;  %3858 = vmatprep.mubr.f32.mxu1 %v3108_v51 }
 0x1ea   : > { %v5592_v38 = vsel %vm1046_vm1, %v6983_v0, 0.0  ;;  %v2725_v8 = vmul.f32 %v5523_v17, %v2693_v21  ;;  %v2536_v58 = vmul.f32 %v5574_v39, %v2504_v18  ;;  %v2793_v59 = vmul.f32 %v2761_v40, %v2345_v1  ;;  %v4029_v26 = vpop.eup %4028 }
 0x1eb   : > { %v2144_v6 = vmul.f32 %v4762_v48, %v4893_v9  ;;  %v2694_v62 = vadd.f32 0.2548296, %v2662_v19  ;;  %v2567_v61 = vadd.f32 1.4214138, %v2535_v50  ;;  %4038 = vrcp.f32 %v2410_v4  ;;  %v4031_v63 = vpop.eup %4030  ;;  %v6984_v50 = vld [vmem:[#allocation46_spill] sm:$0xff] }
 0x1ec   : > { %v2108_v13 = vadd.f32 %v2076_v25, %v1783_v34  ;;  %v2885_v30 = vmul.f32 %v4029_v26, %v2725_v8  ;;  %vm2950_vm4 = vcmp.lt.f32.partialorder %v5446_v33, 0.0  ;;  %v2568_v2 = vadd.f32 1.4214138, %v2536_v58  ;;  %v4033_v47 = vpop.eup %4032  ;;  %v6987_v33 = vld [vmem:[#allocation33_spill] sm:$0xff] }
 0x1ed   : > { %v1292_v55 = vmul.f32 %v4740_v22, %v5513_v44  ;;  %v2762_v17 = vsub.f32 0.0, %v2346_v32  ;;  %v2726_v1 = vmul.f32 %v5542_v3, %v2694_v62  ;;  %v2599_v40 = vmul.f32 %v5570_v41, %v2567_v61  ;;  %v6985_v62 = vld [vmem:[#allocation44_spill] sm:$0xff] }
 0x1ee   : > { %v2176_v9 = vadd.f32 %v2144_v6, %v2108_v13  ;;  %v2212_v45 = vmul.f32 %v4776_v57, %v5592_v38  ;;  %v2917_v24 = vsub.f32 1.0, %v2885_v30  ;;  %v2600_v34 = vmul.f32 %v5574_v39, %v2568_v2  ;;  %v4035_v18 = vpop.eup %4034 }
 0x1ef   : > { %v5611_v51 = vadd.f32 %v1292_v55, %v1256_v52  ;;  %v2830_v21 = vmul.f32 1.442695, %v2793_v59  ;;  %v2886_v0 = vmul.f32 %v4031_v63, %v2726_v1  ;;  %v2631_v19 = vadd.f32 -0.28449672, %v2599_v40 }
 0x1f0   : > { %v2244_v44 = vadd.f32 %v2212_v45, %v2176_v9  ;;  %v1648_v4 = vadd.f32 %v6984_v50, %v5555_v20  ;;  %v2981_v3 = vsub.f32 0.0, %v2917_v24  ;;  %v2632_v25 = vadd.f32 -0.28449672, %v2600_v34 }
 0x1f1   : > { %v1752_v8 = vmul.f32 %v4759_v42, %v5537_v11  ;;  %v2794_v58 = vmul.f32 %v2762_v17, %v2346_v32  ;;  %v5617_v6 = vpop.eup %4036  ;;  %v2918_v26 = vsub.f32 1.0, %v2886_v0  ;;  %v2663_v52 = vmul.f32 %v5570_v41, %v2631_v19 }
 0x1f2   : > { %v5621_v59 = vadd.f32 %v5226_v46, %v2244_v44  ;;  %v1716_v61 = vadd.f32 %v6985_v62, %v1648_v4  ;;  %v3013_v13 = vsel %vm2949_vm3, %v2981_v3, %v2917_v24  ;;  %v2664_v20 = vmul.f32 %v5574_v39, %v2632_v25  ;;  %v6986_v44 = vld [vmem:[#allocation45_spill] sm:$0xff] }
 0x1f3   : > { %v2473_v63 = vmul.f32 1.0614054, %v5617_v6  ;;  %4040 = vpow2.f32 %v2830_v21  ;;  %v3045_v30 = vmul.f32 0.5, %v3013_v13  ;;  %v2982_v32 = vsub.f32 0.0, %v2918_v26 }
 0x1f4   : > { %v2695_v2 = vadd.f32 0.2548296, %v2663_v52  ;;  %v5629_v55 = vmul.f32 0.70710677, %v5621_v59  ;;  %v2696_v17 = vadd.f32 0.2548296, %v2664_v20  ;;  %v1784_v9 = vadd.f32 %v1752_v8, %v1716_v61 }
 0x1f5   : > { %v2505_v1 = vadd.f32 -1.4531521, %v2473_v63  ;;  %v2832_v40 = vmul.f32 1.442695, %v2794_v58  ;;  %v3077_v45 = vadd.f32 0.5, %v3045_v30  ;;  %v3014_v54 = vsel %vm2950_vm4, %v2982_v32, %v2918_v26  ;;  %v6988_v20 = vld [vmem:[#allocation32_spill] sm:$0xff] }
 0x1f6   : > { %v2727_v24 = vmul.f32 %v5570_v41, %v2695_v2  ;;  %v5635_v34 = vand.u32 2147483647, %v5629_v55  ;;  %v3046_v21 = vmul.f32 0.5, %v3014_v54  ;;  %v2728_v0 = vmul.f32 %v5574_v39, %v2696_v17 }
 0x1f7   : > { %v2537_v19 = vmul.f32 %v5617_v6, %v2505_v1  ;;  %v2077_v50 = vmul.f32 %v4774_v56, %v6986_v44  ;;  %v3109_v4 = vmul.f32 %v3077_v45, %v5423_v29  ;;  %v2145_v8 = vmul.f32 %v4762_v48, %v6987_v33 }
 0x1f8   : > { %v2887_v3 = vmul.f32 %v4033_v47, %v2727_v24  ;;  %v2379_v25 = vmul.f32 0.3275911, %v5635_v34  ;;  %v5645_v41 = vpop.eup %4038  ;;  %v3078_v58 = vadd.f32 0.5, %v3046_v21  ;;  %v2888_v26 = vmul.f32 %v4035_v18, %v2728_v0 }
 0x1f9   : > { %v2569_v52 = vadd.f32 1.4214138, %v2537_v19  ;;  %v2109_v62 = vadd.f32 %v2077_v50, %v1784_v9  ;;  %3859 = vmatmul.mubr.f32.vlgmr.msra.gmra.mxu1 %v3109_v4  ;;  %v2474_v61 = vmul.f32 1.0614054, %v5645_v41  ;;  %v6989_v63 = vrot.slane %v6988_v20, 1 }
 0x1fa   : > { %v2919_v39 = vsub.f32 1.0, %v2887_v3  ;;  %v2411_v13 = vadd.f32 1.0, %v2379_v25  ;;  %v6990_v29 = vrot.slane %v6987_v33, 1  ;;  %v3110_v30 = vmul.f32 %v3078_v58, %v5436_v5 }
 0x1fb   : > { %v2920_v32 = vsub.f32 1.0, %v2888_v26  ;;  %v2601_v2 = vmul.f32 %v5617_v6, %v2569_v52  ;;  %v2177_v18 = vadd.f32 %v2145_v8, %v2109_v62  ;;  %vm2951_vm5 = vcmp.lt.f32.partialorder %v5492_v16, 0.0  ;;  %v6991_v62 = vld [vmem:[#allocation51_spill] sm:$0xff] }
 0x1fc   : > { %v5653_v47 = vsel %vm1046_vm1, %v6990_v29, %v6989_v63  ;;  %v2983_v17 = vsub.f32 0.0, %v2919_v39  ;;  %v2506_v1 = vadd.f32 -1.4531521, %v2474_v61  ;;  %4042 = vrcp.f32 %v2411_v13  ;;  %3861 = vmatprep.mubr.f32.mxu1 %v3110_v30 }
 0x1fd   : > { %vm2952_vm6 = vcmp.lt.f32.partialorder %v5495_v28, 0.0  ;;  %v2984_v9 = vsub.f32 0.0, %v2920_v32  ;;  %v2633_v45 = vadd.f32 -0.28449672, %v2601_v2  ;;  %v2213_v54 = vmul.f32 %v4776_v57, %v5653_v47 }
 0x1fe   : > { %v3015_v24 = vsel %vm2951_vm5, %v2983_v17, %v2919_v39  ;;  %v2538_v5 = vmul.f32 %v5645_v41, %v2506_v1  ;;  %4044 = vpow2.f32 %v2832_v40  ;;  %v1617_v21 = vmul.f32 %v4754_v37, %v5584_v15  ;;  %v6994_v17 = vld [vmem:[#allocation40_spill] sm:$0xff]  ;;  %v6995_v1 = vld [vmem:[#allocation38_spill] sm:$0xff] }
 0x1ff   : > { %v3047_v0 = vmul.f32 0.5, %v3015_v24  ;;  %v3016_v16 = vsel %vm2952_vm6, %v2984_v9, %v2920_v32  ;;  %v2665_v19 = vmul.f32 %v5617_v6, %v2633_v45  ;;  %v2245_v44 = vadd.f32 %v2213_v54, %v2177_v18 }
 0x200   : > { %v4041_v50 = vpop.eup %4040  ;;  %v3048_v4 = vmul.f32 0.5, %v3016_v16  ;;  %v1293_v28 = vmul.f32 %v4740_v22, %v5537_v11  ;;  %v2570_v3 = vadd.f32 1.4214138, %v2538_v5  ;;  %v1158_v25 = vmul.f32 %v4723_v12, %v5584_v15 }
 0x201   : > { %v3079_v8 = vadd.f32 0.5, %v3047_v0  ;;  %v2697_v58 = vadd.f32 0.2548296, %v2665_v19  ;;  %v2763_v40 = vsub.f32 0.0, %v5635_v34  ;;  %v5671_v26 = vadd.f32 %v5226_v46, %v2245_v44 }
 0x202   : > { %v3080_v52 = vadd.f32 0.5, %v3048_v4  ;;  %v1325_v39 = vadd.f32 %v1293_v28, %v6991_v62  ;;  %v2602_v61 = vmul.f32 %v5645_v41, %v2570_v3  ;;  %v1649_v13 = vadd.f32 %v1617_v21, %v5611_v51  ;;  %v6997_v4 = vld [vmem:[#allocation53_spill] sm:$0xff] }
 0x203   : > { %v3111_v11 = vmul.f32 %v3079_v8, %v5479_v43  ;;  %v2729_v63 = vmul.f32 %v5617_v6, %v2697_v58  ;;  %v5679_v15 = vmul.f32 0.70710677, %v5671_v26  ;;  %v6992_v29 = vrot.slane %v6988_v20, 7 }
 0x204   : > { %v6993_v30 = vrot.slane %v6987_v33, 7  ;;  %v3112_v2 = vmul.f32 %v3080_v52, %v5482_v31  ;;  %v2634_v18 = vadd.f32 -0.28449672, %v2602_v61  ;;  %v1753_v51 = vmul.f32 %v4759_v42, %v5592_v38 }
 0x205   : > { %v1717_v43 = vadd.f32 %v6994_v17, %v1649_v13  ;;  %3862 = vmatmul.mubr.f32.gmra.mxu1 %v3111_v11  ;;  %v2889_v6 = vmul.f32 %v4041_v50, %v2729_v63  ;;  %v1258_v9 = vadd.f32 %v6995_v1, %v1158_v25  ;;  %v2795_v45 = vmul.f32 %v2763_v40, %v5635_v34  ;;  %v6998_v11 = vld [vmem:[#allocation35_spill] sm:$0xff]  ;;  %v7001_v17 = vld [vmem:[#allocation37_spill] sm:$0xff] }
 0x206   : > { %v5686_v32 = vsel %vm949_vm0, %v6993_v30, %v6992_v29  ;;  %v2348_v54 = vand.u32 2147483647, %v5679_v15  ;;  %3864 = vmatprep.mubr.f32.mxu1 %v3112_v2  ;;  %v2666_v33 = vmul.f32 %v5645_v41, %v2634_v18  ;;  %v1294_v31 = vmul.f32 %v4740_v22, %v5592_v38  ;;  %v6999_v18 = vld [vmem:[#allocation36_spill] sm:$0xff] }
 0x207   : > { %v1785_v24 = vadd.f32 %v1753_v51, %v1717_v43  ;;  %v2078_v5 = vmul.f32 %v4774_v56, %v5686_v32  ;;  %v2921_v21 = vsub.f32 1.0, %v2889_v6  ;;  %vm2953_vm7 = vcmp.lt.f32.partialorder %v5546_v35, 0.0 }
 0x208   : > { %v2380_v0 = vmul.f32 0.3275911, %v2348_v54  ;;  %v6996_v16 = vrot.slane %v6988_v20, 1  ;;  %v2698_v19 = vadd.f32 0.2548296, %v2666_v33  ;;  %v2146_v50 = vmul.f32 %v4762_v48, %v6988_v20 }
 0x209   : > { %v2110_v44 = vadd.f32 %v2078_v5, %v1785_v24  ;;  %v1650_v38 = vadd.f32 %v6997_v4, %v1325_v39  ;;  %v5709_v28 = vpop.eup %4042  ;;  %v2985_v3 = vsub.f32 0.0, %v2921_v21  ;;  %v1326_v25 = vadd.f32 %v1294_v31, %v1258_v9 }
 0x20a   : > { %v5704_v34 = vsel %vm1046_vm1, %v6996_v16, 0.0  ;;  %v2834_v8 = vmul.f32 1.442695, %v2795_v45  ;;  %v2412_v58 = vadd.f32 1.0, %v2380_v0  ;;  %v2730_v40 = vmul.f32 %v5645_v41, %v2698_v19 }
 0x20b   : > { %v2475_v52 = vmul.f32 1.0614054, %v5709_v28  ;;  %v2178_v62 = vadd.f32 %v2146_v50, %v2110_v44  ;;  %v2214_v61 = vmul.f32 %v4776_v57, %v5704_v34  ;;  %v4045_v13 = vpop.eup %4044  ;;  %v3017_v20 = vsel %vm2953_vm7, %v2985_v3, %v2921_v21 }
 0x20c   : > { %v1754_v39 = vmul.f32 %v4759_v42, %v5653_v47  ;;  %4046 = vrcp.f32 %v2412_v58  ;;  %v1718_v63 = vadd.f32 %v6998_v11, %v1650_v38  ;;  %v3049_v29 = vmul.f32 0.5, %v3017_v20 }
 0x20d   : > { %v2890_v30 = vmul.f32 %v4045_v13, %v2730_v40  ;;  %v2507_v2 = vadd.f32 -1.4531521, %v2475_v52  ;;  %v2246_v41 = vadd.f32 %v2214_v61, %v2178_v62  ;;  %4048 = vpow2.f32 %v2834_v8 }
 0x20e   : > { %v7000_v51 = vrot.slane %v6999_v18, 1  ;;  %v7002_v43 = vrot.slane %v7001_v17, 1  ;;  %v1786_v35 = vadd.f32 %v1754_v39, %v1718_v63  ;;  %v2079_v1 = vmul.f32 %v4774_v56, %v5014_v27 }
 0x20f   : > { %v3081_v9 = vadd.f32 0.5, %v3049_v29  ;;  %v2922_v45 = vsub.f32 1.0, %v2890_v30  ;;  %v2539_v33 = vmul.f32 %v5709_v28, %v2507_v2  ;;  %v5731_v31 = vadd.f32 %v5226_v46, %v2246_v41 }
 0x210   : > { %v5725_v6 = vsel %vm1046_vm1, %v7002_v43, %v7000_v51  ;;  %v2764_v24 = vsub.f32 0.0, %v2348_v54  ;;  %v1619_v5 = vmul.f32 %v4754_v37, %v5686_v32  ;;  %v2111_v21 = vadd.f32 %v2079_v1, %v1786_v35 }
 0x211   : > { %v2147_v0 = vmul.f32 %v4762_v48, %v7001_v17  ;;  %v3113_v16 = vmul.f32 %v3081_v9, %v5530_v36  ;;  %v2986_v19 = vsub.f32 0.0, %v2922_v45  ;;  %v2571_v44 = vadd.f32 1.4214138, %v2539_v33 }
 0x212   : > { %v5739_v27 = vmul.f32 0.70710677, %v5731_v31  ;;  %v5743_v50 = vmul.f32 %v4762_v48, %v5290_v10  ;;  %vm2954_vm8 = vcmp.lt.f32.partialorder %v5567_v60, 0.0  ;;  %v2215_v38 = vmul.f32 %v4776_v57, %v5725_v6 }
 0x213   : > { %v2179_v4 = vadd.f32 %v2147_v0, %v2111_v21  ;;  %v5750_v3 = vmul.f32 %v4754_v37, %v5473_v49  ;;  %3865 = vmatmul.mubr.f32.gmra.mxu1 %v3113_v16  ;;  %v3018_v36 = vsel %vm2954_vm8, %v2986_v19, %v2922_v45  ;;  %v2603_v8 = vmul.f32 %v5709_v28, %v2571_v44 }
 0x214   : > { %v2349_v58 = vand.u32 2147483647, %v5739_v27  ;;  %v3050_v40 = vmul.f32 0.5, %v3018_v36  ;;  %v1295_v52 = vmul.f32 %v4740_v22, %v5653_v47  ;;  %v1651_v60 = vadd.f32 %v1619_v5, %v1326_v25  ;;  %v7005_v47 = vld [vmem:[#allocation34_spill] sm:$0xff] }
 0x215   : > { %v2247_v62 = vadd.f32 %v2215_v38, %v2179_v4  ;;  %v2635_v61 = vadd.f32 -0.28449672, %v2603_v8  ;;  %v2796_v13 = vmul.f32 %v2764_v24, %v2348_v54  ;;  %v7003_v39 = vrot.slane %v6999_v18, 7  ;;  %v7006_v54 = vld [vmem:[#allocation58_spill] sm:$0xff]  ;;  %v7008_v38 = vld [vmem:[#allocation48_spill] sm:$0xff] }
 0x216   : > { %v2381_v20 = vmul.f32 0.3275911, %v2349_v58  ;;  %v7004_v11 = vrot.slane %v7001_v17, 7  ;;  %v3082_v29 = vadd.f32 0.5, %v3050_v40  ;;  %v1755_v30 = vmul.f32 %v4759_v42, %v5704_v34  ;;  %v7009_v8 = vld [vmem:[#allocation60_spill] sm:$0xff] }
 0x217   : > { %v5766_v2 = vadd.f32 %v5226_v46, %v2247_v62  ;;  %v1719_v41 = vadd.f32 %v7005_v47, %v1651_v60  ;;  %v2667_v25 = vmul.f32 %v5709_v28, %v2635_v61  ;;  %v1327_v51 = vadd.f32 %v1295_v52, %v7006_v54 }
 0x218   : > { %v5761_v63 = vsel %vm949_vm0, %v7004_v11, %v7003_v39  ;;  %v1160_v43 = vmul.f32 %v4723_v12, %v5686_v32  ;;  %v2413_v17 = vadd.f32 1.0, %v2381_v20  ;;  %v3114_v35 = vmul.f32 %v3082_v29, %v5559_v53  ;;  %v7010_v39 = vld [vmem:[#allocation41_spill] sm:$0xff] }
 0x219   : > { %v5775_v1 = vmul.f32 0.70710677, %v5766_v2  ;;  %v1787_v9 = vadd.f32 %v1755_v30, %v1719_v41  ;;  %v2080_v45 = vmul.f32 %v4774_v56, %v5761_v63  ;;  %v5779_v33 = vpop.eup %4046  ;;  %v2699_v24 = vadd.f32 0.2548296, %v2667_v25 }
 0x21a   : > { %v2836_v5 = vmul.f32 1.442695, %v2796_v13  ;;  %4050 = vrcp.f32 %v2413_v17  ;;  %v7007_v21 = vrot.slane %v6999_v18, 1  ;;  %3867 = vmatprep.mubr.f32.mxu1 %v3114_v35  ;;  %v2476_v53 = vmul.f32 1.0614054, %v5779_v33  ;;  %v4049_v44 = vpop.eup %4048  ;;  %v7011_v17 = vld [vmem:[#allocation42_spill] sm:$0xff] }
 0x21b   : > { %v2350_v32 = vand.u32 2147483647, %v5775_v1  ;;  %v2112_v16 = vadd.f32 %v2080_v45, %v1787_v9  ;;  %v2148_v19 = vmul.f32 %v4762_v48, %v6999_v18  ;;  %v2731_v4 = vmul.f32 %v5709_v28, %v2699_v24  ;;  %v7013_v9 = vld [vmem:[#allocation43_spill] sm:$0xff] }
 0x21c   : > { %v5784_v0 = vsel %vm1046_vm1, %v7007_v21, 0.0  ;;  %vm2955_vm9 = vcmp.lt.f32.partialorder %v5629_v55, 0.0  ;;  %v1260_v36 = vadd.f32 %v7008_v38, %v1160_v43  ;;  %v1652_v40 = vadd.f32 %v7009_v8, %v1327_v51 }
 0x21d   : > { %v2508_v52 = vadd.f32 -1.4531521, %v2476_v53  ;;  %v2382_v62 = vmul.f32 0.3275911, %v2350_v32  ;;  %v2180_v60 = vadd.f32 %v2148_v19, %v2112_v16  ;;  %v2216_v61 = vmul.f32 %v4776_v57, %v5784_v0 }
 0x21e   : > { %v2891_v13 = vmul.f32 %v4049_v44, %v2731_v4  ;;  %v2765_v20 = vsub.f32 0.0, %v2349_v58  ;;  %v1756_v18 = vmul.f32 %v4759_v42, %v5725_v6  ;;  %v1720_v11 = vadd.f32 %v7010_v39, %v1652_v40 }
 0x21f   : > { %v2540_v28 = vmul.f32 %v5779_v33, %v2508_v52  ;;  %4052 = vpow2.f32 %v2836_v5  ;;  %v2414_v29 = vadd.f32 1.0, %v2382_v62  ;;  %v2248_v30 = vadd.f32 %v2216_v61, %v2180_v60 }
 0x220   : > { %v2923_v47 = vsub.f32 1.0, %v2891_v13  ;;  %v1296_v41 = vmul.f32 %v4740_v22, %v5704_v34  ;;  %v1788_v25 = vadd.f32 %v1756_v18, %v1720_v11  ;;  %v2081_v54 = vmul.f32 %v4774_v56, %v5061_v23 }
 0x221   : > { %v2572_v51 = vadd.f32 1.4214138, %v2540_v28  ;;  %4054 = vrcp.f32 %v2414_v29  ;;  %v5805_v43 = vadd.f32 %v5226_v46, %v2248_v30  ;;  %v7012_v35 = vrot.slane %v7011_v17, 1 }
 0x222   : > { %v7014_v45 = vrot.slane %v7013_v9, 1  ;;  %v2987_v5 = vsub.f32 0.0, %v2923_v47  ;;  %v2797_v21 = vmul.f32 %v2765_v20, %v2349_v58  ;;  %v2113_v53 = vadd.f32 %v2081_v54, %v1788_v25 }
 0x223   : > { %v2149_v34 = vmul.f32 %v4762_v48, %v7013_v9  ;;  %v2604_v23 = vmul.f32 %v5779_v33, %v2572_v51  ;;  %v1328_v16 = vadd.f32 %v1296_v41, %v1260_v36  ;;  %v1621_v46 = vmul.f32 %v4754_v37, %v5761_v63 }
 0x224   : > { %v5812_v24 = vsel %vm1046_vm1, %v7014_v45, %v7012_v35  ;;  %v5820_v19 = vmul.f32 0.70710677, %v5805_v43  ;;  %v3019_v44 = vsel %vm2955_vm9, %v2987_v5, %v2923_v47  ;;  %v2766_v4 = vsub.f32 0.0, %v2350_v32  ;;  %v7017_v45 = vld [vmem:[#allocation39_spill] sm:$0xff] }
 0x225   : > { %v2181_v38 = vadd.f32 %v2149_v34, %v2113_v53  ;;  %v2217_v58 = vmul.f32 %v4776_v57, %v5812_v24  ;;  %v5828_v8 = vmul.f32 %v4774_v56, %v5327_v14  ;;  %v3051_v40 = vmul.f32 0.5, %v3019_v44 }
 0x226   : > { %v2636_v36 = vadd.f32 -0.28449672, %v2604_v23  ;;  %v5831_v52 = vand.u32 2147483647, %v5820_v19  ;;  %v2838_v62 = vmul.f32 1.442695, %v2797_v21  ;;  %v1297_v60 = vmul.f32 %v4740_v22, %v5725_v6 }
 0x227   : > { %v1162_v55 = vmul.f32 %v4723_v12, %v5761_v63  ;;  %v2249_v61 = vadd.f32 %v2217_v58, %v2181_v38  ;;  %v5837_v13 = vpop.eup %4050  ;;  %v3083_v20 = vadd.f32 0.5, %v3051_v40  ;;  %v1757_v14 = vmul.f32 %v4759_v42, %v5784_v0  ;;  %v5847_v6 = vld [vmem:[%s6753_s6] ss:$0 sm:$0xff]  ;;  %v7018_v21 = vld [vmem:[#allocation64_spill] sm:$0xff]  ;;  %v7019_v58 = vld [vmem:[#allocation55_spill] sm:$0xff] }
 0x228   : > { %v2668_v18 = vmul.f32 %v5779_v33, %v2636_v36  ;;  %v2383_v39 = vmul.f32 0.3275911, %v5831_v52  ;;  %v2477_v11 = vmul.f32 1.0614054, %v5837_v13  ;;  %v2798_v28 = vmul.f32 %v2766_v4, %v2350_v32 }
 0x229   : > { %v5850_v63 = vadd.f32 %v5847_v6, %v2249_v61  ;;  %v1653_v29 = vadd.f32 %v1621_v46, %v1328_v16  ;;  %v3115_v30 = vmul.f32 %v3083_v20, %v5621_v59  ;;  %v7015_v25 = vrot.slane %v7011_v17, 7 }
 0x22a   : > { %v2700_v47 = vadd.f32 0.2548296, %v2668_v18  ;;  %v2415_v41 = vadd.f32 1.0, %v2383_v39  ;;  %v7016_v54 = vrot.slane %v7013_v9, 7  ;;  %vm2956_vm10 = vcmp.lt.f32.partialorder %v5679_v15, 0.0 }
 0x22b   : > { %v2509_v32 = vadd.f32 -1.4531521, %v2477_v11  ;;  %4056 = vpow2.f32 %v2838_v62  ;;  %v5862_v35 = vmul.f32 0.70710677, %v5850_v63  ;;  %v1721_v5 = vadd.f32 %v7017_v45, %v1653_v29  ;;  %3868 = vmatmul.mubr.f32.gmra.mxu1 %v3115_v30  ;;  %v7021_v11 = vld [vmem:[#allocation67_spill] sm:$0xff] }
 0x22c   : > { %v5858_v51 = vsel %vm949_vm0, %v7016_v54, %v7015_v25  ;;  %v2732_v59 = vmul.f32 %v5779_v33, %v2700_v47  ;;  %v1329_v53 = vadd.f32 %v1297_v60, %v7018_v21  ;;  %v1298_v9 = vmul.f32 %v4740_v22, %v5784_v0  ;;  %v4053_v34 = vpop.eup %4052 }
 0x22d   : > { %4058 = vrcp.f32 %v2415_v41  ;;  %v2541_v23 = vmul.f32 %v5837_v13, %v2509_v32  ;;  %v2352_v16 = vand.u32 2147483647, %v5862_v35  ;;  %v1789_v46 = vadd.f32 %v1757_v14, %v1721_v5  ;;  %v7022_v32 = vld [vmem:[#allocation49_spill] sm:$0xff] }
 0x22e   : > { %v2082_v44 = vmul.f32 %v4774_v56, %v5858_v51  ;;  %v2892_v4 = vmul.f32 %v4053_v34, %v2732_v59  ;;  %v2840_v38 = vmul.f32 1.442695, %v2798_v28  ;;  %v1262_v40 = vadd.f32 %v7019_v58, %v1162_v55  ;;  %v5879_v0 = vpop.eup %4054 }
 0x22f   : > { %v7020_v33 = vrot.slane %v7011_v17, 1  ;;  %v2573_v62 = vadd.f32 1.4214138, %v2541_v23  ;;  %v2384_v60 = vmul.f32 0.3275911, %v2352_v16  ;;  %v2150_v20 = vmul.f32 %v4762_v48, %v7011_v17 }
 0x230   : > { %v2114_v61 = vadd.f32 %v2082_v44, %v1789_v46  ;;  %v2924_v18 = vsub.f32 1.0, %v2892_v4  ;;  %v2478_v14 = vmul.f32 1.0614054, %v5879_v0  ;;  %v2767_v39 = vsub.f32 0.0, %v5831_v52 }
 0x231   : > { %v5877_v36 = vsel %vm1046_vm1, %v7020_v33, 0.0  ;;  %v1654_v55 = vadd.f32 %v7021_v11, %v1329_v53  ;;  %v2605_v28 = vmul.f32 %v5837_v13, %v2573_v62  ;;  %v2416_v29 = vadd.f32 1.0, %v2384_v60  ;;  %v7023_v33 = vld [vmem:[#allocation68_spill] sm:$0xff] }
 0x232   : > { %v2182_v30 = vadd.f32 %v2150_v20, %v2114_v61  ;;  %v2218_v47 = vmul.f32 %v4776_v57, %v5877_v36  ;;  %v2988_v41 = vsub.f32 0.0, %v2924_v18  ;;  %v2510_v25 = vadd.f32 -1.4531521, %v2478_v14  ;;  %v7026_v20 = vld [vmem:[#allocation52_spill] sm:$0xff] }
 0x233   : > { %v1330_v54 = vadd.f32 %v1298_v9, %v1262_v40  ;;  %v1722_v45 = vadd.f32 %v7022_v32, %v1654_v55  ;;  %v2637_v17 = vadd.f32 -0.28449672, %v2605_v28  ;;  %v1299_v5 = vmul.f32 %v4740_v22, %v5812_v24 }
 0x234   : > { %4060 = vrcp.f32 %v2416_v29  ;;  %v2250_v59 = vadd.f32 %v2218_v47, %v2182_v30  ;;  %v3020_v21 = vsel %vm2956_vm10, %v2988_v41, %v2924_v18  ;;  %v2542_v53 = vmul.f32 %v5879_v0, %v2510_v25 }
 0x235   : > { %4062 = vpow2.f32 %v2840_v38  ;;  %v1758_v34 = vmul.f32 %v4759_v42, %v5812_v24  ;;  %v3052_v23 = vmul.f32 0.5, %v3020_v21  ;;  %v2669_v9 = vmul.f32 %v5837_v13, %v2637_v17  ;;  %v7024_v24 = vld [vmem:[#allocation50_spill] sm:$0xff] }
 0x236   : > { %v2799_v46 = vmul.f32 %v2767_v39, %v5831_v52  ;;  %v5900_v44 = vadd.f32 %v5847_v6, %v2250_v59  ;;  %v2574_v4 = vadd.f32 1.4214138, %v2542_v53  ;;  %v2768_v58 = vsub.f32 0.0, %v2352_v16 }
 0x237   : > { %v1790_v40 = vadd.f32 %v1758_v34, %v1722_v45  ;;  %v2083_v15 = vmul.f32 %v4774_v56, %v7023_v33  ;;  %v3084_v62 = vadd.f32 0.5, %v3052_v23  ;;  %v2701_v60 = vadd.f32 0.2548296, %v2669_v9  ;;  %v7028_v9 = vld [vmem:[#allocation74_spill] sm:$0xff]  ;;  %v7029_v33 = vld [vmem:[#allocation65_spill] sm:$0xff] }
 0x238   : > { %v5905_v38 = vmul.f32 0.70710677, %v5900_v44  ;;  %v7025_v61 = vrot.slane %v7024_v24, 1  ;;  %v7027_v18 = vrot.slane %v7026_v20, 1  ;;  %v4057_v14 = vpop.eup %4056  ;;  %vm2957_vm11 = vcmp.lt.f32.partialorder %v5739_v27, 0.0 }
 0x239   : > { %v2606_v39 = vmul.f32 %v5879_v0, %v2574_v4  ;;  %v1164_v11 = vmul.f32 %v4723_v12, %v5858_v51  ;;  %v2115_v55 = vadd.f32 %v2083_v15, %v1790_v40  ;;  %v2151_v28 = vmul.f32 %v4762_v48, %v7026_v20 }
 0x23a   : > { %v5912_v52 = vsel %vm1046_vm1, %v7027_v18, %v7025_v61  ;;  %v5920_v29 = vpop.eup %4058  ;;  %v3116_v30 = vmul.f32 %v3084_v62, %v5671_v26  ;;  %v2733_v47 = vmul.f32 %v5837_v13, %v2701_v60  ;;  %v2842_v41 = vmul.f32 1.442695, %v2799_v46 }
 0x23b   : > { %v5925_v25 = vand.u32 2147483647, %v5905_v38  ;;  %v2638_v32 = vadd.f32 -0.28449672, %v2606_v39  ;;  %v2479_v45 = vmul.f32 1.0614054, %v5920_v29  ;;  %v2183_v17 = vadd.f32 %v2151_v28, %v2115_v55 }
 0x23c   : > { %v2219_v59 = vmul.f32 %v4776_v57, %v5912_v52  ;;  %3870 = vmatprep.mubr.f32.mxu1 %v3116_v30  ;;  %v2893_v21 = vmul.f32 %v4057_v14, %v2733_v47  ;;  %v2800_v53 = vmul.f32 %v2768_v58, %v2352_v16  ;;  %v1623_v34 = vmul.f32 %v4754_v37, %v5858_v51 }
 0x23d   : > { %v2385_v26 = vmul.f32 0.3275911, %v5925_v25  ;;  %v2670_v13 = vmul.f32 %v5879_v0, %v2638_v32  ;;  %v2511_v23 = vadd.f32 -1.4531521, %v2479_v45  ;;  %v1331_v46 = vadd.f32 %v1299_v5, %v7028_v9 }
 0x23e   : > { %v2251_v4 = vadd.f32 %v2219_v59, %v2183_v17  ;;  %v2925_v40 = vsub.f32 1.0, %v2893_v21  ;;  %v1264_v15 = vadd.f32 %v7029_v33, %v1164_v11  ;;  %v1759_v62 = vmul.f32 %v4759_v42, %v5877_v36  ;;  %v7033_v17 = vld [vmem:[#allocation47_spill] sm:$0xff] }
 0x23f   : > { %v2417_v60 = vadd.f32 1.0, %v2385_v26  ;;  %v2702_v61 = vadd.f32 0.2548296, %v2670_v13  ;;  %v2543_v16 = vmul.f32 %v5920_v29, %v2511_v23  ;;  %4064 = vpow2.f32 %v2842_v41 }
 0x240   : > { %v5940_v51 = vadd.f32 %v5847_v6, %v2251_v4  ;;  %v2989_v58 = vsub.f32 0.0, %v2925_v40  ;;  %vm2958_vm12 = vcmp.lt.f32.partialorder %v5775_v1, 0.0  ;;  %v2844_v18 = vmul.f32 1.442695, %v2800_v53 }
 0x241   : > { %4066 = vrcp.f32 %v2417_v60  ;;  %v1655_v5 = vadd.f32 %v1623_v34, %v1330_v54  ;;  %v5943_v14 = vpop.eup %4060  ;;  %v2734_v39 = vmul.f32 %v5879_v0, %v2702_v61  ;;  %v2575_v11 = vadd.f32 1.4214138, %v2543_v16 }
 0x242   : > { %v5947_v55 = vmul.f32 0.70710677, %v5940_v51  ;;  %v7030_v28 = vrot.slane %v7024_v24, 7  ;;  %v7031_v30 = vrot.slane %v7026_v20, 7  ;;  %v4063_v41 = vpop.eup %4062  ;;  %v3021_v32 = vsel %vm2957_vm11, %v2989_v58, %v2925_v40 }
 0x243   : > { %v2480_v54 = vmul.f32 1.0614054, %v5943_v14  ;;  %v7032_v45 = vrot.slane %v7024_v24, 1  ;;  %v1723_v59 = vadd.f32 %v7033_v17, %v1655_v5  ;;  %v3053_v21 = vmul.f32 0.5, %v3021_v32 }
 0x244   : > { %v5954_v47 = vsel %vm949_vm0, %v7031_v30, %v7030_v28  ;;  %v2894_v53 = vmul.f32 %v4063_v41, %v2734_v39  ;;  %v2607_v20 = vmul.f32 %v5920_v29, %v2575_v11  ;;  %v2354_v34 = vand.u32 2147483647, %v5947_v55 }
 0x245   : > { %v5962_v0 = vsel %vm1046_vm1, %v7032_v45, 0.0  ;;  %v2512_v26 = vadd.f32 -1.4531521, %v2480_v54  ;;  %v2769_v13 = vsub.f32 0.0, %v5925_v25  ;;  %v1791_v27 = vadd.f32 %v1759_v62, %v1723_v59 }
 0x246   : > { %v2084_v23 = vmul.f32 %v4774_v56, %v5954_v47  ;;  %v3085_v9 = vadd.f32 0.5, %v3053_v21  ;;  %v2926_v4 = vsub.f32 1.0, %v2894_v53  ;;  %v2639_v40 = vadd.f32 -0.28449672, %v2607_v20  ;;  %v7034_v21 = vld [vmem:[#allocation75_spill] sm:$0xff] }
 0x247   : > { %v2386_v33 = vmul.f32 0.3275911, %v2354_v34  ;;  %v2544_v60 = vmul.f32 %v5943_v14, %v2512_v26  ;;  %4068 = vpow2.f32 %v2844_v18  ;;  %v2152_v16 = vmul.f32 %v4762_v48, %v7024_v24 }
 0x248   : > { %v2116_v61 = vadd.f32 %v2084_v23, %v1791_v27  ;;  %v3117_v58 = vmul.f32 %v3085_v9, %v5731_v31  ;;  %v2990_v5 = vsub.f32 0.0, %v2926_v4  ;;  %v2671_v39 = vmul.f32 %v5920_v29, %v2639_v40 }
 0x249   : > { %v2418_v62 = vadd.f32 1.0, %v2386_v33  ;;  %v2576_v11 = vadd.f32 1.4214138, %v2544_v60  ;;  %v1300_v28 = vmul.f32 %v4740_v22, %v5877_v36  ;;  %v2220_v41 = vmul.f32 %v4776_v57, %v5962_v0 }
 0x24a   : > { %v2184_v30 = vadd.f32 %v2152_v16, %v2116_v61  ;;  %3871 = vmatmul.mubr.f32.gmra.mxu1 %v3117_v58  ;;  %v3022_v18 = vsel %vm2958_vm12, %v2990_v5, %v2926_v4  ;;  %v2703_v32 = vadd.f32 0.2548296, %v2671_v39  ;;  %v2801_v24 = vmul.f32 %v2769_v13, %v5925_v25  ;;  %v7036_v58 = vld [vmem:[#allocation77_spill] sm:$0xff] }
 0x24b   : > { %4070 = vrcp.f32 %v2418_v62  ;;  %v3054_v31 = vmul.f32 0.5, %v3022_v18  ;;  %vm2959_vm13 = vcmp.lt.f32.partialorder %v5820_v19, 0.0  ;;  %v2608_v54 = vmul.f32 %v5943_v14, %v2576_v11  ;;  %v7037_v11 = vld [vmem:[#allocation57_spill] sm:$0xff] }
 0x24c   : > { %v2252_v45 = vadd.f32 %v2220_v41, %v2184_v30  ;;  %v2735_v36 = vmul.f32 %v5920_v29, %v2703_v32  ;;  %v1332_v17 = vadd.f32 %v1300_v28, %v1264_v15  ;;  %v1301_v59 = vmul.f32 %v4740_v22, %v5912_v52  ;;  %v4065_v1 = vpop.eup %4064  ;;  %v7035_v15 = vld [vmem:[#allocation56_spill] sm:$0xff]  ;;  %v7039_v30 = vld [vmem:[#allocation59_spill] sm:$0xff] }
 0x24d   : > { %v1656_v53 = vadd.f32 %v7034_v21, %v1331_v46  ;;  %v3086_v20 = vadd.f32 0.5, %v3054_v31  ;;  %v2640_v26 = vadd.f32 -0.28449672, %v2608_v54  ;;  %v1760_v25 = vmul.f32 %v4759_v42, %v5912_v52 }
 0x24e   : > { %v5991_v13 = vadd.f32 %v5847_v6, %v2252_v45  ;;  %v5993_v27 = vpop.eup %4066  ;;  %v2895_v23 = vmul.f32 %v4065_v1, %v2735_v36  ;;  %v2846_v9 = vmul.f32 1.442695, %v2801_v24  ;;  %v2770_v29 = vsub.f32 0.0, %v2354_v34 }
 0x24f   : > { %v1724_v4 = vadd.f32 %v7035_v15, %v1656_v53  ;;  %v3118_v40 = vmul.f32 %v3086_v20, %v5766_v2  ;;  %v2672_v46 = vmul.f32 %v5943_v14, %v2640_v26  ;;  %v2481_v33 = vmul.f32 1.0614054, %v5993_v27  ;;  %v7041_v15 = vld [vmem:[#allocation82_spill] sm:$0xff] }
 0x250   : > { %v6000_v60 = vmul.f32 0.70710677, %v5991_v13  ;;  %v2927_v52 = vsub.f32 1.0, %v2895_v23  ;;  %v1166_v61 = vmul.f32 %v4723_v12, %v5954_v47  ;;  %v2085_v5 = vmul.f32 %v4774_v56, %v7036_v58  ;;  %v7042_v58 = vld [vmem:[#allocation72_spill] sm:$0xff] }
 0x251   : > { %v1792_v16 = vadd.f32 %v1760_v25, %v1724_v4  ;;  %3873 = vmatprep.mubr.f32.mxu1 %v3118_v40  ;;  %v2704_v39 = vadd.f32 0.2548296, %v2672_v46  ;;  %v2513_v62 = vadd.f32 -1.4531521, %v2481_v33  ;;  %v7038_v28 = vrot.slane %v7037_v11, 1 }
 0x252   : > { %v6007_v2 = vand.u32 2147483647, %v6000_v60  ;;  %v7040_v41 = vrot.slane %v7039_v30, 1  ;;  %v2991_v32 = vsub.f32 0.0, %v2927_v52  ;;  %vm2960_vm14 = vcmp.lt.f32.partialorder %v5862_v35, 0.0 }
 0x253   : > { %v2802_v24 = vmul.f32 %v2770_v29, %v2354_v34  ;;  %v2117_v31 = vadd.f32 %v2085_v5, %v1792_v16  ;;  %v2153_v54 = vmul.f32 %v4762_v48, %v7039_v30  ;;  %v2736_v45 = vmul.f32 %v5943_v14, %v2704_v39 }
 0x254   : > { %v6014_v18 = vsel %vm1046_vm1, %v7040_v41, %v7038_v28  ;;  %v2545_v36 = vmul.f32 %v5993_v27, %v2513_v62  ;;  %4072 = vpow2.f32 %v2846_v9  ;;  %v2387_v21 = vmul.f32 0.3275911, %v6007_v2  ;;  %v4069_v53 = vpop.eup %4068 }
 0x255   : > { %v3023_v1 = vsel %vm2959_vm13, %v2991_v32, %v2927_v52  ;;  %v1625_v20 = vmul.f32 %v4754_v37, %v5954_v47  ;;  %v2185_v26 = vadd.f32 %v2153_v54, %v2117_v31  ;;  %v2221_v34 = vmul.f32 %v4776_v57, %v6014_v18 }
 0x256   : > { %v3055_v25 = vmul.f32 0.5, %v3023_v1  ;;  %v2896_v23 = vmul.f32 %v4069_v53, %v2736_v45  ;;  %v2577_v29 = vadd.f32 1.4214138, %v2545_v36  ;;  %v2419_v14 = vadd.f32 1.0, %v2387_v21 }
 0x257   : > { %v1333_v4 = vadd.f32 %v1301_v59, %v7041_v15  ;;  %v2848_v9 = vmul.f32 1.442695, %v2802_v24  ;;  %v1302_v40 = vmul.f32 %v4740_v22, %v5962_v0  ;;  %v2253_v46 = vadd.f32 %v2221_v34, %v2185_v26 }
 0x258   : > { %v6031_v19 = vpop.eup %4070  ;;  %v3087_v33 = vadd.f32 0.5, %v3055_v25  ;;  %v2928_v52 = vsub.f32 1.0, %v2896_v23  ;;  %v2609_v47 = vmul.f32 %v5993_v27, %v2577_v29  ;;  %4074 = vrcp.f32 %v2419_v14 }
 0x259   : > { %v2482_v16 = vmul.f32 1.0614054, %v6031_v19  ;;  %v1266_v5 = vadd.f32 %v7042_v58, %v1166_v61  ;;  %v1761_v39 = vmul.f32 %v4759_v42, %v5962_v0  ;;  %v6039_v59 = vadd.f32 %v5847_v6, %v2253_v46 }
 0x25a   : > { %v3119_v62 = vmul.f32 %v3087_v33, %v5805_v43  ;;  %v2992_v28 = vsub.f32 0.0, %v2928_v52  ;;  %v2641_v41 = vadd.f32 -0.28449672, %v2609_v47  ;;  %v1657_v32 = vadd.f32 %v1625_v20, %v1332_v17  ;;  %v7045_v17 = vld [vmem:[#allocation54_spill] sm:$0xff]  ;;  %v7047_v47 = vld [vmem:[#allocation85_spill] sm:$0xff] }
 0x25b   : > { %v2514_v24 = vadd.f32 -1.4531521, %v2482_v16  ;;  %v1762_v31 = vmul.f32 %v4759_v42, %v6014_v18  ;;  %v6045_v54 = vmul.f32 0.70710677, %v6039_v59  ;;  %v7043_v61 = vrot.slane %v7037_v11, 7 }
 0x25c   : > { %v7044_v45 = vrot.slane %v7039_v30, 7  ;;  %3874 = vmatmul.mubr.f32.gmra.mxu1 %v3119_v62  ;;  %v3024_v43 = vsel %vm2960_vm14, %v2992_v28, %v2928_v52  ;;  %v2673_v36 = vmul.f32 %v5993_v27, %v2641_v41  ;;  %4076 = vpow2.f32 %v2848_v9 }
 0x25d   : > { %v1725_v21 = vadd.f32 %v7045_v17, %v1657_v32  ;;  %v3056_v53 = vmul.f32 0.5, %v3024_v43  ;;  %v2546_v1 = vmul.f32 %v6031_v19, %v2514_v24  ;;  %v2771_v20 = vsub.f32 0.0, %v6007_v2 }
 0x25e   : > { %v982_v0 = vsel %vm949_vm0, %v7044_v45, %v7043_v61  ;;  %v2356_v26 = vand.u32 2147483647, %v6045_v54  ;;  %v2705_v34 = vadd.f32 0.2548296, %v2673_v36  ;;  %v7046_v30 = vrot.slane %v7037_v11, 1 }
 0x25f   : > { %v1793_v35 = vadd.f32 %v1761_v39, %v1725_v21  ;;  %v2086_v23 = vmul.f32 %v4774_v56, %v982_v0  ;;  %v3088_v29 = vadd.f32 0.5, %v3056_v53  ;;  %v2578_v14 = vadd.f32 1.4214138, %v2546_v1  ;;  %v7049_v1 = vld [vmem:[#allocation80_spill] sm:$0xff] }
 0x260   : > { %v6062_v25 = vsel %vm1046_vm1, %v7046_v30, 0.0  ;;  %v2388_v15 = vmul.f32 0.3275911, %v2356_v26  ;;  %v1168_v9 = vmul.f32 %v4723_v12, %v982_v0  ;;  %v2737_v46 = vmul.f32 %v5993_v27, %v2705_v34  ;;  %v7048_v27 = vld [vmem:[#allocation62_spill] sm:$0xff]  ;;  %v7050_v34 = vld [vmem:[#allocation83_spill] sm:$0xff] }
 0x261   : > { %v2118_v33 = vadd.f32 %v2086_v23, %v1793_v35  ;;  %v2154_v52 = vmul.f32 %v4762_v48, %v7037_v11  ;;  %v1658_v16 = vadd.f32 %v7047_v47, %v1333_v4  ;;  %v4073_v58 = vpop.eup %4072  ;;  %v3120_v62 = vmul.f32 %v3088_v29, %v5850_v63  ;;  %v7051_v23 = vld [vmem:[#allocation63_spill] sm:$0xff]  ;;  %v7053_v29 = vld [vmem:[#allocation66_spill] sm:$0xff] }
 0x262   : > { %v2610_v39 = vmul.f32 %v6031_v19, %v2578_v14  ;;  %v2803_v28 = vmul.f32 %v2771_v20, %v6007_v2  ;;  %v2420_v41 = vadd.f32 1.0, %v2388_v15  ;;  %v2897_v32 = vmul.f32 %v4073_v58, %v2737_v46 }
 0x263   : > { %v2186_v24 = vadd.f32 %v2154_v52, %v2118_v33  ;;  %v2222_v61 = vmul.f32 %v4776_v57, %v6062_v25  ;;  %v1726_v45 = vadd.f32 %v7048_v27, %v1658_v16  ;;  %3876 = vmatprep.mubr.f32.mxu1 %v3120_v62  ;;  %vm2961_vm15 = vcmp.lt.f32.partialorder %v5905_v38, 0.0 }
 0x264   : > { %v2642_v11 = vadd.f32 -0.28449672, %v2610_v39  ;;  %v1334_v4 = vadd.f32 %v1302_v40, %v1266_v5  ;;  %4078 = vrcp.f32 %v2420_v41  ;;  %v2929_v43 = vsub.f32 1.0, %v2897_v32 }
 0x265   : > { %v1303_v63 = vmul.f32 %v4740_v22, %v6014_v18  ;;  %v2254_v36 = vadd.f32 %v2222_v61, %v2186_v24  ;;  %v1794_v2 = vadd.f32 %v1762_v31, %v1726_v45  ;;  %v6079_v17 = vpop.eup %4074  ;;  %v2850_v53 = vmul.f32 1.442695, %v2803_v28 }
 0x266   : > { %v2674_v21 = vmul.f32 %v6031_v19, %v2642_v11  ;;  %v1268_v20 = vadd.f32 %v7049_v1, %v1168_v9  ;;  %v2087_v30 = vmul.f32 %v4774_v56, %v7050_v34  ;;  %v2993_v35 = vsub.f32 0.0, %v2929_v43 }
 0x267   : > { %v2483_v40 = vmul.f32 1.0614054, %v6079_v17  ;;  %v6087_v5 = vadd.f32 %v5847_v6, %v2254_v36  ;;  %v7052_v18 = vrot.slane %v7051_v23, 1  ;;  %v7054_v31 = vrot.slane %v7053_v29, 1  ;;  %v7055_v36 = vld [vmem:[#allocation90_spill] sm:$0xff] }
 0x268   : > { %v2706_v15 = vadd.f32 0.2548296, %v2674_v21  ;;  %v2772_v46 = vsub.f32 0.0, %v2356_v26  ;;  %v2119_v33 = vadd.f32 %v2087_v30, %v1794_v2  ;;  %v2155_v9 = vmul.f32 %v4762_v48, %v7053_v29 }
 0x269   : > { %v6094_v14 = vsel %vm1046_vm1, %v7054_v31, %v7052_v18  ;;  %v3025_v52 = vsel %vm2961_vm15, %v2993_v35, %v2929_v43  ;;  %vm2962_vm2 = vcmp.lt.f32.partialorder %v5947_v55, 0.0  ;;  %v2515_v47 = vadd.f32 -1.4531521, %v2483_v40  ;;  %v4077_v62 = vpop.eup %4076 }
 0x26a   : > { %v1627_v16 = vmul.f32 %v4754_v37, %v982_v0  ;;  %v6103_v58 = vmul.f32 0.70710677, %v6087_v5  ;;  %v3057_v39 = vmul.f32 0.5, %v3025_v52  ;;  %v2738_v28 = vmul.f32 %v6031_v19, %v2706_v15 }
 0x26b   : > { %v2187_v41 = vadd.f32 %v2155_v9, %v2119_v33  ;;  %v2223_v32 = vmul.f32 %v4776_v57, %v6094_v14  ;;  %v2547_v24 = vmul.f32 %v6079_v17, %v2515_v47  ;;  %4080 = vpow2.f32 %v2850_v53 }
 0x26c   : > { %v1304_v38 = vmul.f32 %v4740_v22, %v6062_v25  ;;  %v2357_v61 = vand.u32 2147483647, %v6103_v58  ;;  %v3089_v0 = vadd.f32 0.5, %v3057_v39  ;;  %v2898_v27 = vmul.f32 %v4077_v62, %v2738_v28 }
 0x26d   : > { %v2804_v45 = vmul.f32 %v2772_v46, %v2356_v26  ;;  %v2255_v11 = vadd.f32 %v2223_v32, %v2187_v41  ;;  %v2579_v43 = vadd.f32 1.4214138, %v2547_v24  ;;  %v1335_v2 = vadd.f32 %v1303_v63, %v7055_v36  ;;  %v7058_v46 = vld [vmem:[#allocation61_spill] sm:$0xff] }
 0x26e   : > { %v6113_v19 = vadd.f32 %v1304_v38, %v1268_v20  ;;  %v2389_v21 = vmul.f32 0.3275911, %v2357_v61  ;;  %v3121_v1 = vmul.f32 %v3089_v0, %v5900_v44  ;;  %v2930_v34 = vsub.f32 1.0, %v2898_v27 }
 0x26f   : > { %v6117_v53 = vadd.f32 %v5847_v6, %v2255_v11  ;;  %v1659_v30 = vadd.f32 %v1627_v16, %v1334_v4  ;;  %v2611_v35 = vmul.f32 %v6079_v17, %v2579_v43  ;;  %v1763_v40 = vmul.f32 %v4759_v42, %v6062_v25 }
 0x270   : > { %v2421_v26 = vadd.f32 1.0, %v2389_v21  ;;  %v7056_v18 = vrot.slane %v7051_v23, 7  ;;  %v7057_v63 = vrot.slane %v7053_v29, 7  ;;  %3877 = vmatmul.mubr.f32.gmra.mxu1 %v3121_v1  ;;  %v2994_v31 = vsub.f32 0.0, %v2930_v34  ;;  %v7060_v1 = vld [vmem:[#allocation89_spill] sm:$0xff] }
 0x271   : > { %v2852_v44 = vmul.f32 1.442695, %v2804_v45  ;;  %v6128_v15 = vmul.f32 0.70710677, %v6117_v53  ;;  %v1727_v4 = vadd.f32 %v7058_v46, %v1659_v30  ;;  %v6131_v33 = vpop.eup %4078  ;;  %v2643_v9 = vadd.f32 -0.28449672, %v2611_v35 }
 0x272   : > { %v985_v20 = vsel %vm949_vm0, %v7057_v63, %v7056_v18  ;;  %4082 = vrcp.f32 %v2421_v26  ;;  %v1305_v25 = vmul.f32 %v4740_v22, %v6094_v14  ;;  %v7059_v52 = vrot.slane %v7051_v23, 1  ;;  %v7061_v18 = vld [vmem:[#allocation91_spill] sm:$0xff] }
 0x273   : > { %v3026_v47 = vsel %vm2962_vm2, %v2994_v31, %v2930_v34  ;;  %v2484_v16 = vmul.f32 1.0614054, %v6131_v33  ;;  %v2358_v62 = vand.u32 2147483647, %v6128_v15  ;;  %v1170_v39 = vmul.f32 %v4723_v12, %v985_v20 }
 0x274   : > { %v1138_v29 = vsel %vm1046_vm1, %v7059_v52, 0.0  ;;  %v3058_v28 = vmul.f32 0.5, %v3026_v47  ;;  %v2675_v41 = vmul.f32 %v6079_v17, %v2643_v9  ;;  %v1795_v32 = vadd.f32 %v1763_v40, %v1727_v4  ;;  %v7062_v47 = vld [vmem:[#allocation70_spill] sm:$0xff] }
 0x275   : > { %v2088_v24 = vmul.f32 %v4774_v56, %v985_v20  ;;  %v2516_v38 = vadd.f32 -1.4531521, %v2484_v16  ;;  %4084 = vpow2.f32 %v2852_v44  ;;  %v2773_v0 = vsub.f32 0.0, %v2357_v61 }
 0x276   : > { %v2390_v27 = vmul.f32 0.3275911, %v2358_v62  ;;  %v3090_v45 = vadd.f32 0.5, %v3058_v28  ;;  %v2707_v11 = vadd.f32 0.2548296, %v2675_v41  ;;  %v2156_v43 = vmul.f32 %v4762_v48, %v7051_v23 }
 0x277   : > { %v2120_v55 = vadd.f32 %v2088_v24, %v1795_v32  ;;  %vm2963_vm3 = vcmp.lt.f32.partialorder %v6000_v60, 0.0  ;;  %v2548_v36 = vmul.f32 %v6131_v33, %v2516_v38  ;;  %v1270_v34 = vadd.f32 %v7060_v1, %v1170_v39  ;;  %v7064_v32 = vld [vmem:[#allocation96_spill] sm:$0xff] }
 0x278   : > { %v2422_v21 = vadd.f32 1.0, %v2390_v27  ;;  %v2224_v30 = vmul.f32 %v4776_v57, %v1138_v29  ;;  %v3122_v35 = vmul.f32 %v3090_v45, %v5940_v51  ;;  %v2739_v40 = vmul.f32 %v6079_v17, %v2707_v11  ;;  %v4081_v31 = vpop.eup %4080  ;;  %v7063_v17 = vld [vmem:[#allocation98_spill] sm:$0xff]  ;;  %v7065_v11 = vld [vmem:[#allocation71_spill] sm:$0xff] }
 0x279   : > { %v2188_v26 = vadd.f32 %v2156_v43, %v2120_v55  ;;  %v1660_v63 = vadd.f32 %v7061_v18, %v1335_v2  ;;  %v2580_v44 = vadd.f32 1.4214138, %v2548_v36  ;;  %v2805_v46 = vmul.f32 %v2773_v0, %v2357_v61  ;;  %v7067_v43 = vld [vmem:[#allocation73_spill] sm:$0xff] }
 0x27a   : > { %4086 = vrcp.f32 %v2422_v21  ;;  %v1629_v23 = vmul.f32 %v4754_v37, %v985_v20  ;;  %3879 = vmatprep.mubr.f32.mxu1 %v3122_v35  ;;  %v2899_v4 = vmul.f32 %v4081_v31, %v2739_v40  ;;  %v1764_v9 = vmul.f32 %v4759_v42, %v6094_v14  ;;  %v7069_v40 = vld [vmem:[#allocation69_spill] sm:$0xff] }
 0x27b   : > { %v2256_v52 = vadd.f32 %v2224_v30, %v2188_v26  ;;  %v1728_v16 = vadd.f32 %v7062_v47, %v1660_v63  ;;  %v2612_v51 = vmul.f32 %v6131_v33, %v2580_v44  ;;  %v6160_v39 = vadd.f32 %v1305_v25, %v7063_v17 }
 0x27c   : > { %v2774_v2 = vsub.f32 0.0, %v2358_v62  ;;  %v1306_v28 = vmul.f32 %v4740_v22, %v1138_v29  ;;  %v2931_v61 = vsub.f32 1.0, %v2899_v4  ;;  %v2089_v24 = vmul.f32 %v4774_v56, %v7064_v32 }
 0x27d   : > { %v6164_v41 = vadd.f32 %v5847_v6, %v2256_v52  ;;  %v1796_v20 = vadd.f32 %v1764_v9, %v1728_v16  ;;  %v2644_v14 = vadd.f32 -0.28449672, %v2612_v51  ;;  %v2854_v38 = vmul.f32 1.442695, %v2805_v46 }
 0x27e   : > { %v6168_v0 = vadd.f32 %v1306_v28, %v1270_v34  ;;  %v1661_v27 = vadd.f32 %v1629_v23, %v6113_v19  ;;  %v2995_v45 = vsub.f32 0.0, %v2931_v61  ;;  %v7066_v55 = vrot.slane %v7065_v11, 1 }
 0x27f   : > { %v6172_v25 = vmul.f32 0.70710677, %v6164_v41  ;;  %v7068_v36 = vrot.slane %v7067_v43, 1  ;;  %v2121_v1 = vadd.f32 %v2089_v24, %v1796_v20  ;;  %v6179_v30 = vpop.eup %4082  ;;  %v2676_v35 = vmul.f32 %v6131_v33, %v2644_v14 }
 0x280   : > { %v1765_v34 = vmul.f32 %v4759_v42, %v1138_v29  ;;  %v2157_v19 = vmul.f32 %v4762_v48, %v7067_v43  ;;  %v1729_v26 = vadd.f32 %v7069_v40, %v1661_v27  ;;  %v3027_v18 = vsel %vm2963_vm3, %v2995_v45, %v2931_v61 }
 0x281   : > { %v1085_v21 = vsel %vm1046_vm1, %v7068_v36, %v7066_v55  ;;  %v2485_v63 = vmul.f32 1.0614054, %v6179_v30  ;;  %v2806_v31 = vmul.f32 %v2774_v2, %v2358_v62  ;;  %v6190_v44 = vand.u32 2147483647, %v6172_v25 }
 0x282   : > { %v3059_v46 = vmul.f32 0.5, %v3027_v18  ;;  %v2708_v23 = vadd.f32 0.2548296, %v2676_v35  ;;  %v2189_v4 = vadd.f32 %v2157_v19, %v2121_v1  ;;  %v2225_v9 = vmul.f32 %v4776_v57, %v1085_v21  ;;  %v4085_v29 = vpop.eup %4084 }
 0x283   : > { %vm2964_vm4 = vcmp.lt.f32.partialorder %v6045_v54, 0.0  ;;  %v2517_v52 = vadd.f32 -1.4531521, %v2485_v63  ;;  %4088 = vpow2.f32 %v2854_v38  ;;  %v2391_v47 = vmul.f32 0.3275911, %v6190_v44  ;;  %v7076_v54 = vld [vmem:[#allocation95_spill] sm:$0xff] }
 0x284   : > { %v7070_v60 = vrot.slane %v7065_v11, 7  ;;  %v7071_v16 = vrot.slane %v7067_v43, 7  ;;  %v3091_v51 = vadd.f32 0.5, %v3059_v46  ;;  %v2740_v17 = vmul.f32 %v6131_v33, %v2708_v23  ;;  %v7072_v43 = vld [vmem:[#allocation108_spill] sm:$0xff] }
 0x285   : > { %v1307_v2 = vmul.f32 %v4740_v22, %v1085_v21  ;;  %v2257_v28 = vadd.f32 %v2225_v9, %v2189_v4  ;;  %v2549_v61 = vmul.f32 %v6179_v30, %v2517_v52  ;;  %v2856_v20 = vmul.f32 1.442695, %v2806_v31 }
 0x286   : > { %v6200_v62 = vsel %vm949_vm0, %v7071_v16, %v7070_v60  ;;  %v2423_v32 = vadd.f32 1.0, %v2391_v47  ;;  %v1797_v24 = vadd.f32 %v1765_v34, %v1729_v26  ;;  %v3123_v14 = vmul.f32 %v3091_v51, %v5991_v13  ;;  %v7074_v47 = vld [vmem:[#allocation100_spill] sm:$0xff] }
 0x287   : > { %v2900_v38 = vmul.f32 %v4085_v29, %v2740_v17  ;;  %v6207_v27 = vadd.f32 %v5847_v6, %v2257_v28  ;;  %v2090_v45 = vmul.f32 %v4774_v56, %v6200_v62  ;;  %v6211_v55 = vpop.eup %4086  ;;  %v2581_v33 = vadd.f32 1.4214138, %v2549_v61 }
 0x288   : > { %4090 = vrcp.f32 %v2423_v32  ;;  %v6214_v36 = vadd.f32 %v1307_v2, %v7072_v43  ;;  %v7073_v1 = vrot.slane %v7065_v11, 1  ;;  %3880 = vmatmul.mubr.f32.gmra.mxu1 %v3123_v14  ;;  %v2486_v34 = vmul.f32 1.0614054, %v6211_v55  ;;  %v7075_v14 = vld [vmem:[#allocation78_spill] sm:$0xff] }
 0x289   : > { %v2932_v13 = vsub.f32 1.0, %v2900_v38  ;;  %v6221_v19 = vmul.f32 0.70710677, %v6207_v27  ;;  %v2122_v40 = vadd.f32 %v2090_v45, %v1797_v24  ;;  %v2613_v26 = vmul.f32 %v6179_v30, %v2581_v33 }
 0x28a   : > { %v1139_v35 = vsel %vm1046_vm1, %v7073_v1, 0.0  ;;  %4092 = vpow2.f32 %v2856_v20  ;;  %v1766_v18 = vmul.f32 %v4759_v42, %v1085_v21  ;;  %v2158_v63 = vmul.f32 %v4762_v48, %v7065_v11 }
 0x28b   : > { %v2996_v31 = vsub.f32 0.0, %v2932_v13  ;;  %v2518_v46 = vadd.f32 -1.4531521, %v2486_v34  ;;  %v2360_v23 = vand.u32 2147483647, %v6221_v19  ;;  %v1172_v4 = vmul.f32 %v4723_v12, %v6200_v62 }
 0x28c   : > { %v2645_v9 = vadd.f32 -0.28449672, %v2613_v26  ;;  %v2190_v29 = vadd.f32 %v2158_v63, %v2122_v40  ;;  %v2226_v52 = vmul.f32 %v4776_v57, %v1139_v35  ;;  %v1662_v60 = vadd.f32 %v7074_v47, %v6160_v39  ;;  %v7078_v47 = vld [vmem:[#allocation79_spill] sm:$0xff] }
 0x28d   : > { %v3028_v21 = vsel %vm2964_vm4, %v2996_v31, %v2932_v13  ;;  %v2550_v16 = vmul.f32 %v6211_v55, %v2518_v46  ;;  %v2775_v11 = vsub.f32 0.0, %v6190_v44  ;;  %v2392_v51 = vmul.f32 0.3275911, %v2360_v23  ;;  %v7077_v46 = vld [vmem:[#allocation105_spill] sm:$0xff] }
 0x28e   : > { %v3060_v17 = vmul.f32 0.5, %v3028_v21  ;;  %v2677_v2 = vmul.f32 %v6179_v30, %v2645_v9  ;;  %v1308_v28 = vmul.f32 %v4740_v22, %v1139_v35  ;;  %v2258_v61 = vadd.f32 %v2226_v52, %v2190_v29 }
 0x28f   : > { %v2582_v20 = vadd.f32 1.4214138, %v2550_v16  ;;  %v2424_v32 = vadd.f32 1.0, %v2392_v51  ;;  %v2776_v24 = vsub.f32 0.0, %v2360_v23  ;;  %v1730_v38 = vadd.f32 %v7075_v14, %v1662_v60 }
 0x290   : > { %v3092_v39 = vadd.f32 0.5, %v3060_v17  ;;  %v2709_v45 = vadd.f32 0.2548296, %v2677_v2  ;;  %v1272_v33 = vadd.f32 %v7076_v54, %v1172_v4  ;;  %v6242_v43 = vadd.f32 %v5847_v6, %v2258_v61  ;;  %v4089_v1 = vpop.eup %4088 }
 0x291   : > { %vm2965_vm5 = vcmp.lt.f32.partialorder %v6103_v58, 0.0  ;;  %v2614_v13 = vmul.f32 %v6211_v55, %v2582_v20  ;;  %v2807_v34 = vmul.f32 %v2775_v11, %v6190_v44  ;;  %4094 = vrcp.f32 %v2424_v32  ;;  %v7080_v44 = vld [vmem:[#allocation81_spill] sm:$0xff] }
 0x292   : > { %v1798_v40 = vadd.f32 %v1766_v18, %v1730_v38  ;;  %v3124_v26 = vmul.f32 %v3092_v39, %v6039_v59  ;;  %v2741_v63 = vmul.f32 %v6179_v30, %v2709_v45  ;;  %v6250_v31 = vmul.f32 0.70710677, %v6242_v43 }
 0x293   : > { %v2091_v4 = vmul.f32 %v4774_v56, %v7077_v46  ;;  %v2646_v9 = vadd.f32 -0.28449672, %v2614_v13  ;;  %v2808_v29 = vmul.f32 %v2776_v24, %v2360_v23  ;;  %v1631_v52 = vmul.f32 %v4754_v37, %v6200_v62 }
 0x294   : > { %v7079_v60 = vrot.slane %v7078_v47, 1  ;;  %v7081_v21 = vrot.slane %v7080_v44, 1  ;;  %3882 = vmatprep.mubr.f32.mxu1 %v3124_v26  ;;  %v2901_v59 = vmul.f32 %v4089_v1, %v2741_v63  ;;  %v1767_v30 = vmul.f32 %v4759_v42, %v1139_v35 }
 0x295   : > { %v2361_v16 = vand.u32 2147483647, %v6250_v31  ;;  %v2123_v11 = vadd.f32 %v2091_v4, %v1798_v40  ;;  %v6263_v51 = vpop.eup %4090  ;;  %v2678_v23 = vmul.f32 %v6211_v55, %v2646_v9  ;;  %v2858_v17 = vmul.f32 1.442695, %v2807_v34 }
 0x296   : > { %v1088_v18 = vsel %vm1046_vm1, %v7081_v21, %v7079_v60  ;;  %v6266_v2 = vadd.f32 %v1308_v28, %v1272_v33  ;;  %v2159_v62 = vmul.f32 %v4762_v48, %v7080_v44  ;;  %v2933_v61 = vsub.f32 1.0, %v2901_v59  ;;  %v7085_v21 = vld [vmem:[#allocation76_spill] sm:$0xff] }
 0x297   : > { %v2487_v20 = vmul.f32 1.0614054, %v6263_v51  ;;  %v2393_v32 = vmul.f32 0.3275911, %v2361_v16  ;;  %v1309_v24 = vmul.f32 %v4740_v22, %v1088_v18  ;;  %v4093_v35 = vpop.eup %4092  ;;  %v2710_v14 = vadd.f32 0.2548296, %v2678_v23 }
 0x298   : > { %v2860_v38 = vmul.f32 1.442695, %v2808_v29  ;;  %v2191_v39 = vadd.f32 %v2159_v62, %v2123_v11  ;;  %v2227_v45 = vmul.f32 %v4776_v57, %v1088_v18  ;;  %v2997_v54 = vsub.f32 0.0, %v2933_v61 }
 0x299   : > { %vm2966_vm6 = vcmp.lt.f32.partialorder %v6128_v15, 0.0  ;;  %v2519_v28 = vadd.f32 -1.4531521, %v2487_v20  ;;  %v2425_v33 = vadd.f32 1.0, %v2393_v32  ;;  %v1663_v1 = vadd.f32 %v1631_v52, %v6168_v0 }
 0x29a   : > { %v2742_v13 = vmul.f32 %v6211_v55, %v2710_v14  ;;  %4096 = vpow2.f32 %v2858_v17  ;;  %v6277_v34 = vadd.f32 %v1309_v24, %v5356_v7  ;;  %v2259_v40 = vadd.f32 %v2227_v45, %v2191_v39 }
 0x29b   : > { %v3029_v26 = vsel %vm2965_vm5, %v2997_v54, %v2933_v61  ;;  %v2551_v63 = vmul.f32 %v6263_v51, %v2519_v28  ;;  %4098 = vrcp.f32 %v2425_v33  ;;  %v1768_v46 = vmul.f32 %v4759_v42, %v1088_v18 }
 0x29c   : > { %v3061_v4 = vmul.f32 0.5, %v3029_v26  ;;  %v2902_v9 = vmul.f32 %v4093_v35, %v2742_v13  ;;  %v6284_v29 = vadd.f32 %v5847_v6, %v2259_v40  ;;  %v7082_v0 = vrot.slane %v7078_v47, 7 }
 0x29d   : > { %v7083_v55 = vrot.slane %v7080_v44, 7  ;;  %v2583_v52 = vadd.f32 1.4214138, %v2551_v63  ;;  %4100 = vpow2.f32 %v2860_v38  ;;  %v7084_v58 = vmov %v7079_v60 }
 0x29e   : > { %v6294_v60 = vsel %vm1046_vm1, %v7084_v58, 0.0  ;;  %v1731_v18 = vadd.f32 %v7085_v21, %v1663_v1  ;;  %v3093_v59 = vadd.f32 0.5, %v3061_v4  ;;  %v2934_v11 = vsub.f32 1.0, %v2902_v9  ;;  %v6300_v17 = vpop.eup %4094  ;;  %v7086_v9 = vld [vmem:[#allocation106_spill] sm:$0xff] }
 0x29f   : > { %v991_v7 = vsel %vm949_vm0, %v7083_v55, %v7082_v0  ;;  %v2777_v23 = vsub.f32 0.0, %v2361_v16  ;;  %v6298_v6 = vmul.f32 0.70710677, %v6284_v29  ;;  %v2615_v44 = vmul.f32 %v6263_v51, %v2583_v52 }
 0x2a0   : > { %v1174_v62 = vmul.f32 %v4723_v12, %v991_v7  ;;  %v1799_v61 = vadd.f32 %v1767_v30, %v1731_v18  ;;  %v2092_v20 = vmul.f32 %v4774_v56, %v991_v7  ;;  %v3125_v32 = vmul.f32 %v3093_v59, %v6087_v5  ;;  %v7088_v59 = vld [vmem:[#allocation86_spill] sm:$0xff] }
 0x2a1   : > { %v2998_v24 = vsub.f32 0.0, %v2934_v11  ;;  %v2488_v35 = vmul.f32 1.0614054, %v6300_v17  ;;  %v2362_v14 = vand.u32 2147483647, %v6298_v6  ;;  %v1310_v39 = vmul.f32 %v4740_v22, %v6294_v60 }
 0x2a2   : > { %v2647_v38 = vadd.f32 -0.28449672, %v2615_v44  ;;  %v2124_v45 = vadd.f32 %v2092_v20, %v1799_v61  ;;  %v2160_v54 = vmul.f32 %v4762_v48, %v7078_v47  ;;  %3883 = vmatmul.mubr.f32.gmra.mxu1 %v3125_v32  ;;  %v2809_v33 = vmul.f32 %v2777_v23, %v2361_v16  ;;  %v7087_v47 = vld [vmem:[#allocation109_spill] sm:$0xff] }
 0x2a3   : > { %v3030_v30 = vsel %vm2966_vm6, %v2998_v24, %v2934_v11  ;;  %v2520_v28 = vadd.f32 -1.4531521, %v2488_v35  ;;  %v2394_v5 = vmul.f32 0.3275911, %v2362_v14  ;;  %v2228_v26 = vmul.f32 %v4776_v57, %v6294_v60 }
 0x2a4   : > { %v3062_v1 = vmul.f32 0.5, %v3030_v30  ;;  %v2679_v13 = vmul.f32 %v6263_v51, %v2647_v38  ;;  %v2192_v40 = vadd.f32 %v2160_v54, %v2124_v45  ;;  %v1274_v0 = vadd.f32 %v7086_v9, %v1174_v62  ;;  %v7090_v30 = vld [vmem:[#allocation87_spill] sm:$0xff] }
 0x2a5   : > { %v2552_v63 = vmul.f32 %v6300_v17, %v2520_v28  ;;  %v2426_v4 = vadd.f32 1.0, %v2394_v5  ;;  %v1664_v55 = vadd.f32 %v7087_v47, %v6214_v36  ;;  %v6322_v16 = vmul.f32 %v4754_v37, %v991_v7  ;;  %v6331_v7 = vld [vmem:[%s6753_s6] ss:$0 sm:$0xff] }
 0x2a6   : > { %v3094_v15 = vadd.f32 0.5, %v3062_v1  ;;  %v2711_v52 = vadd.f32 0.2548296, %v2679_v13  ;;  %v2260_v58 = vadd.f32 %v2228_v26, %v2192_v40  ;;  %vm2967_vm7 = vcmp.lt.f32.partialorder %v6172_v25, 0.0  ;;  %v567_v13 = vld [vmem:[%s4675_s13] sm:$0xff] }
 0x2a7   : > { %v2584_v21 = vadd.f32 1.4214138, %v2552_v63  ;;  %4102 = vrcp.f32 %v2426_v4  ;;  %v2778_v18 = vsub.f32 0.0, %v2362_v14  ;;  %v1732_v11 = vadd.f32 %v7088_v59, %v1664_v55  ;;  %v4097_v23 = vpop.eup %4096  ;;  %3823 = vmatprep.mubr.f32.mxu0 %v567_v13 }
 0x2a8   : > { %v3126_v44 = vmul.f32 %v3094_v15, %v6117_v53  ;;  %v2743_v36 = vmul.f32 %v6263_v51, %v2711_v52  ;;  %v2862_v62 = vmul.f32 1.442695, %v2809_v33  ;;  %v6334_v61 = vadd.f32 %v6331_v7, %v2260_v58  ;;  %v6336_v20 = vpop.eup %4098  ;;  %v7089_v53 = vld [vmem:[#allocation111_spill] sm:$0xff]  ;;  %v7092_v33 = vld [vmem:[#allocation88_spill] sm:$0xff] }
 0x2a9   : > { %v2616_v32 = vmul.f32 %v6300_v17, %v2584_v21  ;;  %v6339_v24 = vadd.f32 %v1310_v39, %v1274_v0  ;;  %v1800_v35 = vadd.f32 %v1768_v46, %v1732_v11  ;;  %v2093_v38 = vmul.f32 %v4774_v56, %v7089_v53  ;;  %v568_v39 = vld [vmem:[%s4675_s13 + $0x8] sm:$0xff]  ;;  %s4413_s13 = smov [#allocation14]  }
 0x2aa   : > { %3885 = vmatprep.mubr.f32.mxu1 %v3126_v44  ;;  %v2903_v51 = vmul.f32 %v4097_v23, %v2743_v36  ;;  %v2489_v45 = vmul.f32 1.0614054, %v6336_v20  ;;  %v6345_v54 = vmul.f32 0.70710677, %v6334_v61  ;;  %v7091_v28 = vrot.slane %v7090_v30, 1  ;;  %v4101_v40 = vpop.eup %4100  ;;  %3824 = vmatmul.mubr.f32.gmra.mxu0 %v568_v39  ;;  %s4312_s15 = sshll.u32 %s4413_s13, 4  ;;  %s4313_s15 = int_to_ptr.vmem [resolvable:$false] %s4312_s15 }
 0x2ab   : > { %v7093_v5 = vrot.slane %v7092_v33, 1  ;;  %v2648_v46 = vadd.f32 -0.28449672, %v2616_v32  ;;  %v2810_v26 = vmul.f32 %v2778_v18, %v2362_v14  ;;  %v2125_v63 = vadd.f32 %v2093_v38, %v1800_v35  ;;  %s4314_s18 = scalar_lea.vmem %s4313_s15, 8192  ;;  %p4315_p10 = scmp.lt.s32.totalorder %s6696_s1, %s4313_s15 }
 0x2ac   : > { %v2161_v4 = vmul.f32 %v4762_v48, %v7092_v33  ;;  %v2935_v9 = vsub.f32 1.0, %v2903_v51  ;;  %v2521_v0 = vadd.f32 -1.4531521, %v2489_v45  ;;  %4104 = vpow2.f32 %v2862_v62  ;;  %p4316_p5 = scmp.lt.s32.totalorder %s4314_s18, %s4308_s3 }
 0x2ad   : > { %v1091_v1 = vsel %vm1046_vm1, %v7093_v5, %v7091_v28  ;;  %v2363_v47 = vand.u32 2147483647, %v6345_v54  ;;  %v2680_v55 = vmul.f32 %v6300_v17, %v2648_v46  ;;  %v7094_v58 = vrot.slane %v7090_v30, 7 }
 0x2ae   : > { %v2193_v15 = vadd.f32 %v2161_v4, %v2125_v63  ;;  %v2229_v52 = vmul.f32 %v4776_v57, %v1091_v1  ;;  %v7095_v14 = vrot.slane %v7092_v33, 7  ;;  %v2999_v18 = vsub.f32 0.0, %v2935_v9  ;;  %v7096_v33 = vld [vmem:[#allocation115_spill] sm:$0xff]  ;;  %p4317_p2 = por %p4316_p5, %p4315_p10 }
 0x2af   : > { %v2553_v59 = vmul.f32 %v6336_v20, %v2521_v0  ;;  %v1769_v11 = vmul.f32 %v4759_v42, %v6294_v60  ;;  %v2395_v23 = vmul.f32 0.3275911, %v2363_v47  ;;  %v2712_v44 = vadd.f32 0.2548296, %v2680_v55 }
 0x2b0   : > { %v994_v21 = vsel %vm949_vm0, %v7095_v14, %v7094_v58  ;;  %v2864_v36 = vmul.f32 1.442695, %v2810_v26  ;;  %v1311_v62 = vmul.f32 %v4740_v22, %v1091_v1  ;;  %v2261_v32 = vadd.f32 %v2229_v52, %v2193_v15  ;;  %v7098_v15 = vld [vmem:[#allocation110_spill] sm:$0xff]  ;;  %p4318_p7 = pnand %p4317_p2, %p4311_p3 }
 0x2b1   : > { %v3031_v35 = vsel %vm2967_vm7, %v2999_v18, %v2935_v9  ;;  %vm2968_vm8 = vcmp.lt.f32.partialorder %v6221_v19, 0.0  ;;  %v2585_v53 = vadd.f32 1.4214138, %v2553_v59  ;;  %v2427_v38 = vadd.f32 1.0, %v2395_v23  ;;  %v7099_v59 = vld [vmem:[#allocation84_spill] sm:$0xff] }
 0x2b2   : > { %v1176_v51 = vmul.f32 %v4723_v12, %v994_v21  ;;  %v3063_v45 = vmul.f32 0.5, %v3031_v35  ;;  %v2744_v28 = vmul.f32 %v6300_v17, %v2712_v44  ;;  %v6374_v60 = vadd.f32 %v1311_v62, %v7096_v33 }
 0x2b3   : > { %v6377_v5 = vadd.f32 %v6331_v7, %v2261_v32  ;;  %v2617_v13 = vmul.f32 %v6336_v20, %v2585_v53  ;;  %4106 = vrcp.f32 %v2427_v38  ;;  %v2779_v25 = vsub.f32 0.0, %v2363_v47  ;;  %v7100_v38 = vld [vmem:[#allocation113_spill] sm:$0xff] }
 0x2b4   : > { %v1770_v39 = vmul.f32 %v4759_v42, %v1091_v1  ;;  %v3095_v46 = vadd.f32 0.5, %v3063_v45  ;;  %v2904_v26 = vmul.f32 %v4101_v40, %v2744_v28  ;;  %v1665_v17 = vadd.f32 %v6322_v16, %v6266_v2  ;;  %v6386_v4 = vpop.eup %4102 }
 0x2b5   : > { %v6382_v63 = vmul.f32 0.70710677, %v6377_v5  ;;  %v2649_v9 = vadd.f32 -0.28449672, %v2617_v13  ;;  %4108 = vpow2.f32 %v2864_v36  ;;  %v7097_v0 = vrot.slane %v7090_v30, 1 }
 0x2b6   : > { %v1276_v52 = vadd.f32 %v7098_v15, %v1176_v51  ;;  %v3127_v1 = vmul.f32 %v3095_v46, %v6164_v41  ;;  %v2936_v40 = vsub.f32 1.0, %v2904_v26  ;;  %v2490_v58 = vmul.f32 1.0614054, %v6386_v4  ;;  %v7101_v46 = vld [vmem:[#allocation93_spill] sm:$0xff] }
 0x2b7   : > { %v6391_v55 = vsel %vm1046_vm1, %v7097_v0, 0.0  ;;  %v2364_v14 = vand.u32 2147483647, %v6382_v63  ;;  %v2681_v2 = vmul.f32 %v6336_v20, %v2649_v9  ;;  %v2811_v16 = vmul.f32 %v2779_v25, %v2363_v47 }
 0x2b8   : > { %v1635_v18 = vmul.f32 %v4754_v37, %v994_v21  ;;  %v1733_v23 = vadd.f32 %v7099_v59, %v1665_v17  ;;  %3886 = vmatmul.mubr.f32.gmra.mxu1 %v3127_v1  ;;  %v3000_v44 = vsub.f32 0.0, %v2936_v40  ;;  %v2522_v36 = vadd.f32 -1.4531521, %v2490_v58  ;;  %v7102_v17 = vld [vmem:[#allocation103_spill] sm:$0xff] }
 0x2b9   : > { %v2396_v62 = vmul.f32 0.3275911, %v2364_v14  ;;  %v2094_v32 = vmul.f32 %v4774_v56, %v994_v21  ;;  %v2713_v35 = vadd.f32 0.2548296, %v2681_v2  ;;  %v2162_v53 = vmul.f32 %v4762_v48, %v7090_v30  ;;  %v4105_v45 = vpop.eup %4104 }
 0x2ba   : > { %v1801_v41 = vadd.f32 %v1769_v11, %v1733_v23  ;;  %v1666_v51 = vadd.f32 %v7100_v38, %v6277_v34  ;;  %v3032_v47 = vsel %vm2968_vm8, %v3000_v44, %v2936_v40  ;;  %vm2969_vm9 = vcmp.lt.f32.partialorder %v6250_v31, 0.0 }
 0x2bb   : > { %v2554_v28 = vmul.f32 %v6386_v4, %v2522_v36  ;;  %v2428_v33 = vadd.f32 1.0, %v2396_v62  ;;  %v2780_v13 = vsub.f32 0.0, %v2364_v14  ;;  %v3064_v25 = vmul.f32 0.5, %v3032_v47 }
 0x2bc   : > { %v2745_v21 = vmul.f32 %v6336_v20, %v2713_v35  ;;  %v2126_v11 = vadd.f32 %v2094_v32, %v1801_v41  ;;  %v1734_v26 = vadd.f32 %v7101_v46, %v1666_v51  ;;  %v2230_v34 = vmul.f32 %v4776_v57, %v6391_v55  ;;  %v7103_v20 = vld [vmem:[#allocation97_spill] sm:$0xff] }
 0x2bd   : > { %v2586_v30 = vadd.f32 1.4214138, %v2554_v28  ;;  %4110 = vrcp.f32 %v2428_v33  ;;  %v2095_v19 = vmul.f32 %v4774_v56, %v7102_v17  ;;  %v3096_v9 = vadd.f32 0.5, %v3064_v25  ;;  %v7106_v17 = vld [vmem:[#allocation94_spill] sm:$0xff] }
 0x2be   : > { %v2905_v0 = vmul.f32 %v4105_v45, %v2745_v21  ;;  %v2194_v15 = vadd.f32 %v2162_v53, %v2126_v11  ;;  %v1802_v1 = vadd.f32 %v1770_v39, %v1734_v26  ;;  %v2866_v58 = vmul.f32 1.442695, %v2811_v16  ;;  %v7104_v53 = vld [vmem:[#allocation104_spill] sm:$0xff] }
 0x2bf   : > { %v2618_v40 = vmul.f32 %v6386_v4, %v2586_v30  ;;  %v2812_v2 = vmul.f32 %v2780_v13, %v2364_v14  ;;  %v2163_v59 = vmul.f32 %v4762_v48, %v7103_v20  ;;  %v3128_v23 = vmul.f32 %v3096_v9, %v6207_v27  ;;  %v7105_v26 = vld [vmem:[#allocation92_spill] sm:$0xff] }
 0x2c0   : > { %v2937_v44 = vsub.f32 1.0, %v2905_v0  ;;  %v2262_v36 = vadd.f32 %v2230_v34, %v2194_v15  ;;  %v2127_v62 = vadd.f32 %v2095_v19, %v1802_v1  ;;  %v6419_v32 = vpop.eup %4106  ;;  %v1312_v41 = vmul.f32 %v4740_v22, %v6391_v55 }
 0x2c1   : > { %v2650_v35 = vadd.f32 -0.28449672, %v2618_v40  ;;  %v2231_v39 = vmul.f32 %v4776_v57, %v7104_v53  ;;  %v1667_v16 = vadd.f32 %v1635_v18, %v6339_v24  ;;  %3888 = vmatprep.mubr.f32.mxu1 %v3128_v23  ;;  %v2491_v38 = vmul.f32 1.0614054, %v6419_v32 }
 0x2c2   : > { %v3001_v14 = vsub.f32 0.0, %v2937_v44  ;;  %v6428_v27 = vadd.f32 %v6331_v7, %v2262_v36  ;;  %v2195_v51 = vadd.f32 %v2163_v59, %v2127_v62  ;;  %v4109_v45 = vpop.eup %4108  ;;  %4112 = vpow2.f32 %v2866_v58 }
 0x2c3   : > { %v2682_v47 = vmul.f32 %v6386_v4, %v2650_v35  ;;  %v2868_v28 = vmul.f32 1.442695, %v2812_v2  ;;  %v6431_v33 = vadd.f32 %v1312_v41, %v1276_v52  ;;  %v2523_v25 = vadd.f32 -1.4531521, %v2491_v38 }
 0x2c4   : > { %v3033_v13 = vsel %vm2969_vm9, %v3001_v14, %v2937_v44  ;;  %v6436_v24 = vmul.f32 0.70710677, %v6428_v27  ;;  %v2263_v18 = vadd.f32 %v2231_v39, %v2195_v51  ;;  %v1771_v46 = vmul.f32 %v4759_v42, %v6391_v55 }
 0x2c5   : > { %v3065_v21 = vmul.f32 0.5, %v3033_v13  ;;  %v2714_v11 = vadd.f32 0.2548296, %v2682_v47  ;;  %v1735_v30 = vadd.f32 %v7105_v26, %v1667_v16  ;;  %vm2970_vm10 = vcmp.lt.f32.partialorder %v6298_v6, 0.0 }
 0x2c6   : > { %v2555_v52 = vmul.f32 %v6419_v32, %v2523_v25  ;;  %v2365_v34 = vand.u32 2147483647, %v6436_v24  ;;  %v6445_v31 = vadd.f32 %v6331_v7, %v2263_v18  ;;  %v7107_v19 = vrot.slane %v7106_v17, 7 }
 0x2c7   : > { %v7108_v9 = vrot.slane %v7103_v20, 7  ;;  %v3097_v15 = vadd.f32 0.5, %v3065_v21  ;;  %v2746_v55 = vmul.f32 %v6386_v4, %v2714_v11  ;;  %4114 = vpow2.f32 %v2868_v28 }
 0x2c8   : > { %v7109_v1 = vrot.slane %v7106_v17, 1  ;;  %v2587_v58 = vadd.f32 1.4214138, %v2555_v52  ;;  %v2397_v2 = vmul.f32 0.3275911, %v2365_v34  ;;  %v2781_v59 = vsub.f32 0.0, %v2365_v34 }
 0x2c9   : > { %v997_v0 = vsel %vm949_vm0, %v7108_v9, %v7107_v19  ;;  %v1803_v23 = vadd.f32 %v1771_v46, %v1735_v30  ;;  %v3129_v44 = vmul.f32 %v3097_v15, %v6242_v43  ;;  %v2906_v36 = vmul.f32 %v4109_v45, %v2746_v55 }
 0x2ca   : > { %v1142_v40 = vsel %vm1046_vm1, %v7109_v1, 0.0  ;;  %v6458_v62 = vmul.f32 0.70710677, %v6445_v31  ;;  %v1178_v20 = vmul.f32 %v4723_v12, %v997_v0  ;;  %v6461_v35 = vpop.eup %4110  ;;  %v2619_v4 = vmul.f32 %v6419_v32, %v2587_v58 }
 0x2cb   : > { %v2429_v41 = vadd.f32 1.0, %v2397_v2  ;;  %v1314_v39 = vmul.f32 %v4740_v22, %v1142_v40  ;;  %v2096_v16 = vmul.f32 %v4774_v56, %v997_v0  ;;  %3889 = vmatmul.mubr.f32.gmra.mxu1 %v3129_v44  ;;  %v2938_v14 = vsub.f32 1.0, %v2906_v36  ;;  %v7112_v44 = vld [vmem:[#allocation102_spill] sm:$0xff] }
 0x2cc   : > { %v2492_v38 = vmul.f32 1.0614054, %v6461_v35  ;;  %v2813_v43 = vmul.f32 %v2781_v59, %v2365_v34  ;;  %v2366_v51 = vand.u32 2147483647, %v6458_v62  ;;  %v2651_v45 = vadd.f32 -0.28449672, %v2619_v4 }
 0x2cd   : > { %4116 = vrcp.f32 %v2429_v41  ;;  %v2128_v47 = vadd.f32 %v2096_v16, %v1803_v23  ;;  %v2164_v12 = vmul.f32 %v4762_v48, %v7106_v17  ;;  %v3002_v28 = vsub.f32 0.0, %v2938_v14  ;;  %v7110_v34 = vld [vmem:[#allocation114_spill] sm:$0xff] }
 0x2ce   : > { %v2524_v13 = vadd.f32 -1.4531521, %v2492_v38  ;;  %v2398_v25 = vmul.f32 0.3275911, %v2366_v51  ;;  %v2782_v18 = vsub.f32 0.0, %v2366_v51  ;;  %v2683_v22 = vmul.f32 %v6419_v32, %v2651_v45 }
 0x2cf   : > { %v1637_v21 = vmul.f32 %v4754_v37, %v997_v0  ;;  %v2196_v11 = vadd.f32 %v2164_v12, %v2128_v47  ;;  %v2232_v46 = vmul.f32 %v4776_v57, %v1142_v40  ;;  %v3034_v26 = vsel %vm2970_vm10, %v3002_v28, %v2938_v14  ;;  %v4113_v17 = vpop.eup %4112  ;;  %v7111_v0 = vld [vmem:[#allocation116_spill] sm:$0xff]  ;;  %v7115_v14 = vld [vmem:[#allocation101_spill] sm:$0xff] }
 0x2d0   : > { %v2556_v30 = vmul.f32 %v6461_v35, %v2524_v13  ;;  %v2430_v52 = vadd.f32 1.0, %v2398_v25  ;;  %v1278_v19 = vadd.f32 %v7110_v34, %v1178_v20  ;;  %v3066_v9 = vmul.f32 0.5, %v3034_v26 }
 0x2d1   : > { %v2715_v15 = vadd.f32 0.2548296, %v2683_v22  ;;  %v2870_v55 = vmul.f32 1.442695, %v2813_v43  ;;  %v2264_v1 = vadd.f32 %v2232_v46, %v2196_v11  ;;  %vm2971_vm0 = vcmp.lt.f32.partialorder %v6345_v54, 0.0  ;;  %v7117_v11 = vld [vmem:[#allocation112_spill] sm:$0xff] }
 0x2d2   : > { %v2588_v58 = vadd.f32 1.4214138, %v2556_v30  ;;  %4118 = vrcp.f32 %v2430_v52  ;;  %v2814_v37 = vmul.f32 %v2782_v18, %v2366_v51  ;;  %v1668_v2 = vadd.f32 %v7111_v0, %v6374_v60  ;;  %v7118_v52 = vld [vmem:[#allocation29_spill] sm:$0xff] }
 0x2d3   : > { %v3098_v6 = vadd.f32 0.5, %v3066_v9  ;;  %v2747_v59 = vmul.f32 %v6419_v32, %v2715_v15  ;;  %v6482_v23 = vadd.f32 %v6331_v7, %v2264_v1  ;;  %v7113_v36 = vrot.slane %v7112_v44, 1 }
 0x2d4   : > { %v7114_v20 = vrot.slane %v5290_v10, 1  ;;  %v2620_v41 = vmul.f32 %v6461_v35, %v2588_v58  ;;  %v1346_v16 = vadd.f32 %v1314_v39, %v1278_v19  ;;  %v1736_v38 = vadd.f32 %v7115_v14, %v1668_v2  ;;  %v4115_v43 = vpop.eup %4114  ;;  %v6521_v2 = vpop.f32.mrf.mxu1 }
 0x2d5   : > { %v1772_v60 = vmul.f32 %v4759_v42, %v7104_v53  ;;  %v3130_v32 = vmul.f32 %v3098_v6, %v6284_v29  ;;  %v2907_v51 = vmul.f32 %v4113_v17, %v2747_v59  ;;  %v1773_v45 = vmul.f32 %v4759_v42, %v1142_v40  ;;  %v7116_v40 = vld [vmem:[#allocation99_spill] sm:$0xff] }
 0x2d6   : > { %v1555_v4 = vsel %vm1046_vm1, %v7114_v20, %v7113_v36  ;;  %v6496_v47 = vmul.f32 0.70710677, %v6482_v23  ;;  %v2652_v10 = vadd.f32 -0.28449672, %v2620_v41  ;;  %v1669_v39 = vadd.f32 %v1637_v21, %v6431_v33 }
 0x2d7   : > { %v1774_v12 = vmul.f32 %v4759_v42, %v1555_v4  ;;  %v1804_v28 = vadd.f32 %v1772_v60, %v1736_v38  ;;  %3891 = vmatprep.mubr.f32.mxu1 %v3130_v32  ;;  %v2939_v13 = vsub.f32 1.0, %v2907_v51  ;;  %4120 = vpow2.f32 %v2870_v55  ;;  %v7121_v60 = vld [vmem:[#allocation30_spill] sm:$0xff] }
 0x2d8   : > { %v2872_v25 = vmul.f32 1.442695, %v2814_v37  ;;  %v2367_v53 = vand.u32 2147483647, %v6496_v47  ;;  %v2684_v29 = vmul.f32 %v6461_v35, %v2652_v10  ;;  %v1737_v22 = vadd.f32 %v7116_v40, %v1669_v39 }
 0x2d9   : > { %v2129_v18 = vadd.f32 %v5828_v8, %v1804_v28  ;;  %v1806_v46 = vadd.f32 %v1774_v12, %v7117_v11  ;;  %v3003_v26 = vsub.f32 0.0, %v2939_v13  ;;  %v2233_v42 = vmul.f32 %v4776_v57, %v1555_v4  ;;  %v6540_v12 = vpop.f32.mrf.mxu1 }
 0x2da   : > { %v2399_v30 = vmul.f32 0.3275911, %v2367_v53  ;;  %v2099_v33 = vmul.f32 %v4774_v56, %v7118_v52  ;;  %v6508_v21 = vpop.eup %4116  ;;  %v2716_v34 = vadd.f32 0.2548296, %v2684_v29  ;;  %v1805_v17 = vadd.f32 %v1773_v45, %v1737_v22 }
 0x2db   : > { %v2197_v19 = vadd.f32 %v5743_v50, %v2129_v18  ;;  %v2098_v8 = vmul.f32 %v4774_v56, %v5473_v49  ;;  %v3035_v9 = vsel %vm2971_vm0, %v3003_v26, %v2939_v13  ;;  %vm2972_vm1 = vcmp.lt.f32.partialorder %v6382_v63, 0.0  ;;  %v7119_v49 = vld [vmem:[#allocation117_spill] sm:$0xff]  ;;  %v7122_v26 = vld [vmem:[#allocation107_spill] sm:$0xff] }
 0x2dc   : > { %v2493_v15 = vmul.f32 1.0614054, %v6508_v21  ;;  %v2431_v55 = vadd.f32 1.0, %v2399_v30  ;;  %v6518_v1 = vmul.f32 0.0, %v4762_v48  ;;  %v3067_v58 = vmul.f32 0.5, %v3035_v9  ;;  %v7120_v48 = vld [vmem:[#allocation118_spill] sm:$0xff] }
 0x2dd   : > { %v2748_v37 = vmul.f32 %v6461_v35, %v2716_v34  ;;  %v2265_v0 = vadd.f32 %v2233_v42, %v2197_v19  ;;  %v2130_v50 = vadd.f32 %v2098_v8, %v1805_v17  ;;  %v2234_v54 = vmul.f32 %v4776_v57, %v7119_v49  ;;  %v7123_v8 = vld [vmem:[#allocation119_spill] sm:$0xff] }
 0x2de   : > { %v2525_v6 = vadd.f32 -1.4531521, %v2493_v15  ;;  %4122 = vrcp.f32 %v2431_v55  ;;  %v2131_v59 = vadd.f32 %v2099_v33, %v1806_v46  ;;  %v3099_v44 = vadd.f32 0.5, %v3067_v58  ;;  %v3863_v33 = vpop.f32.mrf.mxu1 }
 0x2df   : > { %v2908_v36 = vmul.f32 %v4115_v43, %v2748_v37  ;;  %v6526_v20 = vadd.f32 %v6331_v7, %v2265_v0  ;;  %v2198_v4 = vadd.f32 %v7120_v48, %v2130_v50  ;;  %v6529_v41 = vpop.eup %4118  ;;  %v2783_v14 = vsub.f32 0.0, %v2367_v53 }
 0x2e0   : > { %v2557_v35 = vmul.f32 %v6508_v21, %v2525_v6  ;;  %v2199_v38 = vadd.f32 %v6518_v1, %v2131_v59  ;;  %v2235_v32 = vmul.f32 %v4776_v57, %v7121_v60  ;;  %v3131_v51 = vmul.f32 %v3099_v44, %v6334_v61  ;;  %v3239_v49 = vpop.f32.mrf.mxu1 }
 0x2e1   : > { %v2940_v45 = vsub.f32 1.0, %v2908_v36  ;;  %v2494_v43 = vmul.f32 1.0614054, %v6529_v41  ;;  %v6538_v10 = vmul.f32 0.70710677, %v6526_v20  ;;  %v2266_v39 = vadd.f32 %v2234_v54, %v2198_v4 }
 0x2e2   : > { %v2589_v28 = vadd.f32 1.4214138, %v2557_v35  ;;  %v2267_v13 = vadd.f32 %v2235_v32, %v2199_v38  ;;  %v1671_v29 = vadd.f32 %v5750_v3, %v1346_v16  ;;  %3892 = vmatmul.mubr.f32.gmra.mxu1 %v3131_v51  ;;  %4124 = vpow2.f32 %v2872_v25 }
 0x2e3   : > { %v3004_v18 = vsub.f32 0.0, %v2940_v45  ;;  %v2526_v40 = vadd.f32 -1.4531521, %v2494_v43  ;;  %v2368_v22 = vand.u32 2147483647, %v6538_v10  ;;  %v6546_v11 = vadd.f32 %v6331_v7, %v2266_v39 }
 0x2e4   : > { %v2621_v61 = vmul.f32 %v6508_v21, %v2589_v28  ;;  %v6549_v46 = vadd.f32 %v6331_v7, %v2267_v13  ;;  %v1739_v30 = vadd.f32 %v7122_v26, %v1671_v29  ;;  %v4121_v42 = vpop.eup %4120  ;;  %v2815_v52 = vmul.f32 %v2783_v14, %v2367_v53  ;;  %v6579_v28 = vld [vmem:[%s6755_s8] ss:$0 sm:$0xff]  ;;  %v7124_v13 = vld [vmem:[#allocation28_spill] sm:$0xff] }
 0x2e5   : > { %v3036_v3 = vsel %vm2972_vm1, %v3004_v18, %v2940_v45  ;;  %v2558_v16 = vmul.f32 %v6529_v41, %v2526_v40  ;;  %v2400_v25 = vmul.f32 0.3275911, %v2368_v22  ;;  %v6556_v17 = vmul.f32 0.70710677, %v6546_v11  ;;  %v3866_v45 = vpop.f32.mrf.mxu1 }
 0x2e6   : > { %v3068_v34 = vmul.f32 0.5, %v3036_v3  ;;  %v2653_v19 = vadd.f32 -0.28449672, %v2621_v61  ;;  %v1807_v9 = vadd.f32 %v7123_v8, %v1739_v30  ;;  %v6560_v58 = vmul.f32 0.70710677, %v6549_v46 }
 0x2e7   : > { %v2590_v15 = vadd.f32 1.4214138, %v2558_v16  ;;  %v2432_v55 = vadd.f32 1.0, %v2400_v25  ;;  %v6564_v0 = vand.u32 2147483647, %v6556_v17  ;;  %v2784_v4 = vsub.f32 0.0, %v2368_v22  ;;  %v3249_v25 = vpop.f32.mrf.mxu1 }
 0x2e8   : > { %v3100_v37 = vadd.f32 0.5, %v3068_v34  ;;  %v2685_v63 = vmul.f32 %v6508_v21, %v2653_v19  ;;  %v2874_v50 = vmul.f32 1.442695, %v2815_v52  ;;  %v2370_v6 = vand.u32 2147483647, %v6560_v58  ;;  %v7125_v16 = vld [vmem:[#allocation31_spill] sm:$0xff] }
 0x2e9   : > { %v2622_v53 = vmul.f32 %v6529_v41, %v2590_v15  ;;  %4126 = vrcp.f32 %v2432_v55  ;;  %v2401_v44 = vmul.f32 0.3275911, %v6564_v0  ;;  %vm2973_vm11 = vcmp.lt.f32.partialorder %v6436_v24, 0.0 }
 0x2ea   : > { %v3132_v54 = vmul.f32 %v3100_v37, %v6377_v5  ;;  %v2717_v59 = vadd.f32 0.2548296, %v2685_v63  ;;  %v2402_v35 = vmul.f32 0.3275911, %v2370_v6  ;;  %4128 = vpow2.f32 %v2874_v50 }
 0x2eb   : > { %v6570_v36 = vpop.eup %4122  ;;  %v2654_v48 = vadd.f32 -0.28449672, %v2622_v53  ;;  %v2433_v60 = vadd.f32 1.0, %v2401_v44  ;;  %v2100_v29 = vmul.f32 %v4774_v56, %v7124_v13  ;;  %v2785_v26 = vsub.f32 0.0, %v6564_v0 }
 0x2ec   : > { %3894 = vmatprep.mubr.f32.mxu1 %v3132_v54  ;;  %v2749_v14 = vmul.f32 %v6508_v21, %v2717_v59  ;;  %v2495_v38 = vmul.f32 1.0614054, %v6570_v36  ;;  %v2434_v51 = vadd.f32 1.0, %v2402_v35  ;;  %v2816_v21 = vmul.f32 %v2784_v4, %v2368_v22 }
 0x2ed   : > { %v2686_v32 = vmul.f32 %v6529_v41, %v2654_v48  ;;  %4130 = vrcp.f32 %v2433_v60  ;;  %v2786_v30 = vsub.f32 0.0, %v2370_v6  ;;  %v2132_v3 = vadd.f32 %v2100_v29, %v1807_v9 }
 0x2ee   : > { %v2909_v5 = vmul.f32 %v4121_v42, %v2749_v14  ;;  %v2527_v43 = vadd.f32 -1.4531521, %v2495_v38  ;;  %4132 = vrcp.f32 %v2434_v51  ;;  %v2236_v52 = vmul.f32 %v4776_v57, %v7125_v16 }
 0x2ef   : > { %v2718_v39 = vadd.f32 0.2548296, %v2686_v32  ;;  %v4125_v18 = vpop.eup %4124  ;;  %v3235_v22 = vadd.f32 %v6521_v2, %v6579_v28  ;;  %v3230_v19 = vadd.f32 %v6579_v28, %v6540_v12  ;;  %v3245_v8 = vadd.f32 %v3863_v33, %v6579_v28 }
 0x2f0   : > { %v2941_v40 = vsub.f32 1.0, %v2909_v5  ;;  %v2559_v61 = vmul.f32 %v6570_v36, %v2527_v43  ;;  %v2200_v55 = vadd.f32 %v6518_v1, %v2132_v3  ;;  %v3240_v57 = vadd.f32 %v6579_v28, %v3239_v49 }
 0x2f1   : > { %v2750_v42 = vmul.f32 %v6529_v41, %v2718_v39  ;;  %3389 = vst [vmem:[%s6596_s23 + $0x8] sm:$0xff] %v3235_v22  ;;  %v3255_v2 = vadd.f32 %v3866_v45, %v6579_v28  ;;  %3388 = vst [vmem:[%s6596_s23] sm:$0xff] %v3230_v19  ;;  %v3250_v1 = vadd.f32 %v6579_v28, %v3249_v25  ;;  %v2876_v50 = vmul.f32 1.442695, %v2816_v21 }
 0x2f2   : > { %v3005_v34 = vsub.f32 0.0, %v2941_v40  ;;  %v2591_v56 = vadd.f32 1.4214138, %v2559_v61  ;;  %3391 = vst [vmem:[%s6596_s23 + $0x18] sm:$0xff] %v3245_v8  ;;  %v2268_v37 = vadd.f32 %v2236_v52, %v2200_v55  ;;  %3390 = vst [vmem:[%s6596_s23 + $0x10] sm:$0xff] %v3240_v57  ;;  %v2817_v49 = vmul.f32 %v2785_v26, %v6564_v0  ;;  %v3869_v0 = vpop.f32.mrf.mxu1 }
 0x2f3   : > { %v2910_v15 = vmul.f32 %v4125_v18, %v2750_v42  ;;  %3393 = vst [vmem:[%s6596_s23 + $0x28] sm:$0xff] %v3255_v2  ;;  %v2818_v24 = vmul.f32 %v2786_v30, %v2370_v6  ;;  %3392 = vst [vmem:[%s6596_s23 + $0x20] sm:$0xff] %v3250_v1  ;;  %vm2974_vm12 = vcmp.lt.f32.partialorder %v6458_v62, 0.0  ;;  %4134 = vpow2.f32 %v2876_v50 }
 0x2f4   : > { %v3037_v41 = vsel %vm2973_vm11, %v3005_v34, %v2941_v40  ;;  %v2623_v12 = vmul.f32 %v6570_v36, %v2591_v56  ;;  %v6615_v48 = vadd.f32 %v6331_v7, %v2268_v37  ;;  %v3265_v7 = vadd.f32 %v3869_v0, %v6579_v28  ;;  %v3259_v39 = vpop.f32.mrf.mxu1 }
 0x2f5   : > { %v3069_v33 = vmul.f32 0.5, %v3037_v41  ;;  %v2942_v9 = vsub.f32 1.0, %v2910_v15  ;;  %v2878_v5 = vmul.f32 1.442695, %v2817_v49  ;;  %v3260_v40 = vadd.f32 %v6579_v28, %v3259_v39 }
 0x2f6   : > { %v6609_v63 = vpop.eup %4126  ;;  %v2655_v53 = vadd.f32 -0.28449672, %v2623_v12  ;;  %v6621_v60 = vmul.f32 0.70710677, %v6615_v48  ;;  %3395 = vst [vmem:[%s6596_s23 + $0x38] sm:$0xff] %v3265_v7  ;;  %vm2975_vm13 = vcmp.lt.f32.partialorder %v6496_v47, 0.0 }
 0x2f7   : > { %v3101_v54 = vadd.f32 0.5, %v3069_v33  ;;  %v3006_v59 = vsub.f32 0.0, %v2942_v9  ;;  %v2496_v44 = vmul.f32 1.0614054, %v6609_v63  ;;  %v4129_v6 = vpop.eup %4128  ;;  %3394 = vst [vmem:[%s6596_s23 + $0x30] sm:$0xff] %v3260_v40  ;;  %4136 = vpow2.f32 %v2878_v5 }
 0x2f8   : > { %v2687_v4 = vmul.f32 %v6570_v36, %v2655_v53  ;;  %v2371_v43 = vand.u32 2147483647, %v6621_v60  ;;  %vm2976_vm14 = vcmp.lt.f32.partialorder %v6538_v10, 0.0  ;;  %vm2977_vm15 = vcmp.lt.f32.partialorder %v6556_v17, 0.0 }
 0x2f9   : > { %v3133_v35 = vmul.f32 %v3101_v54, %v6428_v27  ;;  %v3038_v14 = vsel %vm2974_vm12, %v3006_v59, %v2942_v9  ;;  %v2528_v38 = vadd.f32 -1.4531521, %v2496_v44  ;;  %v2880_v27 = vmul.f32 1.442695, %v2818_v24 }
 0x2fa   : > { %v3070_v32 = vmul.f32 0.5, %v3038_v14  ;;  %v2719_v51 = vadd.f32 0.2548296, %v2687_v4  ;;  %v4131_v45 = vpop.eup %4130  ;;  %v2403_v30 = vmul.f32 0.3275911, %v2371_v43  ;;  %v2787_v49 = vsub.f32 0.0, %v2371_v43 }
 0x2fb   : > { %3895 = vmatmul.mubr.f32.gmra.mxu1 %v3133_v35  ;;  %v2560_v62 = vmul.f32 %v6609_v63, %v2528_v38  ;;  %v4133_v21 = vpop.eup %4132  ;;  %v2497_v18 = vmul.f32 1.0614054, %v4131_v45  ;;  %4138 = vpow2.f32 %v2880_v27  ;;  %vm2978_vm2 = vcmp.lt.f32.partialorder %v6560_v58, 0.0 }
 0x2fc   : > { %v3102_v13 = vadd.f32 0.5, %v3070_v32  ;;  %v2751_v29 = vmul.f32 %v6570_v36, %v2719_v51  ;;  %v2498_v26 = vmul.f32 1.0614054, %v4133_v21  ;;  %v2435_v25 = vadd.f32 1.0, %v2403_v30 }
 0x2fd   : > { %v2592_v61 = vadd.f32 1.4214138, %v2560_v62  ;;  %v2529_v16 = vadd.f32 -1.4531521, %v2497_v18  ;;  %v2819_v14 = vmul.f32 %v2787_v49, %v2371_v43  ;;  %vm2979_vm3 = vcmp.lt.f32.partialorder %v6621_v60, 0.0 }
 0x2fe   : > { %v3134_v42 = vmul.f32 %v3102_v13, %v6445_v31  ;;  %v2911_v3 = vmul.f32 %v4129_v6, %v2751_v29  ;;  %v2530_v22 = vadd.f32 -1.4531521, %v2498_v26  ;;  %4140 = vrcp.f32 %v2435_v25 }
 0x2ff   : > { %v2624_v52 = vmul.f32 %v6609_v63, %v2592_v61  ;;  %v2561_v36 = vmul.f32 %v4131_v45, %v2529_v16 }
 0x300   : > { %3897 = vmatprep.mubr.f32.mxu1 %v3134_v42  ;;  %v2943_v34 = vsub.f32 1.0, %v2911_v3  ;;  %v2562_v19 = vmul.f32 %v4133_v21, %v2530_v22  ;;  %v4135_v9 = vpop.eup %4134 }
 0x301   : > { %v2656_v56 = vadd.f32 -0.28449672, %v2624_v52  ;;  %v2593_v15 = vadd.f32 1.4214138, %v2561_v36 }
 0x302   : > { %v3007_v8 = vsub.f32 0.0, %v2943_v34  ;;  %v2594_v55 = vadd.f32 1.4214138, %v2562_v19 }
 0x303   : > { %v2688_v31 = vmul.f32 %v6609_v63, %v2656_v56  ;;  %v2625_v2 = vmul.f32 %v4131_v45, %v2593_v15 }
 0x304   : > { %v3039_v57 = vsel %vm2975_vm13, %v3007_v8, %v2943_v34  ;;  %v2626_v1 = vmul.f32 %v4133_v21, %v2594_v55  ;;  %v4137_v38 = vpop.eup %4136 }
 0x305   : > { %v3071_v41 = vmul.f32 0.5, %v3039_v57  ;;  %v2720_v12 = vadd.f32 0.2548296, %v2688_v31  ;;  %v2657_v33 = vadd.f32 -0.28449672, %v2625_v2 }
 0x306   : > { %v2658_v50 = vadd.f32 -0.28449672, %v2626_v1 }
 0x307   : > { %v3103_v37 = vadd.f32 0.5, %v3071_v41  ;;  %v2752_v53 = vmul.f32 %v6609_v63, %v2720_v12  ;;  %v2689_v24 = vmul.f32 %v4131_v45, %v2657_v33 }
 0x308   : > { %v2690_v47 = vmul.f32 %v4133_v21, %v2658_v50  ;;  %v4139_v6 = vpop.eup %4138 }
 0x309   : > { %v3135_v54 = vmul.f32 %v3103_v37, %v6482_v23  ;;  %v2912_v59 = vmul.f32 %v4135_v9, %v2752_v53  ;;  %v2721_v44 = vadd.f32 0.2548296, %v2689_v24  ;;  %v2882_v23 = vmul.f32 1.442695, %v2819_v14 }
 0x30a   : > { %v2722_v35 = vadd.f32 0.2548296, %v2690_v47  ;;  %v3872_v3 = vpop.f32.mrf.mxu1 }
 0x30b   : > { %3898 = vmatmul.mubr.f32.gmra.mxu1 %v3135_v54  ;;  %v2944_v4 = vsub.f32 1.0, %v2912_v59  ;;  %v2753_v0 = vmul.f32 %v4131_v45, %v2721_v44  ;;  %v4141_v7 = vpop.eup %4140  ;;  %4142 = vpow2.f32 %v2882_v23  ;;  %v3275_v52 = vadd.f32 %v3872_v3, %v6579_v28 }
 0x30c   : > { %v2754_v51 = vmul.f32 %v4133_v21, %v2722_v35  ;;  %v2499_v27 = vmul.f32 1.0614054, %v4141_v7  ;;  %v3269_v25 = vpop.f32.mrf.mxu1 }
 0x30d   : > { %v3008_v32 = vsub.f32 0.0, %v2944_v4  ;;  %v2913_v63 = vmul.f32 %v4137_v38, %v2753_v0  ;;  %3397 = vst [vmem:[%s6596_s23 + $0x48] sm:$0xff] %v3275_v52  ;;  %v3270_v36 = vadd.f32 %v6579_v28, %v3269_v25 }
 0x30e   : > { %v2914_v5 = vmul.f32 %v4139_v6, %v2754_v51  ;;  %v2531_v18 = vadd.f32 -1.4531521, %v2499_v27 }
 0x30f   : > { %v3040_v62 = vsel %vm2976_vm14, %v3008_v32, %v2944_v4  ;;  %v2945_v13 = vsub.f32 1.0, %v2913_v63  ;;  %3396 = vst [vmem:[%s6596_s23 + $0x40] sm:$0xff] %v3270_v36 }
 0x310   : > { %v3072_v39 = vmul.f32 0.5, %v3040_v62  ;;  %v2946_v29 = vsub.f32 1.0, %v2914_v5  ;;  %v2563_v43 = vmul.f32 %v4141_v7, %v2531_v18 }
 0x311   : > { %v3009_v61 = vsub.f32 0.0, %v2945_v13 }
 0x312   : > { %v3104_v40 = vadd.f32 0.5, %v3072_v39  ;;  %v3010_v45 = vsub.f32 0.0, %v2946_v29  ;;  %v2595_v42 = vadd.f32 1.4214138, %v2563_v43 }
 0x313   : > { %v3041_v10 = vsel %vm2977_vm15, %v3009_v61, %v2945_v13 }
 0x314   : > { %v3136_v21 = vmul.f32 %v3104_v40, %v6526_v20  ;;  %v3073_v26 = vmul.f32 0.5, %v3041_v10  ;;  %v3042_v30 = vsel %vm2978_vm2, %v3010_v45, %v2946_v29  ;;  %v2627_v17 = vmul.f32 %v4141_v7, %v2595_v42 }
 0x315   : > { %v3074_v16 = vmul.f32 0.5, %v3042_v30 }
 0x316   : > { %3900 = vmatprep.mubr.f32.mxu1 %v3136_v21  ;;  %v3105_v22 = vadd.f32 0.5, %v3073_v26  ;;  %v2659_v56 = vadd.f32 -0.28449672, %v2627_v17 }
 0x317   : > { %v3106_v34 = vadd.f32 0.5, %v3074_v16 }
 0x318   : > { %v3137_v20 = vmul.f32 %v3105_v22, %v6546_v11  ;;  %v2691_v19 = vmul.f32 %v4141_v7, %v2659_v56  ;;  %v4143_v31 = vpop.eup %4142 }
 0x319   : > { %v3138_v58 = vmul.f32 %v3106_v34, %v6549_v46 }
 0x31a   : > { %3901 = vmatmul.mubr.f32.gmra.mxu1 %v3137_v20  ;;  %v2723_v8 = vadd.f32 0.2548296, %v2691_v19 }
 0x31b   : > { %3903 = vmatprep.mubr.f32.mxu1 %v3138_v58 }
 0x31c   : > { %v2755_v15 = vmul.f32 %v4141_v7, %v2723_v8  ;;  %v3875_v41 = vpop.f32.mrf.mxu1 }
 0x31d   : > { %v3285_v46 = vadd.f32 %v3875_v41, %v6579_v28 }
 0x31e   : > { %v2915_v55 = vmul.f32 %v4143_v31, %v2755_v15  ;;  %v3279_v1 = vpop.f32.mrf.mxu1 }
 0x31f   : > { %3399 = vst [vmem:[%s6596_s23 + $0x58] sm:$0xff] %v3285_v46  ;;  %v3280_v33 = vadd.f32 %v6579_v28, %v3279_v1 }
 0x320   : > { %v2947_v57 = vsub.f32 1.0, %v2915_v55 }
 0x321   : > { %3398 = vst [vmem:[%s6596_s23 + $0x50] sm:$0xff] %v3280_v33 }
 0x322   : > { %v3011_v2 = vsub.f32 0.0, %v2947_v57 }
 0x324   : > { %v3043_v11 = vsel %vm2979_vm3, %v3011_v2, %v2947_v57 }
 0x325   : > { %v3075_v12 = vmul.f32 0.5, %v3043_v11 }
 0x327   : > { %v3107_v9 = vadd.f32 0.5, %v3075_v12 }
 0x329   : > { %v3139_v37 = vmul.f32 %v3107_v9, %v6615_v48 }
 0x32b   : > { %3904 = vmatmul.mubr.f32.gmra.mxu1 %v3139_v37 }
 0x330   : > { %v3878_v53 = vpop.f32.mrf.mxu1 }
 0x331   : > { %v3295_v60 = vadd.f32 %v3878_v53, %v6579_v28 }
 0x332   : > { %v3289_v50 = vpop.f32.mrf.mxu1 }
 0x333   : > { %3401 = vst [vmem:[%s6596_s23 + $0x68] sm:$0xff] %v3295_v60  ;;  %v3290_v49 = vadd.f32 %v6579_v28, %v3289_v50 }
 0x335   : > { %3400 = vst [vmem:[%s6596_s23 + $0x60] sm:$0xff] %v3290_v49 }
 0x348   : > { %v3881_v24 = vpop.f32.mrf.mxu1 }
 0x349   : > { %v3305_v54 = vadd.f32 %v3881_v24, %v6579_v28 }
 0x34a   : > { %v3299_v59 = vpop.f32.mrf.mxu1 }
 0x34b   : > { %3403 = vst [vmem:[%s6596_s23 + $0x78] sm:$0xff] %v3305_v54  ;;  %v3300_v48 = vadd.f32 %v6579_v28, %v3299_v59 }
 0x34d   : > { %3402 = vst [vmem:[%s6596_s23 + $0x70] sm:$0xff] %v3300_v48 }
 0x362   : > { %v3884_v47 = vpop.f32.mrf.mxu1 }
 0x363   : > { %v3315_v44 = vadd.f32 %v3884_v47, %v6579_v28 }
 0x364   : > { %v3309_v4 = vpop.f32.mrf.mxu1 }
 0x365   : > { %3405 = vst [vmem:[%s6596_s23 + $0x88] sm:$0xff] %v3315_v44  ;;  %v3310_v35 = vadd.f32 %v6579_v28, %v3309_v4 }
 0x367   : > { %3404 = vst [vmem:[%s6596_s23 + $0x80] sm:$0xff] %v3310_v35 }
 0x36a   : > { %v3825_v14 = vpop.f32.mrf.mxu0 }
 0x36c   : > { %v828_v38 = vpop.f32.mrf.mxu0 }
 0x378   : > { %v3887_v0 = vpop.f32.mrf.mxu1 }
 0x379   : > { %v3325_v6 = vadd.f32 %v3887_v0, %v6579_v28 }
 0x37a   : > { %v3319_v32 = vpop.f32.mrf.mxu1 }
 0x37b   : > { %3407 = vst [vmem:[%s6596_s23 + $0x98] sm:$0xff] %v3325_v6  ;;  %v3320_v51 = vadd.f32 %v6579_v28, %v3319_v32 }
 0x37d   : > { %3406 = vst [vmem:[%s6596_s23 + $0x90] sm:$0xff] %v3320_v51 }
 0x38b   : > { %v3890_v7 = vpop.f32.mrf.mxu1 }
 0x38c   : > { %v3335_v63 = vadd.f32 %v3890_v7, %v6579_v28 }
 0x38d   : > { %v3329_v62 = vpop.f32.mrf.mxu1 }
 0x38e   : > { %3409 = vst [vmem:[%s6596_s23 + $0xa8] sm:$0xff] %v3335_v63  ;;  %v3330_v5 = vadd.f32 %v6579_v28, %v3329_v62 }
 0x390   : > { %3408 = vst [vmem:[%s6596_s23 + $0xa0] sm:$0xff] %v3330_v5 }
 0x3a2   : > { %v3893_v27 = vpop.f32.mrf.mxu1 }
 0x3a3   : > { %v3345_v23 = vadd.f32 %v3893_v27, %v6579_v28 }
 0x3a4   : > { %v3339_v39 = vpop.f32.mrf.mxu1 }
 0x3a5   : > { %3411 = vst [vmem:[%s6596_s23 + $0xb8] sm:$0xff] %v3345_v23  ;;  %v3340_v13 = vadd.f32 %v6579_v28, %v3339_v39 }
 0x3a7   : > { %3410 = vst [vmem:[%s6596_s23 + $0xb0] sm:$0xff] %v3340_v13 }
 0x3bb   : > { %v3896_v29 = vpop.f32.mrf.mxu1 }
 0x3bc   : > { %v3355_v18 = vadd.f32 %v3896_v29, %v6579_v28 }
 0x3bd   : > { %v3349_v40 = vpop.f32.mrf.mxu1 }
 0x3be   : > { %3413 = vst [vmem:[%s6596_s23 + $0xc8] sm:$0xff] %v3355_v18  ;;  %v3350_v61 = vadd.f32 %v6579_v28, %v3349_v40 }
 0x3c0   : > { %3412 = vst [vmem:[%s6596_s23 + $0xc0] sm:$0xff] %v3350_v61 }
 0x3cb   : > { %v3899_v45 = vpop.f32.mrf.mxu1 }
 0x3cc   : > { %v3365_v43 = vadd.f32 %v3899_v45, %v6579_v28 }
 0x3cd   : > { %v3359_v21 = vpop.f32.mrf.mxu1 }
 0x3ce   : > { %3415 = vst [vmem:[%s6596_s23 + $0xd8] sm:$0xff] %v3365_v43  ;;  %v3360_v10 = vadd.f32 %v6579_v28, %v3359_v21 }
 0x3d0   : > { %3414 = vst [vmem:[%s6596_s23 + $0xd0] sm:$0xff] %v3360_v10 }
 0x3da   : > { %v3902_v26 = vpop.f32.mrf.mxu1 }
 0x3db   : > { %v3375_v30 = vadd.f32 %v3902_v26, %v6579_v28 }
 0x3dc   : > { %v3369_v42 = vpop.f32.mrf.mxu1 }
 0x3dd   : > { %3417 = vst [vmem:[%s6596_s23 + $0xe8] sm:$0xff] %v3375_v30  ;;  %v3370_v3 = vadd.f32 %v6579_v28, %v3369_v42 }
 0x3df   : > { %3416 = vst [vmem:[%s6596_s23 + $0xe0] sm:$0xff] %v3370_v3 }
 0x3eb   : > { %v3905_v16 = vpop.f32.mrf.mxu1 }
 0x3ec   : > { %v3385_v52 = vadd.f32 %v3905_v16, %v6579_v28 }
 0x3ed   : > { %v3379_v22 = vpop.f32.mrf.mxu1 }
 0x3ee   : > { %3419 = vst [vmem:[%s6596_s23 + $0xf8] sm:$0xff] %v3385_v52  ;;  %v3380_v17 = vadd.f32 %v6579_v28, %v3379_v22 }
 0x3f0   : > { %3418 = vst [vmem:[%s6596_s23 + $0xf0] sm:$0xff] %v3380_v17 }
 0x3f1   : > { %4321 = shalt.err (!%p4318_p7)
}
 0x3f2   : > { %s4322_s22 = scalar_lea.hbm %s6694_s30, 4096  ;;  %s4326_s27 = scalar_lea.hbm %s7128_s21, 8192 }
 0x3f3   : > { %p4323_p1 = scmp.ne.s32.totalorder %s6694_s30, %s4322_s22  ;;  %p4327_p0 = scmp.lt.s32.totalorder %s6694_s30, %s7128_s21 }
 0x3f4   : > { %p4328_p4 = scmp.lt.s32.totalorder %s4326_s27, %s4322_s22 }
 0x3f5   : > { %p4324_p9 = pnand %p4323_p1, %p4517_p8 }
 0x3f6   : > { %p4329_p11 = por %p4328_p4, %p4327_p0 }
 0x3f7   : > { %p4325_p12 = pneg %p4324_p9 }
 0x3f9   : > { %p4330_p6 = pnand %p4329_p11, %p4325_p12 }
 0x3fb   : > { %4333 = shalt.err (!%p4330_p6)
}
 0x3fc   : > { %s4414_s20 = smov 128   ;;  %s4415_s29 = smov 8  }
 0x3fd   : > { %3924 = dma.vmem_to_hbm [thread:$0]  (%p4517_p8), %s6696_s1, 4096, %s6694_s30, %s3421_s17, %s4414_s20, %s4414_s20, %s4415_s29  }
 0x3fe PF: > { %s7129_s23 = sld [smem:[#allocation20_spill]]  ;;  %p7132_p3 = scmp.ge.s32.totalorder %s4400_s14, 2 }
 0x3ff   : > { %s7130_s5 = sld [smem:[#allocation25_spill]] }
 0x404   : > { %s3452_s12 = sand.u32 1, %s7129_s23  }
 0x405   : > { %p7131_p13 = scmp.ne.s32.totalorder %s7130_s5, 0  ;;  %s3453_s16 = scalar_lea.sflag [#allocation5], %s3452_s12 }
 0x407   : > { %p3947_p10 = pnand %p7132_p3, %p7131_p13 }
 0x409   : > { %p3948_p5 = pneg %p3947_p10 }
 0x40b   : > { %4375 = dma.done.wait (%p3948_p5), %s3453_s16, 4096  }
 0x40c   : > { %4377 = vsyncadd (%p3948_p5), %s3453_s16, 4294963200  ;;  %s30_s14 = sadd.s32 1, %s4400_s14   ;;  %s7133_s19 = sld [smem:[#allocation21_spill]] }
 0x40d   : > { %p27_p2 = scmp.ge.s32.totalorder %s30_s14, 4   ;;  %s7134_s11 = sld [smem:[#allocation27_spill]] }
 0x40e   : > { %s7135_s12 = sld [smem:[#allocation23_spill]]  ;;  %s7137_s30 = smov %s4384_s10 }
 0x40f   : > { %s7136_s13 = sld [smem:[#allocation26_spill]]  ;;  %29 = sbr.rel (!%p27_p2) target bundleno = 15 (0xf), region = 144 }
 0x412   : > { %s7138_s10 = smov %s7133_s19 }
 0x414   :  { %3458 = vsyncpa [#allocation4], 1 }
 0x415   :  { %3460 = vsyncpa [#allocation4 + $0x1], 1 }
 0x416   :  { %3461 = vsyncpa [#allocation7], 1 }
 0x417   :  { %3463 = vsyncpa [#allocation7 + $0x1], 1 }
 0x418   :  { %3464 = vsyncpa [#allocation10], 1 }
 0x419   :  { %3465 = vsyncpa [#allocation13], 1 }
 0x41a   :  { %3466 = vsyncpa [#allocation5], 1 }
 0x41b   :  { %3468 = vsyncpa [#allocation5 + $0x1], 1 }

</bundles_post_ra>
